<compile_context>
chip_gen: v5e
topology: v5e:2x2
jax: 0.10.0
libtpu: 0.0.40
codegen_flags: <defaults>
</compile_context>

<pallas_src>
import jax
import jax.numpy as jnp
from jax import lax
from jax.experimental import pallas as pl
from jax.experimental.pallas import tpu as pltpu

EPS = 1e-5
VMEM_LIMIT = 32 * 1024 * 1024   # explicit; safe on v5e/v6e (128 MiB) and v7x (64 MiB)


def _make_fused_kernel(N, H, W, Cin, Cout, KH, KW):
    HW = H * W

    def kernel(x_ref, w_ref, gamma_ref, beta_ref, o_ref):
        """Fused conv3x3 + BN(train) + ReLU for the whole (VMEM-resident) batch.

        x_ref:     (N, H+2, W+2, Cin)   zero-padded NHWC input
        w_ref:     (KH*KW*Cin, Cout)    weights, tap-major / cin-minor rows
        gamma_ref: (Cout, 1)            BN weight
        beta_ref:  (Cout, 1)            BN bias
        o_ref:     (N, Cout, H*W)       output, channels on sublanes (lane-dense)
        """
        # ---- im2col: fold all taps into K so the MXU sees ONE matmul ----
        cols = []
        for kh in range(KH):
            for kw in range(KW):
                patch = x_ref[:, kh:kh + H, kw:kw + W, :].astype(jnp.float32)
                # (N, H, W, Cin) -> (N*H*W, Cin): leading dims collapse onto the
                # sublane dim (W is a multiple of 8) -> pure vreg renumbering.
                cols.append(patch.reshape(N * HW, Cin))
        im2col = jnp.concatenate(cols, axis=-1)               # (N*HW, KH*KW*Cin)

        # f32 MXU inputs kept on purpose: bf16 would cost ~1e-3 relative error,
        # which the 1e-4 correctness tolerance does not allow.
        y = jnp.dot(im2col, w_ref[...],
                    preferred_element_type=jnp.float32)       # (N*HW, Cout)
        y_t = y.T                                             # (Cout, N*HW) lane-dense

        # ---- training-mode BN statistics while the tile is still in vregs ----
        cnt = jnp.float32(N * HW)
        mean = jnp.sum(y_t, axis=1, keepdims=True) / cnt                    # (Cout,1)
        var = jnp.maximum(
            jnp.sum(y_t * y_t, axis=1, keepdims=True) / cnt - mean * mean, 0.0)
        scale = gamma_ref[...] * lax.rsqrt(var + EPS)                       # (Cout,1)
        shift = beta_ref[...] - mean * scale

        out = jnp.maximum(y_t * scale + shift, 0.0)           # (Cout, N*HW)

        # ---- emit NCHW-compatible (N, Cout, HW); lane slices are 128-aligned ----
        for n in range(N):
            o_ref[n] = out[:, n * HW:(n + 1) * HW].astype(o_ref.dtype)

    return kernel


def conv_block_forward(x_nchw, w_oihw, bias, gamma, beta):
    """Conv2d(3x3, s=1, p=1, bias) + BatchNorm2d(training) + ReLU.

    x_nchw: (N, Cin, H, W) float32. Returns (N, Cout, H, W).
    `bias` is accepted for API parity but unused: a per-channel constant added
    before training-mode BatchNorm is removed exactly by the mean subtraction.
    """
    del bias
    N, Cin, H, W = x_nchw.shape
    Cout, _, KH, KW = w_oihw.shape
    HW = H * W

    # Tiny layout-only host-side ops (XLA fuses transpose+pad on the 8 KB input);
    # the kernel keeps channels on lane/sublane axes and emits NCHW element order.
    x_pad = jnp.pad(jnp.transpose(x_nchw, (0, 2, 3, 1)).astype(jnp.float32),
                    ((0, 0), (1, 1), (1, 1), (0, 0)))          # (N, H+2, W+2, Cin)
    # (Cout, Cin, KH, KW) -> (KH*KW*Cin, Cout): row index = (kh*KW + kw)*Cin + ci,
    # matching the im2col column ordering above.
    wmat = jnp.transpose(w_oihw, (2, 3, 1, 0)).reshape(KH * KW * Cin, Cout)
    wmat = wmat.astype(jnp.float32)
    gamma2 = gamma.astype(jnp.float32).reshape(Cout, 1)
    beta2 = beta.astype(jnp.float32).reshape(Cout, 1)

    kernel = _make_fused_kernel(N, H, W, Cin, Cout, KH, KW)

    # NOTE: single-shot kernel assumes the whole batch fits in VMEM (true here:
    # ~30 KB). For large N*H*W this would split back into a tiled two-pass form.
    out_flat = pl.pallas_call(
        kernel,
        out_shape=jax.ShapeDtypeStruct((N, Cout, HW), x_nchw.dtype),
        grid_spec=pltpu.PrefetchScalarGridSpec(
            num_scalar_prefetch=0,
            grid=(1,),
            in_specs=[
                pl.BlockSpec((N, H + 2, W + 2, Cin), lambda i: (0, 0, 0, 0)),
                pl.BlockSpec((KH * KW * Cin, Cout), lambda i: (0, 0)),
                pl.BlockSpec((Cout, 1), lambda i: (0, 0)),
                pl.BlockSpec((Cout, 1), lambda i: (0, 0)),
            ],
            out_specs=pl.BlockSpec((N, Cout, HW), lambda i: (0, 0, 0)),
        ),
        compiler_params=pltpu.CompilerParams(
            dimension_semantics=("arbitrary",),
            vmem_limit_bytes=VMEM_LIMIT),
    )(x_pad, wmat, gamma2, beta2)

    return out_flat.reshape(N, Cout, H, W)                     # free reshape to NCHW


def reference_forward(x_nchw, w_oihw, bias, gamma, beta):
    y = lax.conv_general_dilated(
        x_nchw, w_oihw, window_strides=(1, 1), padding=((1, 1), (1, 1)),
        dimension_numbers=("NCHW", "OIHW", "NCHW"))
    y = y + bias[None, :, None, None]
    mean = jnp.mean(y, axis=(0, 2, 3), keepdims=True)
    var = jnp.mean((y - mean) ** 2, axis=(0, 2, 3), keepdims=True)
    y = (y - mean) * lax.rsqrt(var + EPS)
    y = y * gamma[None, :, None, None] + beta[None, :, None, None]
    return jnp.maximum(y, 0.0)


if __name__ == "__main__":
    key = jax.random.PRNGKey(0)
    k_x, k_w, k_b, k_g, k_beta = jax.random.split(key, 5)

    N, Cin, Cout, H, W = 2, 4, 8, 16, 16
    KH = KW = 3

    x = jax.random.normal(k_x, (N, Cin, H, W), dtype=jnp.float32)
    # Conv2d parameter shapes: weight (Cout, Cin, 3, 3), bias (Cout,)
    w = jax.random.normal(k_w, (Cout, Cin, KH, KW), dtype=jnp.float32) * 0.1
    b = jax.random.normal(k_b, (Cout,), dtype=jnp.float32) * 0.1
    # BatchNorm2d affine parameters (Cout,)
    gamma = 1.0 + 0.1 * jax.random.normal(k_g, (Cout,), dtype=jnp.float32)
    beta = 0.1 * jax.random.normal(k_beta, (Cout,), dtype=jnp.float32)

    out = conv_block_forward(x, w, b, gamma, beta)
    out = jax.block_until_ready(out)

    ref = reference_forward(x, w, b, gamma, beta)
    assert out.shape == (N, Cout, H, W)
    assert jnp.allclose(out, ref, atol=1e-4, rtol=1e-4), "mismatch vs reference"

    print("KERNEL_OK")
</pallas_src>

<mosaic_0001>
module attributes {stable_mosaic.version = 11 : i64} {
  func.func @kernel(%arg0: i32, %arg1: memref<2x18x18x4xf32, #tpu.memory_space<vmem>>, %arg2: memref<36x8xf32, #tpu.memory_space<vmem>>, %arg3: memref<8x1xf32, #tpu.memory_space<vmem>>, %arg4: memref<8x1xf32, #tpu.memory_space<vmem>>, %arg5: memref<2x8x256xf32, #tpu.memory_space<vmem>>) attributes {dimension_semantics = [#tpu.dimension_semantics<arbitrary>], iteration_bounds = array<i64: 1>, scalar_prefetch = 0 : i64, scratch_operands = 0 : i64, tpu.core_type = #tpu.core_type<tc>, window_params = [{pipeline_mode = #tpu.pipeline_mode<synchronous>, transform_indices = @transform_0, window_bounds = array<i64: 2, 18, 18, 4>}, {pipeline_mode = #tpu.pipeline_mode<synchronous>, transform_indices = @transform_1, window_bounds = array<i64: 36, 8>}, {pipeline_mode = #tpu.pipeline_mode<synchronous>, transform_indices = @transform_2, window_bounds = array<i64: 8, 1>}, {pipeline_mode = #tpu.pipeline_mode<synchronous>, transform_indices = @transform_3, window_bounds = array<i64: 8, 1>}, {pipeline_mode = #tpu.pipeline_mode<synchronous>, transform_indices = @transform_4, window_bounds = array<i64: 2, 8, 256>}]} {
    %c0 = arith.constant 0 : index
    %c0_0 = arith.constant 0 : index
    %c0_1 = arith.constant 0 : index
    %c0_2 = arith.constant 0 : index
    %0 = vector.load %arg1[%c0, %c0_0, %c0_1, %c0_2] : memref<2x18x18x4xf32, #tpu.memory_space<vmem>>, vector<2x16x16x4xf32>
    %1 = vector.shape_cast %0 : vector<2x16x16x4xf32> to vector<512x4xf32>
    %c0_3 = arith.constant 0 : index
    %c0_4 = arith.constant 0 : index
    %c1 = arith.constant 1 : index
    %c0_5 = arith.constant 0 : index
    %2 = vector.load %arg1[%c0_3, %c0_4, %c1, %c0_5] : memref<2x18x18x4xf32, #tpu.memory_space<vmem>>, vector<2x16x16x4xf32>
    %3 = vector.shape_cast %2 : vector<2x16x16x4xf32> to vector<512x4xf32>
    %c0_6 = arith.constant 0 : index
    %c0_7 = arith.constant 0 : index
    %c2 = arith.constant 2 : index
    %c0_8 = arith.constant 0 : index
    %4 = vector.load %arg1[%c0_6, %c0_7, %c2, %c0_8] : memref<2x18x18x4xf32, #tpu.memory_space<vmem>>, vector<2x16x16x4xf32>
    %5 = vector.shape_cast %4 : vector<2x16x16x4xf32> to vector<512x4xf32>
    %c0_9 = arith.constant 0 : index
    %c1_10 = arith.constant 1 : index
    %c0_11 = arith.constant 0 : index
    %c0_12 = arith.constant 0 : index
    %6 = vector.load %arg1[%c0_9, %c1_10, %c0_11, %c0_12] : memref<2x18x18x4xf32, #tpu.memory_space<vmem>>, vector<2x16x16x4xf32>
    %7 = vector.shape_cast %6 : vector<2x16x16x4xf32> to vector<512x4xf32>
    %c0_13 = arith.constant 0 : index
    %c1_14 = arith.constant 1 : index
    %c1_15 = arith.constant 1 : index
    %c0_16 = arith.constant 0 : index
    %8 = vector.load %arg1[%c0_13, %c1_14, %c1_15, %c0_16] : memref<2x18x18x4xf32, #tpu.memory_space<vmem>>, vector<2x16x16x4xf32>
    %9 = vector.shape_cast %8 : vector<2x16x16x4xf32> to vector<512x4xf32>
    %c0_17 = arith.constant 0 : index
    %c1_18 = arith.constant 1 : index
    %c2_19 = arith.constant 2 : index
    %c0_20 = arith.constant 0 : index
    %10 = vector.load %arg1[%c0_17, %c1_18, %c2_19, %c0_20] : memref<2x18x18x4xf32, #tpu.memory_space<vmem>>, vector<2x16x16x4xf32>
    %11 = vector.shape_cast %10 : vector<2x16x16x4xf32> to vector<512x4xf32>
    %c0_21 = arith.constant 0 : index
    %c2_22 = arith.constant 2 : index
    %c0_23 = arith.constant 0 : index
    %c0_24 = arith.constant 0 : index
    %12 = vector.load %arg1[%c0_21, %c2_22, %c0_23, %c0_24] : memref<2x18x18x4xf32, #tpu.memory_space<vmem>>, vector<2x16x16x4xf32>
    %13 = vector.shape_cast %12 : vector<2x16x16x4xf32> to vector<512x4xf32>
    %c0_25 = arith.constant 0 : index
    %c2_26 = arith.constant 2 : index
    %c1_27 = arith.constant 1 : index
    %c0_28 = arith.constant 0 : index
    %14 = vector.load %arg1[%c0_25, %c2_26, %c1_27, %c0_28] : memref<2x18x18x4xf32, #tpu.memory_space<vmem>>, vector<2x16x16x4xf32>
    %15 = vector.shape_cast %14 : vector<2x16x16x4xf32> to vector<512x4xf32>
    %c0_29 = arith.constant 0 : index
    %c2_30 = arith.constant 2 : index
    %c2_31 = arith.constant 2 : index
    %c0_32 = arith.constant 0 : index
    %16 = vector.load %arg1[%c0_29, %c2_30, %c2_31, %c0_32] : memref<2x18x18x4xf32, #tpu.memory_space<vmem>>, vector<2x16x16x4xf32>
    %17 = vector.shape_cast %16 : vector<2x16x16x4xf32> to vector<512x4xf32>
    %18 = tpu.concatenate %1, %3, %5, %7, %9, %11, %13, %15, %17 in 1 : vector<512x4xf32>, vector<512x4xf32>, vector<512x4xf32>, vector<512x4xf32>, vector<512x4xf32>, vector<512x4xf32>, vector<512x4xf32>, vector<512x4xf32>, vector<512x4xf32> -> vector<512x36xf32>
    %c0_33 = arith.constant 0 : index
    %c0_34 = arith.constant 0 : index
    %19 = vector.load %arg2[%c0_33, %c0_34] : memref<36x8xf32, #tpu.memory_space<vmem>>, vector<36x8xf32>
    %cst = arith.constant dense<0.000000e+00> : vector<512x8xf32>
    %20 = tpu.matmul %18, %19, %cst {dimension_numbers = #tpu.dot_dimension_numbers<[1], [0], [0], [1], [0, 0, 1, 1], [], []>} : vector<512x36xf32>, vector<36x8xf32>, vector<512x8xf32> -> vector<512x8xf32>
    %21 = tpu.transpose %20, [1, 0] : vector<512x8xf32> -> vector<8x512xf32>
    %cst_35 = arith.constant dense<0.000000e+00> : vector<8xf32>
    %22 = vector.multi_reduction <add>, %21, %cst_35 [1] : vector<8x512xf32> to vector<8xf32>
    %23 = vector.shape_cast %22 : vector<8xf32> to vector<8x1xf32>
    %cst_36 = arith.constant 5.120000e+02 : f32
    %24 = vector.broadcast %cst_36 : f32 to vector<8x1xf32>
    %25 = arith.divf %23, %24 : vector<8x1xf32>
    %26 = arith.mulf %21, %21 : vector<8x512xf32>
    %cst_37 = arith.constant dense<0.000000e+00> : vector<8xf32>
    %27 = vector.multi_reduction <add>, %26, %cst_37 [1] : vector<8x512xf32> to vector<8xf32>
    %28 = vector.shape_cast %27 : vector<8xf32> to vector<8x1xf32>
    %cst_38 = arith.constant 5.120000e+02 : f32
    %29 = vector.broadcast %cst_38 : f32 to vector<8x1xf32>
    %30 = arith.divf %28, %29 : vector<8x1xf32>
    %31 = arith.mulf %25, %25 : vector<8x1xf32>
    %32 = arith.subf %30, %31 : vector<8x1xf32>
    %cst_39 = arith.constant 0.000000e+00 : f32
    %33 = vector.broadcast %cst_39 : f32 to vector<8x1xf32>
    %34 = arith.maximumf %32, %33 : vector<8x1xf32>
    %c0_40 = arith.constant 0 : index
    %c0_41 = arith.constant 0 : index
    %35 = vector.load %arg3[%c0_40, %c0_41] : memref<8x1xf32, #tpu.memory_space<vmem>>, vector<8x1xf32>
    %cst_42 = arith.constant 9.99999974E-6 : f32
    %36 = vector.broadcast %cst_42 : f32 to vector<8x1xf32>
    %37 = arith.addf %34, %36 : vector<8x1xf32>
    %38 = math.rsqrt %37 : vector<8x1xf32>
    %39 = arith.mulf %35, %38 : vector<8x1xf32>
    %c0_43 = arith.constant 0 : index
    %c0_44 = arith.constant 0 : index
    %40 = vector.load %arg4[%c0_43, %c0_44] : memref<8x1xf32, #tpu.memory_space<vmem>>, vector<8x1xf32>
    %41 = arith.mulf %25, %39 : vector<8x1xf32>
    %42 = arith.subf %40, %41 : vector<8x1xf32>
    %43 = vector.broadcast %39 : vector<8x1xf32> to vector<8x512xf32>
    %44 = arith.mulf %21, %43 : vector<8x512xf32>
    %45 = vector.broadcast %42 : vector<8x1xf32> to vector<8x512xf32>
    %46 = arith.addf %44, %45 : vector<8x512xf32>
    %cst_45 = arith.constant 0.000000e+00 : f32
    %47 = vector.broadcast %cst_45 : f32 to vector<8x512xf32>
    %48 = arith.maximumf %46, %47 : vector<8x512xf32>
    %49 = vector.extract_strided_slice %48 {offsets = [0, 0], sizes = [8, 256], strides = [1, 1]} : vector<8x512xf32> to vector<8x256xf32>
    %c0_46 = arith.constant 0 : index
    %c0_47 = arith.constant 0 : index
    %c0_48 = arith.constant 0 : index
    %50 = vector.load %arg5[%c0_46, %c0_47, %c0_48] : memref<2x8x256xf32, #tpu.memory_space<vmem>>, vector<1x8x256xf32>
    %51 = vector.shape_cast %50 : vector<1x8x256xf32> to vector<8x256xf32>
    %52 = vector.shape_cast %49 : vector<8x256xf32> to vector<1x8x256xf32>
    tpu.vector_store %arg5[%c0_46, %c0_47, %c0_48], %52 {strides = array<i32>} : memref<2x8x256xf32, #tpu.memory_space<vmem>>, vector<1x8x256xf32>,
    %53 = vector.extract_strided_slice %48 {offsets = [0, 256], sizes = [8, 256], strides = [1, 1]} : vector<8x512xf32> to vector<8x256xf32>
    %c1_49 = arith.constant 1 : index
    %c0_50 = arith.constant 0 : index
    %c0_51 = arith.constant 0 : index
    %54 = vector.load %arg5[%c1_49, %c0_50, %c0_51] : memref<2x8x256xf32, #tpu.memory_space<vmem>>, vector<1x8x256xf32>
    %55 = vector.shape_cast %54 : vector<1x8x256xf32> to vector<8x256xf32>
    %56 = vector.shape_cast %53 : vector<8x256xf32> to vector<1x8x256xf32>
    tpu.vector_store %arg5[%c1_49, %c0_50, %c0_51], %56 {strides = array<i32>} : memref<2x8x256xf32, #tpu.memory_space<vmem>>, vector<1x8x256xf32>,
    return
  }
  func.func @transform_0(%arg0: i32) -> (i32, i32, i32, i32) {
    %c0_i32 = arith.constant 0 : i32
    %c0_i32_0 = arith.constant 0 : i32
    %c0_i32_1 = arith.constant 0 : i32
    %c0_i32_2 = arith.constant 0 : i32
    %c0_i32_3 = arith.constant 0 : i32
    return %c0_i32, %c0_i32_0, %c0_i32_1, %c0_i32_2 : i32, i32, i32, i32
  }
  func.func @transform_1(%arg0: i32) -> (i32, i32) {
    %c0_i32 = arith.constant 0 : i32
    %c0_i32_0 = arith.constant 0 : i32
    %c0_i32_1 = arith.constant 0 : i32
    return %c0_i32, %c0_i32_0 : i32, i32
  }
  func.func @transform_2(%arg0: i32) -> (i32, i32) {
    %c0_i32 = arith.constant 0 : i32
    %c0_i32_0 = arith.constant 0 : i32
    %c0_i32_1 = arith.constant 0 : i32
    return %c0_i32, %c0_i32_0 : i32, i32
  }
  func.func @transform_3(%arg0: i32) -> (i32, i32) {
    %c0_i32 = arith.constant 0 : i32
    %c0_i32_0 = arith.constant 0 : i32
    %c0_i32_1 = arith.constant 0 : i32
    return %c0_i32, %c0_i32_0 : i32, i32
  }
  func.func @transform_4(%arg0: i32) -> (i32, i32, i32) {
    %c0_i32 = arith.constant 0 : i32
    %c0_i32_0 = arith.constant 0 : i32
    %c0_i32_1 = arith.constant 0 : i32
    %c0_i32_2 = arith.constant 0 : i32
    return %c0_i32, %c0_i32_0, %c0_i32_1 : i32, i32, i32
  }
}

</mosaic_0001>

<bundles_post_ra>
// kernel: tpu_custom_call.1
= control target key start
LH: loop header
LB: loop body
LE: loop exit
PB: predicated region body
PF: predicated region fallthrough
CT: control target
= control target key end

     0   :  { %s4358_s21 = smov 4   ;;  %s8616_s0 = inlined_call_operand.vmem [shape: f32[2,18,18,4], index: 0, kind: input, shape index: {}]   ;;  %s8617_s1 = inlined_call_operand.vmem [shape: f32[36,8], index: 1, kind: input, shape index: {}]   ;;  %s8618_s2 = inlined_call_operand.vmem [shape: f32[8,1], index: 2, kind: input, shape index: {}]   ;;  %s8619_s3 = inlined_call_operand.vmem [shape: f32[8,1], index: 3, kind: input, shape index: {}]   ;;  %s8620_s4 = inlined_call_operand.hbm [shape: f32[2,8,256], index: 4, kind: output, shape index: {}]  }
   0x1   :  { %v86_v0 = vld [vmem:[%s8616_s0 + $0x31] sm:$0xff]  ;;  %v84_v1 = vld [vmem:[%s8616_s0 + $0x19] sm:$0xff]  ;;  %v82_v2 = vld [vmem:[%s8616_s0 + $0x1] sm:$0xff] }
   0x2   :  { %668 = vrot.lane.b32.xlu2 %v86_v0, %s4358_s21  ;;  %664 = vrot.lane.b32.xlu1 %v84_v1, %s4358_s21 }
   0x3   :  { %660 = vrot.lane.b32.xlu0 %v82_v2, %s4358_s21 }
   0x4   :  { %9 = vsyncpa [#allocation3], 0  ;;  %v87_v3 = vld [vmem:[%s8616_s0 + $0x39] sm:$0xff]  ;;  %v85_v4 = vld [vmem:[%s8616_s0 + $0x21] sm:$0xff]  ;;  %s4359_s23 = smov 8   ;;  %s4360_s25 = smov 12  }
   0x5   :  { %v83_v5 = vld [vmem:[%s8616_s0 + $0x9] sm:$0xff]  ;;  %v90_v6 = vld [vmem:[%s8616_s0 + $0x61] sm:$0xff]  ;;  %v89_v7 = vld [vmem:[%s8616_s0 + $0x51] sm:$0xff]  ;;  %s4361_s5 = smov 16   ;;  %s4362_s6 = smov 20   ;;  %vm2644_vm0 = vcmask 31744  }
   0x6   :  { %v88_v8 = vld [vmem:[%s8616_s0 + $0x49] sm:$0xff]  ;;  %v93_v9 = vld [vmem:[%s8616_s0 + $0x81] sm:$0xff]  ;;  %v92_v10 = vld [vmem:[%s8616_s0 + $0x79] sm:$0xff]  ;;  %s4363_s13 = smov 24   ;;  %s4364_s28 = smov 28   ;;  %vm2709_vm1 = vcmask 64512  }
   0x7   :  { %v91_v11 = vld [vmem:[%s8616_s0 + $0x69] sm:$0xff]  ;;  %v95_v13 = vld [vmem:[%s8616_s0 + $0x99] sm:$0xff]  ;;  %v94_v14 = vld [vmem:[%s8616_s0 + $0x91] sm:$0xff]  ;;  %s4365_s7 = smov 32   ;;  %vm2774_vm2 = vcmask 97280   ;;  %vm2839_vm3 = vcmask 130048  }
   0x8   :  { %v96_v12 = vld [vmem:[%s8616_s0 + $0xa9] sm:$0xff]  ;;  %v98_v16 = vld [vmem:[%s8616_s0 + $0xc1] sm:$0xff]  ;;  %v97_v17 = vld [vmem:[%s8616_s0 + $0xb1] sm:$0xff]  ;;  %vm2904_vm4 = vcmask 162816   ;;  %vm2969_vm5 = vcmask 195584   ;;  %vm3034_vm6 = vcmask 228352  }
   0x9   :  { %v99_v15 = vld [vmem:[%s8616_s0 + $0xc9] sm:$0xff]  ;;  %v102_v18 = vld [vmem:[%s8616_s0 + $0xf1] sm:$0xff]  ;;  %v101_v19 = vld [vmem:[%s8616_s0 + $0xe1] sm:$0xff]  ;;  %vm3362_vm7 = vcmask 1043456   ;;  %vm3099_vm8 = vcmask 261120   ;;  %vm3169_vm9 = vcmask 293888  }
   0xa   :  { %670 = vrot.lane.b32.xlu2 %v87_v3, %s4358_s21  ;;  %666 = vrot.lane.b32.xlu1 %v85_v4, %s4358_s21  ;;  %v100_v20 = vld [vmem:[%s8616_s0 + $0xd9] sm:$0xff]  ;;  %v105_v21 = vld [vmem:[%s8616_s0 + $0x111] sm:$0xff]  ;;  %s3778_s26 = sshll.u32 %s8620_s4, 4  ;;  %s4369_s27 = smov 256   ;;  %s3779_s26 = int_to_ptr.hbm [resolvable:$true] %s3778_s26 }
   0xb   :  { %662 = vrot.lane.b32.xlu0 %v83_v5, %s4358_s21  ;;  %v104_v22 = vld [vmem:[%s8616_s0 + $0x109] sm:$0xff]  ;;  %v103_v23 = vld [vmem:[%s8616_s0 + $0xf9] sm:$0xff]  ;;  %v106_v26 = vld [vmem:[%s8616_s0 + $0x121] sm:$0xff] }
   0xc   :  { %v108_v24 = vld [vmem:[%s8616_s0 + $0x139] sm:$0xff]  ;;  %v107_v25 = vld [vmem:[%s8616_s0 + $0x129] sm:$0xff]  ;;  %v110_v28 = vld [vmem:[%s8616_s0 + $0x151] sm:$0xff] }
   0xd   :  { %v111_v27 = vld [vmem:[%s8616_s0 + $0x159] sm:$0xff]  ;;  %v109_v29 = vld [vmem:[%s8616_s0 + $0x141] sm:$0xff]  ;;  %v114_v30 = vld [vmem:[%s8616_s0 + $0x1b1] sm:$0xff] }
   0xe   :  { %v113_v31 = vld [vmem:[%s8616_s0 + $0x171] sm:$0xff]  ;;  %v112_v32 = vld [vmem:[%s8616_s0 + $0x169] sm:$0xff]  ;;  %v115_v35 = vld [vmem:[%s8616_s0 + $0x1b9] sm:$0xff] }
   0xf   :  { %v117_v33 = vld [vmem:[%s8616_s0 + $0x1d1] sm:$0xff]  ;;  %v116_v34 = vld [vmem:[%s8616_s0 + $0x1c9] sm:$0xff]  ;;  %v120_v37 = vld [vmem:[%s8616_s0 + $0x1f9] sm:$0xff] }
  0x10   :  { %v119_v38 = vld [vmem:[%s8616_s0 + $0x1e9] sm:$0xff]  ;;  %v118_v39 = vld [vmem:[%s8616_s0 + $0x1e1] sm:$0xff]  ;;  %v123_v41 = vld [vmem:[%s8616_s0 + $0x219] sm:$0xff] }
  0x11   :  { %v122_v42 = vld [vmem:[%s8616_s0 + $0x211] sm:$0xff]  ;;  %v121_v43 = vld [vmem:[%s8616_s0 + $0x201] sm:$0xff]  ;;  %v124_v47 = vld [vmem:[%s8616_s0 + $0x229] sm:$0xff] }
  0x12   :  { %676 = vrot.lane.b32.xlu2 %v90_v6, %s4358_s21  ;;  %674 = vrot.lane.b32.xlu1 %v89_v7, %s4358_s21  ;;  %v126_v45 = vld [vmem:[%s8616_s0 + $0x241] sm:$0xff]  ;;  %v125_v46 = vld [vmem:[%s8616_s0 + $0x231] sm:$0xff] }
  0x13   :  { %672 = vrot.lane.b32.xlu0 %v88_v8, %s4358_s21  ;;  %v129_v51 = vld [vmem:[%s8616_s0 + $0x261] sm:$0xff]  ;;  %v128_v52 = vld [vmem:[%s8616_s0 + $0x259] sm:$0xff]  ;;  %v127_v53 = vld [vmem:[%s8616_s0 + $0x249] sm:$0xff] }
  0x14   :  { %v132_v57 = vld [vmem:[%s8616_s0 + $0x289] sm:$0xff]  ;;  %v131_v58 = vld [vmem:[%s8616_s0 + $0x279] sm:$0xff]  ;;  %v130_v59 = vld [vmem:[%s8616_s0 + $0x271] sm:$0xff] }
  0x15   :  { %v135_v63 = vld [vmem:[%s8616_s0 + $0x2a9] sm:$0xff]  ;;  %v134_v0 = vld [vmem:[%s8616_s0 + $0x2a1] sm:$0xff]  ;;  %v133_v1 = vld [vmem:[%s8616_s0 + $0x291] sm:$0xff] }
  0x16   :  { %v138_v5 = vld [vmem:[%s8616_s0 + $0x2d1] sm:$0xff]  ;;  %v137_v6 = vld [vmem:[%s8616_s0 + $0x2c1] sm:$0xff]  ;;  %v136_v7 = vld [vmem:[%s8616_s0 + $0x2b9] sm:$0xff] }
  0x1a   :  { %682 = vrot.lane.b32.xlu2 %v93_v9, %s4358_s21  ;;  %680 = vrot.lane.b32.xlu1 %v92_v10, %s4358_s21 }
  0x1b   :  { %678 = vrot.lane.b32.xlu0 %v91_v11, %s4358_s21  ;;  %v141_v11 = vld [vmem:[%s8616_s0 + $0x2f1] sm:$0xff] }
  0x22   :  { %688 = vrot.lane.b32.xlu2 %v96_v12, %s4358_s21  ;;  %686 = vrot.lane.b32.xlu1 %v95_v13, %s4358_s21  ;;  %v140_v12 = vld [vmem:[%s8616_s0 + $0x2e9] sm:$0xff]  ;;  %v139_v13 = vld [vmem:[%s8616_s0 + $0x2d9] sm:$0xff] }
  0x23   :  { %684 = vrot.lane.b32.xlu0 %v94_v14, %s4358_s21 }
  0x2a   :  { %694 = vrot.lane.b32.xlu2 %v99_v15, %s4358_s21  ;;  %692 = vrot.lane.b32.xlu1 %v98_v16, %s4358_s21 }
  0x2b   :  { %690 = vrot.lane.b32.xlu0 %v97_v17, %s4358_s21  ;;  %v144_v17 = vld [vmem:[%s8616_s0 + $0x319] sm:$0xff] }
  0x32   :  { %700 = vrot.lane.b32.xlu2 %v102_v18, %s4358_s21  ;;  %698 = vrot.lane.b32.xlu1 %v101_v19, %s4358_s21  ;;  %v143_v18 = vld [vmem:[%s8616_s0 + $0x309] sm:$0xff]  ;;  %v142_v19 = vld [vmem:[%s8616_s0 + $0x301] sm:$0xff] }
  0x33   :  { %696 = vrot.lane.b32.xlu0 %v100_v20, %s4358_s21 }
  0x3a   :  { %706 = vrot.lane.b32.xlu2 %v105_v21, %s4358_s21  ;;  %704 = vrot.lane.b32.xlu1 %v104_v22, %s4358_s21 }
  0x3b   :  { %702 = vrot.lane.b32.xlu0 %v103_v23, %s4358_s21  ;;  %v147_v23 = vld [vmem:[%s8616_s0 + $0xa] sm:$0xff] }
  0x42   :  { %712 = vrot.lane.b32.xlu2 %v108_v24, %s4358_s21  ;;  %710 = vrot.lane.b32.xlu1 %v107_v25, %s4358_s21  ;;  %v146_v24 = vld [vmem:[%s8616_s0 + $0x2] sm:$0xff] }
  0x43   :  { %708 = vrot.lane.b32.xlu0 %v106_v26, %s4358_s21  ;;  %v145_v25 = vld [vmem:[%s8616_s0 + $0x321] sm:$0xff] }
  0x4a   :  { %718 = vrot.lane.b32.xlu2 %v111_v27, %s4358_s21  ;;  %716 = vrot.lane.b32.xlu1 %v110_v28, %s4358_s21 }
  0x4b   :  { %714 = vrot.lane.b32.xlu0 %v109_v29, %s4358_s21  ;;  %v150_v29 = vld [vmem:[%s8616_s0 + $0x32] sm:$0xff] }
  0x52   :  { %724 = vrot.lane.b32.xlu2 %v114_v30, %s4358_s21  ;;  %722 = vrot.lane.b32.xlu1 %v113_v31, %s4358_s21  ;;  %v149_v30 = vld [vmem:[%s8616_s0 + $0x22] sm:$0xff]  ;;  %v148_v31 = vld [vmem:[%s8616_s0 + $0x1a] sm:$0xff] }
  0x53   :  { %720 = vrot.lane.b32.xlu0 %v112_v32, %s4358_s21 }
  0x5a   :  { %730 = vrot.lane.b32.xlu2 %v117_v33, %s4358_s21  ;;  %728 = vrot.lane.b32.xlu1 %v116_v34, %s4358_s21 }
  0x5b   :  { %726 = vrot.lane.b32.xlu0 %v115_v35, %s4358_s21  ;;  %v153_v35 = vld [vmem:[%s8616_s0 + $0x52] sm:$0xff] }
  0x5c   :  { %v4539_v36 = vpop.permute.xlu2 %668 }
  0x5d   :  { %8621 = vst [vmem:[#allocation5_spill] sm:$0xff] %v4539_v36  ;;  %v3904_v36 = vld [vmem:[%s8616_s0 + $0x2a1] sm:$0xff] }
  0x62   :  { %736 = vrot.lane.b32.xlu2 %v120_v37, %s4358_s21  ;;  %734 = vrot.lane.b32.xlu1 %v119_v38, %s4358_s21  ;;  %v152_v37 = vld [vmem:[%s8616_s0 + $0x4a] sm:$0xff]  ;;  %v151_v38 = vld [vmem:[%s8616_s0 + $0x3a] sm:$0xff] }
  0x63   :  { %732 = vrot.lane.b32.xlu0 %v118_v39, %s4358_s21 }
  0x64   :  { %v4553_v40 = vpop.permute.xlu2 %670 }
  0x65   :  { %8622 = vst [vmem:[#allocation6_spill] sm:$0xff] %v4553_v40  ;;  %v3900_v40 = vld [vmem:[%s8616_s0 + $0x271] sm:$0xff] }
  0x6a   :  { %742 = vrot.lane.b32.xlu2 %v123_v41, %s4358_s21  ;;  %740 = vrot.lane.b32.xlu1 %v122_v42, %s4358_s21 }
  0x6b   :  { %738 = vrot.lane.b32.xlu0 %v121_v43, %s4358_s21  ;;  %v156_v43 = vld [vmem:[%s8616_s0 + $0x7a] sm:$0xff] }
  0x6c   :  { %v4567_v44 = vpop.permute.xlu2 %676 }
  0x6d   :  { %8623 = vst [vmem:[#allocation7_spill] sm:$0xff] %v4567_v44  ;;  %v41_v44 = vld [vmem:[%s8616_s0 + $0x110] sm:$0xff] }
  0x72   :  { %748 = vrot.lane.b32.xlu2 %v126_v45, %s4358_s21  ;;  %746 = vrot.lane.b32.xlu1 %v125_v46, %s4358_s21  ;;  %v155_v45 = vld [vmem:[%s8616_s0 + $0x6a] sm:$0xff]  ;;  %v154_v46 = vld [vmem:[%s8616_s0 + $0x62] sm:$0xff] }
  0x73   :  { %744 = vrot.lane.b32.xlu0 %v124_v47, %s4358_s21 }
  0x74   :  { %v4581_v48 = vpop.permute.xlu2 %682  ;;  %v4583_v49 = vpop.permute.xlu1 %664 }
  0x75   :  { %8624 = vst [vmem:[#allocation8_spill] sm:$0xff] %v4581_v48  ;;  %v4585_v50 = vpop.permute.xlu0 %660  ;;  %v197_v48 = vld [vmem:[%s8616_s0 + $0x292] sm:$0xff] }
  0x76   :  { %8625 = vst [vmem:[#allocation9_spill] sm:$0xff] %v4583_v49  ;;  %v3955_v49 = vld [vmem:[%s8616_s0 + $0x202] sm:$0xff] }
  0x77   :  { %8626 = vst [vmem:[#allocation10_spill] sm:$0xff] %v4585_v50  ;;  %v4038_v50 = vld [vmem:[%s8616_s0 + $0x300] sm:$0xff] }
  0x7a   :  { %754 = vrot.lane.b32.xlu2 %v129_v51, %s4358_s21  ;;  %752 = vrot.lane.b32.xlu1 %v128_v52, %s4358_s21 }
  0x7b   :  { %750 = vrot.lane.b32.xlu0 %v127_v53, %s4358_s21  ;;  %v159_v53 = vld [vmem:[%s8616_s0 + $0x9a] sm:$0xff] }
  0x7c   :  { %v4599_v54 = vpop.permute.xlu2 %688  ;;  %v4601_v55 = vpop.permute.xlu1 %666 }
  0x7d   :  { %8627 = vst [vmem:[#allocation11_spill] sm:$0xff] %v4599_v54  ;;  %v4603_v56 = vpop.permute.xlu0 %662  ;;  %v189_v54 = vld [vmem:[%s8616_s0 + $0x232] sm:$0xff] }
  0x7e   :  { %8628 = vst [vmem:[#allocation12_spill] sm:$0xff] %v4601_v55  ;;  %v3901_v55 = vld [vmem:[%s8616_s0 + $0x279] sm:$0xff] }
  0x7f   :  { %8629 = vst [vmem:[#allocation13_spill] sm:$0xff] %v4603_v56  ;;  %v3963_v56 = vld [vmem:[%s8616_s0 + $0x262] sm:$0xff] }
  0x82   :  { %760 = vrot.lane.b32.xlu2 %v132_v57, %s4358_s21  ;;  %758 = vrot.lane.b32.xlu1 %v131_v58, %s4358_s21  ;;  %v158_v57 = vld [vmem:[%s8616_s0 + $0x92] sm:$0xff]  ;;  %v157_v58 = vld [vmem:[%s8616_s0 + $0x82] sm:$0xff] }
  0x83   :  { %756 = vrot.lane.b32.xlu0 %v130_v59, %s4358_s21 }
  0x84   :  { %v4617_v60 = vpop.permute.xlu2 %694  ;;  %v4619_v61 = vpop.permute.xlu1 %674 }
  0x85   :  { %8630 = vst [vmem:[#allocation14_spill] sm:$0xff] %v4617_v60  ;;  %v4621_v62 = vpop.permute.xlu0 %672  ;;  %v3964_v60 = vld [vmem:[%s8616_s0 + $0x272] sm:$0xff] }
  0x86   :  { %8631 = vst [vmem:[#allocation15_spill] sm:$0xff] %v4621_v62 }
  0x8a   :  { %766 = vrot.lane.b32.xlu2 %v135_v63, %s4358_s21  ;;  %764 = vrot.lane.b32.xlu1 %v134_v0, %s4358_s21 }
  0x8b   :  { %762 = vrot.lane.b32.xlu0 %v133_v1, %s4358_s21  ;;  %v162_v1 = vld [vmem:[%s8616_s0 + $0xc2] sm:$0xff] }
  0x8c   :  { %v4635_v2 = vpop.permute.xlu2 %700  ;;  %v4637_v3 = vpop.permute.xlu1 %680 }
  0x8d   :  { %8632 = vst [vmem:[#allocation16_spill] sm:$0xff] %v4635_v2  ;;  %v4639_v4 = vpop.permute.xlu0 %678  ;;  %v3897_v2 = vld [vmem:[%s8616_s0 + $0x249] sm:$0xff] }
  0x8e   :  { %8633 = vst [vmem:[#allocation17_spill] sm:$0xff] %v4637_v3  ;;  %v200_v3 = vld [vmem:[%s8616_s0 + $0x2ba] sm:$0xff] }
  0x8f   :  { %8634 = vst [vmem:[#allocation18_spill] sm:$0xff] %v4639_v4  ;;  %v203_v4 = vld [vmem:[%s8616_s0 + $0x2da] sm:$0xff] }
  0x92   :  { %772 = vrot.lane.b32.xlu2 %v138_v5, %s4358_s21  ;;  %770 = vrot.lane.b32.xlu1 %v137_v6, %s4358_s21  ;;  %v161_v5 = vld [vmem:[%s8616_s0 + $0xb2] sm:$0xff]  ;;  %v160_v6 = vld [vmem:[%s8616_s0 + $0xaa] sm:$0xff] }
  0x93   :  { %768 = vrot.lane.b32.xlu0 %v136_v7, %s4358_s21 }
  0x94   :  { %v4653_v8 = vpop.permute.xlu2 %706  ;;  %v4655_v9 = vpop.permute.xlu1 %686 }
  0x95   :  { %8635 = vst [vmem:[#allocation19_spill] sm:$0xff] %v4653_v8  ;;  %v4657_v10 = vpop.permute.xlu0 %684  ;;  %v53_v8 = vld [vmem:[%s8616_s0 + $0x1d0] sm:$0xff] }
  0x96   :  { %8636 = vst [vmem:[#allocation20_spill] sm:$0xff] %v4655_v9 }
  0x97   :  { %8637 = vst [vmem:[#allocation21_spill] sm:$0xff] %v4657_v10  ;;  %v191_v10 = vld [vmem:[%s8616_s0 + $0x24a] sm:$0xff] }
  0x9a   :  { %778 = vrot.lane.b32.xlu2 %v141_v11, %s4358_s21  ;;  %776 = vrot.lane.b32.xlu1 %v140_v12, %s4358_s21 }
  0x9b   :  { %774 = vrot.lane.b32.xlu0 %v139_v13, %s4358_s21  ;;  %v165_v13 = vld [vmem:[%s8616_s0 + $0xe2] sm:$0xff] }
  0x9c   :  { %v4671_v14 = vpop.permute.xlu2 %712  ;;  %v4673_v15 = vpop.permute.xlu1 %692 }
  0x9d   :  { %8638 = vst [vmem:[#allocation22_spill] sm:$0xff] %v4671_v14  ;;  %v4675_v16 = vpop.permute.xlu0 %690  ;;  %v201_v14 = vld [vmem:[%s8616_s0 + $0x2c2] sm:$0xff] }
  0x9e   :  { %8639 = vst [vmem:[#allocation23_spill] sm:$0xff] %v4673_v15  ;;  %v4029_v15 = vld [vmem:[%s8616_s0 + $0x290] sm:$0xff] }
  0x9f   :  { %8640 = vst [vmem:[#allocation24_spill] sm:$0xff] %v4675_v16  ;;  %v182_v16 = vld [vmem:[%s8616_s0 + $0x1e2] sm:$0xff] }
  0xa2   :  { %784 = vrot.lane.b32.xlu2 %v144_v17, %s4358_s21  ;;  %782 = vrot.lane.b32.xlu1 %v143_v18, %s4358_s21  ;;  %v164_v17 = vld [vmem:[%s8616_s0 + $0xda] sm:$0xff]  ;;  %v163_v18 = vld [vmem:[%s8616_s0 + $0xca] sm:$0xff] }
  0xa3   :  { %780 = vrot.lane.b32.xlu0 %v142_v19, %s4358_s21 }
  0xa4   :  { %v4689_v20 = vpop.permute.xlu2 %718  ;;  %v4691_v21 = vpop.permute.xlu1 %698 }
  0xa5   :  { %8641 = vst [vmem:[#allocation25_spill] sm:$0xff] %v4689_v20  ;;  %v4693_v22 = vpop.permute.xlu0 %696  ;;  %v188_v20 = vld [vmem:[%s8616_s0 + $0x22a] sm:$0xff] }
  0xa6   :  { %8642 = vst [vmem:[#allocation26_spill] sm:$0xff] %v4691_v21  ;;  %v3898_v21 = vld [vmem:[%s8616_s0 + $0x259] sm:$0xff] }
  0xa7   :  { %8643 = vst [vmem:[#allocation27_spill] sm:$0xff] %v4693_v22  ;;  %v3951_v22 = vld [vmem:[%s8616_s0 + $0x1d2] sm:$0xff] }
  0xaa   :  { %918 = vrot.lane.b32.xlu2 %v147_v23, %s4359_s23  ;;  %916 = vrot.lane.b32.xlu1 %v146_v24, %s4359_s23 }
  0xab   :  { %786 = vrot.lane.b32.xlu0 %v145_v25, %s4358_s21  ;;  %v168_v25 = vld [vmem:[%s8616_s0 + $0x10a] sm:$0xff] }
  0xac   :  { %v4707_v26 = vpop.permute.xlu2 %724  ;;  %v4709_v27 = vpop.permute.xlu1 %704 }
  0xad   :  { %8644 = vst [vmem:[#allocation28_spill] sm:$0xff] %v4707_v26  ;;  %v4711_v28 = vpop.permute.xlu0 %702  ;;  %v3894_v26 = vld [vmem:[%s8616_s0 + $0x229] sm:$0xff] }
  0xae   :  { %8645 = vst [vmem:[#allocation29_spill] sm:$0xff] %v4709_v27  ;;  %v58_v27 = vld [vmem:[%s8616_s0 + $0x210] sm:$0xff] }
  0xaf   :  { %8646 = vst [vmem:[#allocation30_spill] sm:$0xff] %v4711_v28  ;;  %v3895_v28 = vld [vmem:[%s8616_s0 + $0x231] sm:$0xff] }
  0xb2   :  { %924 = vrot.lane.b32.xlu2 %v150_v29, %s4359_s23  ;;  %922 = vrot.lane.b32.xlu1 %v149_v30, %s4359_s23  ;;  %v167_v29 = vld [vmem:[%s8616_s0 + $0xfa] sm:$0xff]  ;;  %v166_v30 = vld [vmem:[%s8616_s0 + $0xf2] sm:$0xff] }
  0xb3   :  { %920 = vrot.lane.b32.xlu0 %v148_v31, %s4359_s23 }
  0xb4   :  { %v4725_v32 = vpop.permute.xlu2 %730  ;;  %v4727_v33 = vpop.permute.xlu1 %710 }
  0xb5   :  { %8647 = vst [vmem:[#allocation31_spill] sm:$0xff] %v4725_v32  ;;  %v4729_v34 = vpop.permute.xlu0 %708  ;;  %v59_v32 = vld [vmem:[%s8616_s0 + $0x218] sm:$0xff] }
  0xb6   :  { %8648 = vst [vmem:[#allocation32_spill] sm:$0xff] %v4727_v33  ;;  %v206_v33 = vld [vmem:[%s8616_s0 + $0x302] sm:$0xff] }
  0xb7   :  { %8649 = vst [vmem:[#allocation33_spill] sm:$0xff] %v4729_v34  ;;  %v22_v34 = vld [vmem:[%s8616_s0 + $0x30] sm:$0xff] }
  0xba   :  { %930 = vrot.lane.b32.xlu2 %v153_v35, %s4359_s23  ;;  %928 = vrot.lane.b32.xlu1 %v152_v37, %s4359_s23 }
  0xbb   :  { %926 = vrot.lane.b32.xlu0 %v151_v38, %s4359_s23  ;;  %v171_v38 = vld [vmem:[%s8616_s0 + $0x12a] sm:$0xff] }
  0xbc   :  { %v4743_v39 = vpop.permute.xlu2 %736  ;;  %v4745_v41 = vpop.permute.xlu1 %716 }
  0xbd   :  { %8650 = vst [vmem:[#allocation34_spill] sm:$0xff] %v4743_v39  ;;  %v4747_v42 = vpop.permute.xlu0 %714  ;;  %v29_v39 = vld [vmem:[%s8616_s0 + $0x80] sm:$0xff] }
  0xbe   :  { %8651 = vst [vmem:[#allocation35_spill] sm:$0xff] %v4745_v41 }
  0xbf   :  { %8652 = vst [vmem:[#allocation36_spill] sm:$0xff] %v4747_v42  ;;  %v195_v42 = vld [vmem:[%s8616_s0 + $0x27a] sm:$0xff] }
  0xc2   :  { %936 = vrot.lane.b32.xlu2 %v156_v43, %s4359_s23  ;;  %934 = vrot.lane.b32.xlu1 %v155_v45, %s4359_s23  ;;  %v170_v43 = vld [vmem:[%s8616_s0 + $0x122] sm:$0xff]  ;;  %v169_v45 = vld [vmem:[%s8616_s0 + $0x112] sm:$0xff] }
  0xc3   :  { %932 = vrot.lane.b32.xlu0 %v154_v46, %s4359_s23 }
  0xc4   :  { %v4761_v47 = vpop.permute.xlu2 %742  ;;  %v4763_v51 = vpop.permute.xlu1 %722 }
  0xc5   :  { %8653 = vst [vmem:[#allocation37_spill] sm:$0xff] %v4761_v47  ;;  %v4765_v52 = vpop.permute.xlu0 %720  ;;  %v23_v47 = vld [vmem:[%s8616_s0 + $0x38] sm:$0xff] }
  0xc6   :  { %8654 = vst [vmem:[#allocation38_spill] sm:$0xff] %v4763_v51 }
  0xc7   :  { %8655 = vst [vmem:[#allocation39_spill] sm:$0xff] %v4765_v52  ;;  %v186_v52 = vld [vmem:[%s8616_s0 + $0x212] sm:$0xff] }
  0xca   :  { %942 = vrot.lane.b32.xlu2 %v159_v53, %s4359_s23  ;;  %940 = vrot.lane.b32.xlu1 %v158_v57, %s4359_s23 }
  0xcb   :  { %938 = vrot.lane.b32.xlu0 %v157_v58, %s4359_s23  ;;  %v174_v58 = vld [vmem:[%s8616_s0 + $0x152] sm:$0xff] }
  0xcc   :  { %v4779_v59 = vpop.permute.xlu2 %748  ;;  %v4781_v63 = vpop.permute.xlu1 %728 }
  0xcd   :  { %8656 = vst [vmem:[#allocation40_spill] sm:$0xff] %v4779_v59  ;;  %v4783_v0 = vpop.permute.xlu0 %726  ;;  %v194_v59 = vld [vmem:[%s8616_s0 + $0x272] sm:$0xff] }
  0xce   :  { %8657 = vst [vmem:[#allocation41_spill] sm:$0xff] %v4781_v63 }
  0xcf   :  { %8658 = vst [vmem:[#allocation42_spill] sm:$0xff] %v4783_v0  ;;  %v3891_v0 = vld [vmem:[%s8616_s0 + $0x201] sm:$0xff] }
  0xd2   :  { %948 = vrot.lane.b32.xlu2 %v162_v1, %s4359_s23  ;;  %946 = vrot.lane.b32.xlu1 %v161_v5, %s4359_s23  ;;  %v173_v1 = vld [vmem:[%s8616_s0 + $0x142] sm:$0xff]  ;;  %v172_v5 = vld [vmem:[%s8616_s0 + $0x13a] sm:$0xff] }
  0xd3   :  { %944 = vrot.lane.b32.xlu0 %v160_v6, %s4359_s23 }
  0xd4   :  { %v4797_v7 = vpop.permute.xlu2 %754  ;;  %v4799_v11 = vpop.permute.xlu1 %734 }
  0xd5   :  { %8659 = vst [vmem:[#allocation43_spill] sm:$0xff] %v4797_v7  ;;  %v4801_v12 = vpop.permute.xlu0 %732  ;;  %v185_v7 = vld [vmem:[%s8616_s0 + $0x202] sm:$0xff] }
  0xd6   :  { %8660 = vst [vmem:[#allocation44_spill] sm:$0xff] %v4799_v11  ;;  %v38_v11 = vld [vmem:[%s8616_s0 + $0xf0] sm:$0xff] }
  0xd7   :  { %8661 = vst [vmem:[#allocation45_spill] sm:$0xff] %v4801_v12  ;;  %v49_v12 = vld [vmem:[%s8616_s0 + $0x170] sm:$0xff] }
  0xda   :  { %954 = vrot.lane.b32.xlu2 %v165_v13, %s4359_s23  ;;  %952 = vrot.lane.b32.xlu1 %v164_v17, %s4359_s23 }
  0xdb   :  { %950 = vrot.lane.b32.xlu0 %v163_v18, %s4359_s23  ;;  %v177_v18 = vld [vmem:[%s8616_s0 + $0x172] sm:$0xff] }
  0xdc   :  { %v4815_v19 = vpop.permute.xlu2 %760  ;;  %v4817_v23 = vpop.permute.xlu1 %740 }
  0xdd   :  { %8662 = vst [vmem:[#allocation46_spill] sm:$0xff] %v4815_v19  ;;  %v4819_v24 = vpop.permute.xlu0 %738  ;;  %v68_v19 = vld [vmem:[%s8616_s0 + $0x288] sm:$0xff] }
  0xde   :  { %8663 = vst [vmem:[#allocation47_spill] sm:$0xff] %v4817_v23  ;;  %v26_v23 = vld [vmem:[%s8616_s0 + $0x60] sm:$0xff] }
  0xdf   :  { %8664 = vst [vmem:[#allocation48_spill] sm:$0xff] %v4819_v24  ;;  %v25_v24 = vld [vmem:[%s8616_s0 + $0x50] sm:$0xff] }
  0xe2   :  { %960 = vrot.lane.b32.xlu2 %v168_v25, %s4359_s23  ;;  %958 = vrot.lane.b32.xlu1 %v167_v29, %s4359_s23  ;;  %v176_v25 = vld [vmem:[%s8616_s0 + $0x16a] sm:$0xff]  ;;  %v175_v29 = vld [vmem:[%s8616_s0 + $0x15a] sm:$0xff] }
  0xe3   :  { %956 = vrot.lane.b32.xlu0 %v166_v30, %s4359_s23 }
  0xe4   :  { %v4833_v31 = vpop.permute.xlu2 %766  ;;  %v4835_v35 = vpop.permute.xlu1 %746 }
  0xe5   :  { %8665 = vst [vmem:[#allocation49_spill] sm:$0xff] %v4833_v31  ;;  %v4837_v37 = vpop.permute.xlu0 %744  ;;  %v37_v31 = vld [vmem:[%s8616_s0 + $0xe0] sm:$0xff] }
  0xe6   :  { %8666 = vst [vmem:[#allocation50_spill] sm:$0xff] %v4835_v35  ;;  %v198_v35 = vld [vmem:[%s8616_s0 + $0x2a2] sm:$0xff] }
  0xe7   :  { %8667 = vst [vmem:[#allocation51_spill] sm:$0xff] %v4837_v37  ;;  %v204_v37 = vld [vmem:[%s8616_s0 + $0x2ea] sm:$0xff] }
  0xea   :  { %966 = vrot.lane.b32.xlu2 %v171_v38, %s4359_s23  ;;  %964 = vrot.lane.b32.xlu1 %v170_v43, %s4359_s23 }
  0xeb   :  { %962 = vrot.lane.b32.xlu0 %v169_v45, %s4359_s23  ;;  %v180_v45 = vld [vmem:[%s8616_s0 + $0x1ca] sm:$0xff] }
  0xec   :  { %v4851_v46 = vpop.permute.xlu2 %772  ;;  %v4853_v53 = vpop.permute.xlu1 %752 }
  0xed   :  { %8668 = vst [vmem:[#allocation52_spill] sm:$0xff] %v4853_v53  ;;  %v4855_v57 = vpop.permute.xlu0 %750 }
  0xee   :  { %8669 = vst [vmem:[#allocation53_spill] sm:$0xff] %v4855_v57  ;;  %v192_v57 = vld [vmem:[%s8616_s0 + $0x25a] sm:$0xff] }
  0xf2   :  { %972 = vrot.lane.b32.xlu2 %v174_v58, %s4359_s23  ;;  %970 = vrot.lane.b32.xlu1 %v173_v1, %s4359_s23  ;;  %v179_v58 = vld [vmem:[%s8616_s0 + $0x1ba] sm:$0xff]  ;;  %v178_v1 = vld [vmem:[%s8616_s0 + $0x1b2] sm:$0xff] }
  0xf3   :  { %968 = vrot.lane.b32.xlu0 %v172_v5, %s4359_s23 }
  0xf4   :  { %v4869_v6 = vpop.permute.xlu2 %778  ;;  %v4871_v13 = vpop.permute.xlu1 %758 }
  0xf5   :  { %8670 = vst [vmem:[#allocation54_spill] sm:$0xff] %v4871_v13  ;;  %v4873_v17 = vpop.permute.xlu0 %756  ;;  %v76_v13 = vld [vmem:[%s8616_s0 + $0x2e8] sm:$0xff] }
  0xf6   :  { %8671 = vst [vmem:[#allocation55_spill] sm:$0xff] %v4873_v17  ;;  %v3888_v17 = vld [vmem:[%s8616_s0 + $0x1e1] sm:$0xff] }
  0xfa   :  { %978 = vrot.lane.b32.xlu2 %v177_v18, %s4359_s23  ;;  %976 = vrot.lane.b32.xlu1 %v176_v25, %s4359_s23 }
  0xfb   :  { %974 = vrot.lane.b32.xlu0 %v175_v29, %s4359_s23  ;;  %v183_v29 = vld [vmem:[%s8616_s0 + $0x1ea] sm:$0xff] }
  0xfc   :  { %v4887_v30 = vpop.permute.xlu2 %784  ;;  %v4889_v38 = vpop.permute.xlu1 %764 }
  0xfd   :  { %8672 = vst [vmem:[#allocation56_spill] sm:$0xff] %v4889_v38  ;;  %v4891_v43 = vpop.permute.xlu0 %762  ;;  %v3821_v38 = vld [vmem:[%s8616_s0 + $0x188] sm:$0xff] }
 0x102   :  { %984 = vrot.lane.b32.xlu2 %v180_v45, %s4359_s23  ;;  %982 = vrot.lane.b32.xlu1 %v179_v58, %s4359_s23  ;;  %v181_v45 = vld [vmem:[%s8616_s0 + $0x1d2] sm:$0xff] }
 0x103   :  { %980 = vrot.lane.b32.xlu0 %v178_v1, %s4359_s23 }
 0x104   :  { %v4905_v5 = vpop.permute.xlu2 %918  ;;  %v4907_v18 = vpop.permute.xlu1 %770 }
 0x105   :  { %8673 = vst [vmem:[#allocation57_spill] sm:$0xff] %v4905_v5  ;;  %v4909_v25 = vpop.permute.xlu0 %768 }
 0x10a   :  { %990 = vrot.lane.b32.xlu2 %v183_v29, %s4359_s23  ;;  %988 = vrot.lane.b32.xlu1 %v182_v16, %s4359_s23  ;;  %v184_v16 = vld [vmem:[%s8616_s0 + $0x1fa] sm:$0xff] }
 0x10b   :  { %986 = vrot.lane.b32.xlu0 %v181_v45, %s4359_s23 }
 0x10c   :  { %v4923_v58 = vpop.permute.xlu2 %924  ;;  %v4925_v1 = vpop.permute.xlu1 %776 }
 0x10d   :  { %8674 = vst [vmem:[#allocation58_spill] sm:$0xff] %v4923_v58  ;;  %v4927_v51 = vpop.permute.xlu0 %774  ;;  %v77_v58 = vld [vmem:[%s8616_s0 + $0x2f0] sm:$0xff] }
 0x112   :  { %996 = vrot.lane.b32.xlu2 %v186_v52, %s4359_s23  ;;  %994 = vrot.lane.b32.xlu1 %v185_v7, %s4359_s23  ;;  %v187_v52 = vld [vmem:[%s8616_s0 + $0x21a] sm:$0xff] }
 0x113   :  { %992 = vrot.lane.b32.xlu0 %v184_v16, %s4359_s23 }
 0x114   :  { %v4941_v29 = vpop.permute.xlu2 %930  ;;  %v4943_v45 = vpop.permute.xlu1 %782 }
 0x115   :  { %v4945_v53 = vpop.permute.xlu0 %780 }
 0x11a   :  { %1002 = vrot.lane.b32.xlu2 %v189_v54, %s4359_s23  ;;  %1000 = vrot.lane.b32.xlu1 %v188_v20, %s4359_s23  ;;  %v190_v54 = vld [vmem:[%s8616_s0 + $0x242] sm:$0xff] }
 0x11b   :  { %998 = vrot.lane.b32.xlu0 %v187_v52, %s4359_s23 }
 0x11c   :  { %v4959_v7 = vpop.permute.xlu2 %936  ;;  %v4961_v16 = vpop.permute.xlu1 %916 }
 0x11d   :  { %8675 = vst [vmem:[#allocation59_spill] sm:$0xff] %v4959_v7  ;;  %v4963_v9 = vpop.permute.xlu0 %786 }
 0x11e   :  { %8676 = vst [vmem:[#allocation60_spill] sm:$0xff] %v4961_v16  ;;  %v4026_v16 = vld [vmem:[%s8616_s0 + $0x270] sm:$0xff] }
 0x11f   :  { %8677 = vst [vmem:[#allocation61_spill] sm:$0xff] %v4963_v9  ;;  %v4023_v9 = vld [vmem:[%s8616_s0 + $0x248] sm:$0xff] }
 0x122   :  { %1008 = vrot.lane.b32.xlu2 %v192_v57, %s4359_s23  ;;  %1006 = vrot.lane.b32.xlu1 %v191_v10, %s4359_s23  ;;  %v193_v10 = vld [vmem:[%s8616_s0 + $0x262] sm:$0xff] }
 0x123   :  { %1004 = vrot.lane.b32.xlu0 %v190_v54, %s4359_s23 }
 0x124   :  { %v4977_v20 = vpop.permute.xlu2 %942  ;;  %v4979_v52 = vpop.permute.xlu1 %922 }
 0x125   :  { %8678 = vst [vmem:[#allocation62_spill] sm:$0xff] %v4977_v20  ;;  %v4981_v41 = vpop.permute.xlu0 %920 }
 0x126   :  { %8679 = vst [vmem:[#allocation63_spill] sm:$0xff] %v4979_v52  ;;  %v3885_v52 = vld [vmem:[%s8616_s0 + $0x189] sm:$0xff] }
 0x127   :  { %8680 = vst [vmem:[#allocation64_spill] sm:$0xff] %v4981_v41  ;;  %v3948_v41 = vld [vmem:[%s8616_s0 + $0x182] sm:$0xff] }
 0x12a   :  { %1014 = vrot.lane.b32.xlu2 %v195_v42, %s4359_s23  ;;  %1012 = vrot.lane.b32.xlu1 %v194_v59, %s4359_s23  ;;  %v196_v42 = vld [vmem:[%s8616_s0 + $0x28a] sm:$0xff] }
 0x12b   :  { %1010 = vrot.lane.b32.xlu0 %v193_v10, %s4359_s23 }
 0x12c   :  { %v4995_v57 = vpop.permute.xlu2 %948  ;;  %v4997_v54 = vpop.permute.xlu1 %928 }
 0x12d   :  { %8681 = vst [vmem:[#allocation65_spill] sm:$0xff] %v4995_v57  ;;  %v4999_v20 = vpop.permute.xlu0 %926  ;;  %v4027_v57 = vld [vmem:[%s8616_s0 + $0x278] sm:$0xff] }
 0x12e   :  { %8682 = vst [vmem:[#allocation66_spill] sm:$0xff] %v4997_v54  ;;  %v55_v54 = vld [vmem:[%s8616_s0 + $0x1e8] sm:$0xff] }
 0x12f   :  { %8683 = vst [vmem:[#allocation67_spill] sm:$0xff] %v4999_v20  ;;  %v64_v20 = vld [vmem:[%s8616_s0 + $0x258] sm:$0xff] }
 0x132   :  { %1020 = vrot.lane.b32.xlu2 %v198_v35, %s4359_s23  ;;  %1018 = vrot.lane.b32.xlu1 %v197_v48, %s4359_s23  ;;  %v199_v48 = vld [vmem:[%s8616_s0 + $0x2aa] sm:$0xff] }
 0x133   :  { %1016 = vrot.lane.b32.xlu0 %v196_v42, %s4359_s23 }
 0x134   :  { %v5013_v59 = vpop.permute.xlu2 %954  ;;  %v5015_v10 = vpop.permute.xlu1 %934 }
 0x135   :  { %8684 = vst [vmem:[#allocation68_spill] sm:$0xff] %v5013_v59  ;;  %v5017_v7 = vpop.permute.xlu0 %932  ;;  %v3882_v59 = vld [vmem:[%s8616_s0 + $0x169] sm:$0xff] }
 0x136   :  { %8685 = vst [vmem:[#allocation69_spill] sm:$0xff] %v5015_v10 }
 0x137   :  { %8686 = vst [vmem:[#allocation70_spill] sm:$0xff] %v5017_v7  ;;  %v28_v7 = vld [vmem:[%s8616_s0 + $0x78] sm:$0xff] }
 0x13a   :  { %1026 = vrot.lane.b32.xlu2 %v201_v14, %s4359_s23  ;;  %1024 = vrot.lane.b32.xlu1 %v200_v3, %s4359_s23  ;;  %v202_v3 = vld [vmem:[%s8616_s0 + $0x2d2] sm:$0xff] }
 0x13b   :  { %1022 = vrot.lane.b32.xlu0 %v199_v48, %s4359_s23 }
 0x13c   :  { %v5031_v35 = vpop.permute.xlu2 %960  ;;  %v5033_v42 = vpop.permute.xlu1 %940 }
 0x13d   :  { %8687 = vst [vmem:[#allocation71_spill] sm:$0xff] %v5031_v35  ;;  %v5035_v10 = vpop.permute.xlu0 %938  ;;  %v56_v35 = vld [vmem:[%s8616_s0 + $0x1f8] sm:$0xff] }
 0x13e   :  { %8688 = vst [vmem:[#allocation72_spill] sm:$0xff] %v5033_v42 }
 0x13f   :  { %8689 = vst [vmem:[#allocation73_spill] sm:$0xff] %v5035_v10  ;;  %v207_v10 = vld [vmem:[%s8616_s0 + $0x30a] sm:$0xff] }
 0x142   :  { %1032 = vrot.lane.b32.xlu2 %v204_v37, %s4359_s23  ;;  %1030 = vrot.lane.b32.xlu1 %v203_v4, %s4359_s23  ;;  %v205_v4 = vld [vmem:[%s8616_s0 + $0x2f2] sm:$0xff] }
 0x143   :  { %1028 = vrot.lane.b32.xlu0 %v202_v3, %s4359_s23 }
 0x144   :  { %v5049_v14 = vpop.permute.xlu2 %966  ;;  %v5051_v48 = vpop.permute.xlu1 %946 }
 0x145   :  { %8690 = vst [vmem:[#allocation74_spill] sm:$0xff] %v5049_v14  ;;  %v5053_v42 = vpop.permute.xlu0 %944  ;;  %v208_v14 = vld [vmem:[%s8616_s0 + $0x31a] sm:$0xff] }
 0x146   :  { %8691 = vst [vmem:[#allocation75_spill] sm:$0xff] %v5051_v48 }
 0x147   :  { %8692 = vst [vmem:[#allocation76_spill] sm:$0xff] %v5053_v42  ;;  %v209_v42 = vld [vmem:[%s8616_s0 + $0x322] sm:$0xff] }
 0x14a   :  { %1038 = vrot.lane.b32.xlu2 %v207_v10, %s4359_s23  ;;  %1036 = vrot.lane.b32.xlu1 %v206_v33, %s4359_s23  ;;  %v20_v33 = vld [vmem:[%s8616_s0 + $0x18] sm:$0xff] }
 0x14b   :  { %1034 = vrot.lane.b32.xlu0 %v205_v4, %s4359_s23 }
 0x14c   :  { %v5067_v37 = vpop.permute.xlu2 %972  ;;  %v5069_v3 = vpop.permute.xlu1 %952 }
 0x14d   :  { %8693 = vst [vmem:[#allocation77_spill] sm:$0xff] %v5067_v37  ;;  %v5071_v48 = vpop.permute.xlu0 %950 }
 0x14e   :  { %8694 = vst [vmem:[#allocation78_spill] sm:$0xff] %v5069_v3  ;;  %v3918_v3 = vld [vmem:[%s8616_s0 + $0x1a] sm:$0xff] }
 0x14f   :  { %8695 = vst [vmem:[#allocation79_spill] sm:$0xff] %v5071_v48  ;;  %v3960_v48 = vld [vmem:[%s8616_s0 + $0x242] sm:$0xff] }
 0x152   :  { %1172 = vrot.lane.b32.xlu2 %v20_v33, %s4360_s25  ;;  %1042 = vrot.lane.b32.xlu1 %v209_v42, %s4359_s23  ;;  %v21_v42 = vld [vmem:[%s8616_s0 + $0x20] sm:$0xff] }
 0x153   :  { %1040 = vrot.lane.b32.xlu0 %v208_v14, %s4359_s23 }
 0x154   :  { %v5085_v10 = vpop.permute.xlu2 %978  ;;  %v5087_v4 = vpop.permute.xlu1 %958 }
 0x155   :  { %8696 = vst [vmem:[#allocation80_spill] sm:$0xff] %v5085_v10  ;;  %v5089_v37 = vpop.permute.xlu0 %956 }
 0x156   :  { %8697 = vst [vmem:[#allocation81_spill] sm:$0xff] %v5087_v4  ;;  %v65_v4 = vld [vmem:[%s8616_s0 + $0x260] sm:$0xff] }
 0x157   :  { %8698 = vst [vmem:[#allocation82_spill] sm:$0xff] %v5089_v37  ;;  %v70_v37 = vld [vmem:[%s8616_s0 + $0x2a0] sm:$0xff] }
 0x15a   :  { %1178 = vrot.lane.b32.xlu2 %v23_v47, %s4360_s25  ;;  %1176 = vrot.lane.b32.xlu1 %v22_v34, %s4360_s25  ;;  %v24_v34 = vld [vmem:[%s8616_s0 + $0x48] sm:$0xff] }
 0x15b   :  { %1174 = vrot.lane.b32.xlu0 %v21_v42, %s4360_s25 }
 0x15c   :  { %v5103_v14 = vpop.permute.xlu2 %984  ;;  %v5105_v33 = vpop.permute.xlu1 %964 }
 0x15d   :  { %8699 = vst [vmem:[#allocation83_spill] sm:$0xff] %v5103_v14  ;;  %v5107_v10 = vpop.permute.xlu0 %962  ;;  %v61_v14 = vld [vmem:[%s8616_s0 + $0x230] sm:$0xff] }
 0x15e   :  { %8700 = vst [vmem:[#allocation84_spill] sm:$0xff] %v5105_v33 }
 0x15f   :  { %8701 = vst [vmem:[#allocation85_spill] sm:$0xff] %v5107_v10  ;;  %v43_v10 = vld [vmem:[%s8616_s0 + $0x128] sm:$0xff] }
 0x162   :  { %1184 = vrot.lane.b32.xlu2 %v26_v23, %s4360_s25  ;;  %1182 = vrot.lane.b32.xlu1 %v25_v24, %s4360_s25  ;;  %v27_v23 = vld [vmem:[%s8616_s0 + $0x68] sm:$0xff] }
 0x163   :  { %1180 = vrot.lane.b32.xlu0 %v24_v34, %s4360_s25 }
 0x164   :  { %v5121_v47 = vpop.permute.xlu2 %990  ;;  %v5123_v42 = vpop.permute.xlu1 %970 }
 0x165   :  { %8702 = vst [vmem:[#allocation86_spill] sm:$0xff] %v5121_v47  ;;  %v5125_v33 = vpop.permute.xlu0 %968  ;;  %v31_v47 = vld [vmem:[%s8616_s0 + $0x98] sm:$0xff] }
 0x166   :  { %8703 = vst [vmem:[#allocation87_spill] sm:$0xff] %v5123_v42 }
 0x167   :  { %8704 = vst [vmem:[#allocation88_spill] sm:$0xff] %v5125_v33  ;;  %v32_v33 = vld [vmem:[%s8616_s0 + $0xa8] sm:$0xff] }
 0x16a   :  { %1190 = vrot.lane.b32.xlu2 %v29_v39, %s4360_s25  ;;  %1188 = vrot.lane.b32.xlu1 %v28_v7, %s4360_s25  ;;  %v30_v39 = vld [vmem:[%s8616_s0 + $0x90] sm:$0xff] }
 0x16b   :  { %1186 = vrot.lane.b32.xlu0 %v27_v23, %s4360_s25 }
 0x16c   :  { %v5139_v24 = vpop.permute.xlu2 %996  ;;  %v5141_v34 = vpop.permute.xlu1 %976 }
 0x16d   :  { %8705 = vst [vmem:[#allocation89_spill] sm:$0xff] %v5139_v24  ;;  %v5143_v42 = vpop.permute.xlu0 %974  ;;  %v34_v24 = vld [vmem:[%s8616_s0 + $0xc0] sm:$0xff] }
 0x16e   :  { %8706 = vst [vmem:[#allocation90_spill] sm:$0xff] %v5141_v34 }
 0x16f   :  { %8707 = vst [vmem:[#allocation91_spill] sm:$0xff] %v5143_v42  ;;  %v35_v42 = vld [vmem:[%s8616_s0 + $0xc8] sm:$0xff] }
 0x172   :  { %1196 = vrot.lane.b32.xlu2 %v32_v33, %s4360_s25  ;;  %1194 = vrot.lane.b32.xlu1 %v31_v47, %s4360_s25  ;;  %v33_v33 = vld [vmem:[%s8616_s0 + $0xb0] sm:$0xff] }
 0x173   :  { %1192 = vrot.lane.b32.xlu0 %v30_v39, %s4360_s25 }
 0x174   :  { %v5157_v7 = vpop.permute.xlu2 %1002  ;;  %v5159_v23 = vpop.permute.xlu1 %982 }
 0x175   :  { %8708 = vst [vmem:[#allocation92_spill] sm:$0xff] %v5157_v7  ;;  %v5161_v34 = vpop.permute.xlu0 %980 }
 0x176   :  { %8709 = vst [vmem:[#allocation93_spill] sm:$0xff] %v5159_v23  ;;  %v71_v23 = vld [vmem:[%s8616_s0 + $0x2a8] sm:$0xff] }
 0x177   :  { %8710 = vst [vmem:[#allocation94_spill] sm:$0xff] %v5161_v34  ;;  %v3879_v34 = vld [vmem:[%s8616_s0 + $0x141] sm:$0xff] }
 0x17a   :  { %1202 = vrot.lane.b32.xlu2 %v35_v42, %s4360_s25  ;;  %1200 = vrot.lane.b32.xlu1 %v34_v24, %s4360_s25  ;;  %v36_v42 = vld [vmem:[%s8616_s0 + $0xd8] sm:$0xff] }
 0x17b   :  { %1198 = vrot.lane.b32.xlu0 %v33_v33, %s4360_s25 }
 0x17c   :  { %v5175_v47 = vpop.permute.xlu2 %1008  ;;  %v5177_v39 = vpop.permute.xlu1 %988 }
 0x17d   :  { %8711 = vst [vmem:[#allocation95_spill] sm:$0xff] %v5175_v47  ;;  %v5179_v7 = vpop.permute.xlu0 %986 }
 0x17e   :  { %8712 = vst [vmem:[#allocation96_spill] sm:$0xff] %v5177_v39  ;;  %v40_v39 = vld [vmem:[%s8616_s0 + $0x108] sm:$0xff] }
 0x17f   :  { %8713 = vst [vmem:[#allocation97_spill] sm:$0xff] %v5179_v7 }
 0x182   :  { %1208 = vrot.lane.b32.xlu2 %v38_v11, %s4360_s25  ;;  %1206 = vrot.lane.b32.xlu1 %v37_v31, %s4360_s25  ;;  %v39_v11 = vld [vmem:[%s8616_s0 + $0xf8] sm:$0xff] }
 0x183   :  { %1204 = vrot.lane.b32.xlu0 %v36_v42, %s4360_s25 }
 0x184   :  { %v5193_v24 = vpop.permute.xlu2 %1014  ;;  %v5195_v33 = vpop.permute.xlu1 %994 }
 0x185   :  { %8714 = vst [vmem:[#allocation98_spill] sm:$0xff] %v5193_v24  ;;  %v5197_v47 = vpop.permute.xlu0 %992  ;;  %v67_v24 = vld [vmem:[%s8616_s0 + $0x278] sm:$0xff] }
 0x186   :  { %8715 = vst [vmem:[#allocation99_spill] sm:$0xff] %v5195_v33 }
 0x187   :  { %8716 = vst [vmem:[#allocation100_spill] sm:$0xff] %v5197_v47  ;;  %v44_v47 = vld [vmem:[%s8616_s0 + $0x138] sm:$0xff] }
 0x18a   :  { %1214 = vrot.lane.b32.xlu2 %v41_v44, %s4360_s25  ;;  %1212 = vrot.lane.b32.xlu1 %v40_v39, %s4360_s25  ;;  %v42_v44 = vld [vmem:[%s8616_s0 + $0x120] sm:$0xff] }
 0x18b   :  { %1210 = vrot.lane.b32.xlu0 %v39_v11, %s4360_s25 }
 0x18c   :  { %v5211_v31 = vpop.permute.xlu2 %1020  ;;  %v5213_v42 = vpop.permute.xlu1 %1000 }
 0x18d   :  { %8717 = vst [vmem:[#allocation101_spill] sm:$0xff] %v5211_v31  ;;  %v5215_v33 = vpop.permute.xlu0 %998  ;;  %v46_v31 = vld [vmem:[%s8616_s0 + $0x150] sm:$0xff] }
 0x18e   :  { %8718 = vst [vmem:[#allocation102_spill] sm:$0xff] %v5213_v42 }
 0x18f   :  { %8719 = vst [vmem:[#allocation103_spill] sm:$0xff] %v5215_v33  ;;  %v47_v33 = vld [vmem:[%s8616_s0 + $0x158] sm:$0xff] }
 0x192   :  { %1220 = vrot.lane.b32.xlu2 %v44_v47, %s4360_s25  ;;  %1218 = vrot.lane.b32.xlu1 %v43_v10, %s4360_s25  ;;  %v45_v10 = vld [vmem:[%s8616_s0 + $0x140] sm:$0xff] }
 0x193   :  { %1216 = vrot.lane.b32.xlu0 %v42_v44, %s4360_s25 }
 0x194   :  { %v5229_v39 = vpop.permute.xlu2 %1026  ;;  %v5231_v11 = vpop.permute.xlu1 %1006 }
 0x195   :  { %8720 = vst [vmem:[#allocation104_spill] sm:$0xff] %v5231_v11  ;;  %v5233_v42 = vpop.permute.xlu0 %1004 }
 0x196   :  { %8721 = vst [vmem:[#allocation105_spill] sm:$0xff] %v5233_v42  ;;  %v3820_v42 = vld [vmem:[%s8616_s0 + $0x180] sm:$0xff] }
 0x19a   :  { %1226 = vrot.lane.b32.xlu2 %v47_v33, %s4360_s25  ;;  %1224 = vrot.lane.b32.xlu1 %v46_v31, %s4360_s25  ;;  %v48_v33 = vld [vmem:[%s8616_s0 + $0x168] sm:$0xff] }
 0x19b   :  { %1222 = vrot.lane.b32.xlu0 %v45_v10, %s4360_s25 }
 0x19c   :  { %v5247_v47 = vpop.permute.xlu2 %1032  ;;  %v5249_v44 = vpop.permute.xlu1 %1012 }
 0x19d   :  { %8722 = vst [vmem:[#allocation106_spill] sm:$0xff] %v5249_v44  ;;  %v5251_v11 = vpop.permute.xlu0 %1010  ;;  %v3855_v44 = vld [vmem:[%s8616_s0 + $0x21] sm:$0xff] }
 0x19e   :  { %8723 = vst [vmem:[#allocation107_spill] sm:$0xff] %v5251_v11 }
 0x1a2   :  { %1232 = vrot.lane.b32.xlu2 %v3820_v42, %s4360_s25  ;;  %1230 = vrot.lane.b32.xlu1 %v49_v12, %s4360_s25  ;;  %v52_v12 = vld [vmem:[%s8616_s0 + $0x1c8] sm:$0xff] }
 0x1a3   :  { %1228 = vrot.lane.b32.xlu0 %v48_v33, %s4360_s25 }
 0x1a4   :  { %v5265_v31 = vpop.permute.xlu2 %1038  ;;  %v5267_v10 = vpop.permute.xlu1 %1018 }
 0x1a5   :  { %v5269_v11 = vpop.permute.xlu0 %1016 }
 0x1a6   :  { %8724 = vst [vmem:[#allocation108_spill] sm:$0xff] %v5269_v11  ;;  %v62_v11 = vld [vmem:[%s8616_s0 + $0x240] sm:$0xff] }
 0x1aa   :  { %1238 = vrot.lane.b32.xlu2 %v53_v8, %s4360_s25  ;;  %1236 = vrot.lane.b32.xlu1 %v52_v12, %s4360_s25  ;;  %v54_v8 = vld [vmem:[%s8616_s0 + $0x1e0] sm:$0xff] }
 0x1ab   :  { %1234 = vrot.lane.b32.xlu0 %v3821_v38, %s4360_s25 }
 0x1ac   :  { %v5283_v42 = vpop.permute.xlu2 %1172  ;;  %v5285_v33 = vpop.permute.xlu1 %1024 }
 0x1ad   :  { %8725 = vst [vmem:[#allocation109_spill] sm:$0xff] %v5283_v42  ;;  %v5287_v7 = vpop.permute.xlu0 %1022  ;;  %v4024_v42 = vld [vmem:[%s8616_s0 + $0x258] sm:$0xff] }
 0x1ae   :  { %8726 = vst [vmem:[#allocation110_spill] sm:$0xff] %v5287_v7 }
 0x1b2   :  { %1244 = vrot.lane.b32.xlu2 %v56_v35, %s4360_s25  ;;  %1242 = vrot.lane.b32.xlu1 %v55_v54, %s4360_s25  ;;  %v57_v54 = vld [vmem:[%s8616_s0 + $0x200] sm:$0xff] }
 0x1b3   :  { %1240 = vrot.lane.b32.xlu0 %v54_v8, %s4360_s25 }
 0x1b4   :  { %v5301_v38 = vpop.permute.xlu2 %1178  ;;  %v5303_v12 = vpop.permute.xlu1 %1030 }
 0x1b5   :  { %8727 = vst [vmem:[#allocation111_spill] sm:$0xff] %v5301_v38  ;;  %v5305_v7 = vpop.permute.xlu0 %1028  ;;  %v3856_v38 = vld [vmem:[%s8616_s0 + $0x31] sm:$0xff] }
 0x1ba   :  { %1250 = vrot.lane.b32.xlu2 %v59_v32, %s4360_s25  ;;  %1248 = vrot.lane.b32.xlu1 %v58_v27, %s4360_s25  ;;  %v60_v27 = vld [vmem:[%s8616_s0 + $0x228] sm:$0xff] }
 0x1bb   :  { %1246 = vrot.lane.b32.xlu0 %v57_v54, %s4360_s25 }
 0x1bc   :  { %v5319_v35 = vpop.permute.xlu2 %1184  ;;  %v5321_v8 = vpop.permute.xlu1 %1036 }
 0x1bd   :  { %8728 = vst [vmem:[#allocation112_spill] sm:$0xff] %v5319_v35  ;;  %v5323_v62 = vpop.permute.xlu0 %1034 }
 0x1c2   :  { %1256 = vrot.lane.b32.xlu2 %v62_v11, %s4360_s25  ;;  %1254 = vrot.lane.b32.xlu1 %v61_v14, %s4360_s25  ;;  %v63_v14 = vld [vmem:[%s8616_s0 + $0x248] sm:$0xff] }
 0x1c3   :  { %1252 = vrot.lane.b32.xlu0 %v60_v27, %s4360_s25 }
 0x1c4   :  { %v5337_v32 = vpop.permute.xlu2 %1190  ;;  %v5339_v54 = vpop.permute.xlu1 %1042 }
 0x1c5   :  { %8729 = vst [vmem:[#allocation113_spill] sm:$0xff] %v5337_v32  ;;  %v5341_v35 = vpop.permute.xlu0 %1040 }
 0x1c6   :  { %8730 = vst [vmem:[#allocation114_spill] sm:$0xff] %v5339_v54  ;;  %v4017_v54 = vld [vmem:[%s8616_s0 + $0x200] sm:$0xff] }
 0x1ca   :  { %1262 = vrot.lane.b32.xlu2 %v65_v4, %s4360_s25  ;;  %1260 = vrot.lane.b32.xlu1 %v64_v20, %s4360_s25  ;;  %v66_v20 = vld [vmem:[%s8616_s0 + $0x270] sm:$0xff] }
 0x1cb   :  { %1258 = vrot.lane.b32.xlu0 %v63_v14, %s4360_s25 }
 0x1cc   :  { %v5355_v11 = vpop.permute.xlu2 %1196  ;;  %v5357_v27 = vpop.permute.xlu1 %1176 }
 0x1cd   :  { %8731 = vst [vmem:[#allocation115_spill] sm:$0xff] %v5355_v11  ;;  %v5359_v32 = vpop.permute.xlu0 %1174 }
 0x1ce   :  { %8732 = vst [vmem:[#allocation116_spill] sm:$0xff] %v5357_v27  ;;  %v3909_v27 = vld [vmem:[%s8616_s0 + $0x2d9] sm:$0xff] }
 0x1cf   :  { %8733 = vst [vmem:[#allocation117_spill] sm:$0xff] %v5359_v32  ;;  %v3961_v32 = vld [vmem:[%s8616_s0 + $0x24a] sm:$0xff] }
 0x1d2   :  { %1268 = vrot.lane.b32.xlu2 %v68_v19, %s4360_s25  ;;  %1266 = vrot.lane.b32.xlu1 %v67_v24, %s4360_s25  ;;  %v69_v19 = vld [vmem:[%s8616_s0 + $0x290] sm:$0xff] }
 0x1d3   :  { %1264 = vrot.lane.b32.xlu0 %v66_v20, %s4360_s25 }
 0x1d4   :  { %v5373_v4 = vpop.permute.xlu2 %1202  ;;  %v5375_v14 = vpop.permute.xlu1 %1182 }
 0x1d5   :  { %8734 = vst [vmem:[#allocation118_spill] sm:$0xff] %v5373_v4  ;;  %v5377_v11 = vpop.permute.xlu0 %1180 }
 0x1d6   :  { %8735 = vst [vmem:[#allocation119_spill] sm:$0xff] %v5375_v14  ;;  %v74_v14 = vld [vmem:[%s8616_s0 + $0x2d0] sm:$0xff] }
 0x1d7   :  { %8736 = vst [vmem:[#allocation120_spill] sm:$0xff] %v5377_v11  ;;  %v73_v11 = vld [vmem:[%s8616_s0 + $0x2c0] sm:$0xff] }
 0x1da   :  { %1274 = vrot.lane.b32.xlu2 %v71_v23, %s4360_s25  ;;  %1272 = vrot.lane.b32.xlu1 %v70_v37, %s4360_s25  ;;  %v72_v37 = vld [vmem:[%s8616_s0 + $0x2b8] sm:$0xff] }
 0x1db   :  { %1270 = vrot.lane.b32.xlu0 %v69_v19, %s4360_s25 }
 0x1dc   :  { %v5391_v24 = vpop.permute.xlu2 %1208  ;;  %v5393_v20 = vpop.permute.xlu1 %1188 }
 0x1dd   :  { %8737 = vst [vmem:[#allocation121_spill] sm:$0xff] %v5391_v24  ;;  %v5395_v4 = vpop.permute.xlu0 %1186  ;;  %v3910_v24 = vld [vmem:[%s8616_s0 + $0x2e9] sm:$0xff] }
 0x1de   :  { %8738 = vst [vmem:[#allocation122_spill] sm:$0xff] %v5393_v20 }
 0x1e2   :  { %1280 = vrot.lane.b32.xlu2 %v74_v14, %s4360_s25  ;;  %1278 = vrot.lane.b32.xlu1 %v73_v11, %s4360_s25  ;;  %v75_v11 = vld [vmem:[%s8616_s0 + $0x2d8] sm:$0xff] }
 0x1e3   :  { %1276 = vrot.lane.b32.xlu0 %v72_v37, %s4360_s25 }
 0x1e4   :  { %v5409_v23 = vpop.permute.xlu2 %1214  ;;  %v5411_v19 = vpop.permute.xlu1 %1194 }
 0x1e5   :  { %8739 = vst [vmem:[#allocation123_spill] sm:$0xff] %v5409_v23  ;;  %v5413_v20 = vpop.permute.xlu0 %1192  ;;  %v79_v23 = vld [vmem:[%s8616_s0 + $0x308] sm:$0xff] }
 0x1e6   :  { %8740 = vst [vmem:[#allocation124_spill] sm:$0xff] %v5411_v19 }
 0x1e7   :  { %8741 = vst [vmem:[#allocation125_spill] sm:$0xff] %v5413_v20  ;;  %v80_v20 = vld [vmem:[%s8616_s0 + $0x318] sm:$0xff] }
 0x1ea   :  { %1286 = vrot.lane.b32.xlu2 %v77_v58, %s4360_s25  ;;  %1284 = vrot.lane.b32.xlu1 %v76_v13, %s4360_s25  ;;  %v78_v13 = vld [vmem:[%s8616_s0 + $0x300] sm:$0xff] }
 0x1eb   :  { %1282 = vrot.lane.b32.xlu0 %v75_v11, %s4360_s25 }
 0x1ec   :  { %v5427_v14 = vpop.permute.xlu2 %1220  ;;  %v5429_v37 = vpop.permute.xlu1 %1200 }
 0x1ed   :  { %8742 = vst [vmem:[#allocation126_spill] sm:$0xff] %v5427_v14  ;;  %v5431_v19 = vpop.permute.xlu0 %1198  ;;  %v3852_v14 = vld [vmem:[%s8616_s0 + $0x330] sm:$0xff] }
 0x1ee   :  { %8743 = vst [vmem:[#allocation127_spill] sm:$0xff] %v5429_v37 }
 0x1ef   :  { %8744 = vst [vmem:[#allocation128_spill] sm:$0xff] %v5431_v19  ;;  %v3853_v19 = vld [vmem:[%s8616_s0 + $0x338] sm:$0xff] }
 0x1f2   :  { %1292 = vrot.lane.b32.xlu2 %v80_v20, %s4360_s25  ;;  %1290 = vrot.lane.b32.xlu1 %v79_v23, %s4360_s25  ;;  %v81_v20 = vld [vmem:[%s8616_s0 + $0x320] sm:$0xff] }
 0x1f3   :  { %1288 = vrot.lane.b32.xlu0 %v78_v13, %s4360_s25 }
 0x1f4   :  { %v5445_v58 = vpop.permute.xlu2 %1226  ;;  %v5447_v11 = vpop.permute.xlu1 %1206 }
 0x1f5   :  { %8745 = vst [vmem:[#allocation129_spill] sm:$0xff] %v5445_v58  ;;  %v5449_v37 = vpop.permute.xlu0 %1204 }
 0x1f6   :  { %8746 = vst [vmem:[#allocation130_spill] sm:$0xff] %v5447_v11  ;;  %v3957_v11 = vld [vmem:[%s8616_s0 + $0x21a] sm:$0xff] }
 0x1f7   :  { %8747 = vst [vmem:[#allocation131_spill] sm:$0xff] %v5449_v37  ;;  %v4020_v37 = vld [vmem:[%s8616_s0 + $0x228] sm:$0xff] }
 0x1fa   :  { %1298 = vrot.lane.b32.xlu2 %v3853_v19, %s4360_s25  ;;  %1296 = vrot.lane.b32.xlu1 %v3852_v14, %s4360_s25  ;;  %v3854_v19 = vld [vmem:[%s8616_s0 + $0x19] sm:$0xff] }
 0x1fb   :  { %1294 = vrot.lane.b32.xlu0 %v81_v20, %s4360_s25 }
 0x1fc   :  { %v5463_v23 = vpop.permute.xlu2 %1232  ;;  %v5465_v13 = vpop.permute.xlu1 %1212 }
 0x1fd   :  { %8748 = vst [vmem:[#allocation132_spill] sm:$0xff] %v5463_v23  ;;  %v5467_v58 = vpop.permute.xlu0 %1210 }
 0x1fe   :  { %8749 = vst [vmem:[#allocation133_spill] sm:$0xff] %v5465_v13  ;;  %v3859_v13 = vld [vmem:[%s8616_s0 + $0x51] sm:$0xff] }
 0x1ff   :  { %8750 = vst [vmem:[#allocation134_spill] sm:$0xff] %v5467_v58  ;;  %v3858_v58 = vld [vmem:[%s8616_s0 + $0x49] sm:$0xff] }
 0x202   :  { %1432 = vrot.lane.b32.xlu2 %v3856_v38, %s4361_s5  ;;  %1430 = vrot.lane.b32.xlu1 %v3855_v44, %s4361_s5  ;;  %v3857_v44 = vld [vmem:[%s8616_s0 + $0x39] sm:$0xff] }
 0x203   :  { %1428 = vrot.lane.b32.xlu0 %v3854_v19, %s4361_s5 }
 0x204   :  { %v5481_v14 = vpop.permute.xlu2 %1238  ;;  %v5483_v20 = vpop.permute.xlu1 %1218 }
 0x205   :  { %8751 = vst [vmem:[#allocation135_spill] sm:$0xff] %v5481_v14  ;;  %v5485_v23 = vpop.permute.xlu0 %1216  ;;  %v3861_v14 = vld [vmem:[%s8616_s0 + $0x69] sm:$0xff] }
 0x206   :  { %8752 = vst [vmem:[#allocation136_spill] sm:$0xff] %v5483_v20 }
 0x207   :  { %8753 = vst [vmem:[#allocation137_spill] sm:$0xff] %v5485_v23  ;;  %v3862_v23 = vld [vmem:[%s8616_s0 + $0x79] sm:$0xff] }
 0x20a   :  { %1438 = vrot.lane.b32.xlu2 %v3859_v13, %s4361_s5  ;;  %1436 = vrot.lane.b32.xlu1 %v3858_v58, %s4361_s5  ;;  %v3860_v58 = vld [vmem:[%s8616_s0 + $0x61] sm:$0xff] }
 0x20b   :  { %1434 = vrot.lane.b32.xlu0 %v3857_v44, %s4361_s5 }
 0x20c   :  { %v5499_v38 = vpop.permute.xlu2 %1244  ;;  %v5501_v19 = vpop.permute.xlu1 %1224 }
 0x20d   :  { %8754 = vst [vmem:[#allocation138_spill] sm:$0xff] %v5499_v38  ;;  %v5503_v20 = vpop.permute.xlu0 %1222  ;;  %v3864_v38 = vld [vmem:[%s8616_s0 + $0x91] sm:$0xff] }
 0x20e   :  { %8755 = vst [vmem:[#allocation139_spill] sm:$0xff] %v5501_v19 }
 0x20f   :  { %8756 = vst [vmem:[#allocation140_spill] sm:$0xff] %v5503_v20  ;;  %v3865_v20 = vld [vmem:[%s8616_s0 + $0x99] sm:$0xff] }
 0x212   :  { %1444 = vrot.lane.b32.xlu2 %v3862_v23, %s4361_s5  ;;  %1442 = vrot.lane.b32.xlu1 %v3861_v14, %s4361_s5  ;;  %v3863_v23 = vld [vmem:[%s8616_s0 + $0x81] sm:$0xff] }
 0x213   :  { %1440 = vrot.lane.b32.xlu0 %v3860_v58, %s4361_s5 }
 0x214   :  { %v5517_v13 = vpop.permute.xlu2 %1250  ;;  %v5519_v44 = vpop.permute.xlu1 %1230 }
 0x215   :  { %8757 = vst [vmem:[#allocation141_spill] sm:$0xff] %v5517_v13  ;;  %v5521_v19 = vpop.permute.xlu0 %1228  ;;  %v3867_v13 = vld [vmem:[%s8616_s0 + $0xb1] sm:$0xff] }
 0x216   :  { %8758 = vst [vmem:[#allocation142_spill] sm:$0xff] %v5519_v44 }
 0x217   :  { %8759 = vst [vmem:[#allocation143_spill] sm:$0xff] %v5521_v19  ;;  %v3868_v19 = vld [vmem:[%s8616_s0 + $0xc1] sm:$0xff] }
 0x21a   :  { %1450 = vrot.lane.b32.xlu2 %v3865_v20, %s4361_s5  ;;  %1448 = vrot.lane.b32.xlu1 %v3864_v38, %s4361_s5  ;;  %v3866_v20 = vld [vmem:[%s8616_s0 + $0xa9] sm:$0xff] }
 0x21b   :  { %1446 = vrot.lane.b32.xlu0 %v3863_v23, %s4361_s5 }
 0x21c   :  { %v5535_v14 = vpop.permute.xlu2 %1256  ;;  %v5537_v58 = vpop.permute.xlu1 %1236 }
 0x21d   :  { %8760 = vst [vmem:[#allocation144_spill] sm:$0xff] %v5535_v14  ;;  %v5539_v44 = vpop.permute.xlu0 %1234  ;;  %v3871_v14 = vld [vmem:[%s8616_s0 + $0xe1] sm:$0xff] }
 0x21e   :  { %8761 = vst [vmem:[#allocation145_spill] sm:$0xff] %v5537_v58  ;;  %v3870_v58 = vld [vmem:[%s8616_s0 + $0xd9] sm:$0xff] }
 0x21f   :  { %8762 = vst [vmem:[#allocation146_spill] sm:$0xff] %v5539_v44 }
 0x222   :  { %1456 = vrot.lane.b32.xlu2 %v3868_v19, %s4361_s5  ;;  %1454 = vrot.lane.b32.xlu1 %v3867_v13, %s4361_s5  ;;  %v3869_v19 = vld [vmem:[%s8616_s0 + $0xc9] sm:$0xff] }
 0x223   :  { %1452 = vrot.lane.b32.xlu0 %v3866_v20, %s4361_s5 }
 0x224   :  { %v5553_v38 = vpop.permute.xlu2 %1262  ;;  %v5555_v23 = vpop.permute.xlu1 %1242 }
 0x225   :  { %8763 = vst [vmem:[#allocation147_spill] sm:$0xff] %v5553_v38  ;;  %v5557_v44 = vpop.permute.xlu0 %1240 }
 0x226   :  { %8764 = vst [vmem:[#allocation148_spill] sm:$0xff] %v5555_v23  ;;  %v3874_v23 = vld [vmem:[%s8616_s0 + $0x109] sm:$0xff] }
 0x227   :  { %8765 = vst [vmem:[#allocation149_spill] sm:$0xff] %v5557_v44  ;;  %v3873_v44 = vld [vmem:[%s8616_s0 + $0xf9] sm:$0xff] }
 0x22a   :  { %1462 = vrot.lane.b32.xlu2 %v3871_v14, %s4361_s5  ;;  %1460 = vrot.lane.b32.xlu1 %v3870_v58, %s4361_s5  ;;  %v3872_v14 = vld [vmem:[%s8616_s0 + $0xf1] sm:$0xff] }
 0x22b   :  { %1458 = vrot.lane.b32.xlu0 %v3869_v19, %s4361_s5 }
 0x22c   :  { %v5571_v13 = vpop.permute.xlu2 %1268  ;;  %v5573_v20 = vpop.permute.xlu1 %1248 }
 0x22d   :  { %8766 = vst [vmem:[#allocation150_spill] sm:$0xff] %v5571_v13  ;;  %v5575_v38 = vpop.permute.xlu0 %1246  ;;  %v3876_v13 = vld [vmem:[%s8616_s0 + $0x121] sm:$0xff] }
 0x22e   :  { %8767 = vst [vmem:[#allocation151_spill] sm:$0xff] %v5573_v20 }
 0x22f   :  { %8768 = vst [vmem:[#allocation152_spill] sm:$0xff] %v5575_v38  ;;  %v3877_v38 = vld [vmem:[%s8616_s0 + $0x129] sm:$0xff] }
 0x232   :  { %1468 = vrot.lane.b32.xlu2 %v3874_v23, %s4361_s5  ;;  %1466 = vrot.lane.b32.xlu1 %v3873_v44, %s4361_s5  ;;  %v3875_v44 = vld [vmem:[%s8616_s0 + $0x111] sm:$0xff] }
 0x233   :  { %1464 = vrot.lane.b32.xlu0 %v3872_v14, %s4361_s5 }
 0x234   :  { %v5589_v58 = vpop.permute.xlu2 %1274  ;;  %v5591_v19 = vpop.permute.xlu1 %1254 }
 0x235   :  { %8769 = vst [vmem:[#allocation153_spill] sm:$0xff] %v5591_v19  ;;  %v5593_v20 = vpop.permute.xlu0 %1252 }
 0x236   :  { %8770 = vst [vmem:[#allocation154_spill] sm:$0xff] %v5593_v20  ;;  %v3880_v20 = vld [vmem:[%s8616_s0 + $0x151] sm:$0xff] }
 0x23a   :  { %1474 = vrot.lane.b32.xlu2 %v3877_v38, %s4361_s5  ;;  %1472 = vrot.lane.b32.xlu1 %v3876_v13, %s4361_s5  ;;  %v3878_v38 = vld [vmem:[%s8616_s0 + $0x139] sm:$0xff] }
 0x23b   :  { %1470 = vrot.lane.b32.xlu0 %v3875_v44, %s4361_s5 }
 0x23c   :  { %v5607_v23 = vpop.permute.xlu2 %1280  ;;  %v5609_v14 = vpop.permute.xlu1 %1260 }
 0x23d   :  { %8771 = vst [vmem:[#allocation155_spill] sm:$0xff] %v5609_v14  ;;  %v5611_v19 = vpop.permute.xlu0 %1258 }
 0x23e   :  { %8772 = vst [vmem:[#allocation156_spill] sm:$0xff] %v5611_v19  ;;  %v3883_v19 = vld [vmem:[%s8616_s0 + $0x171] sm:$0xff] }
 0x242   :  { %1480 = vrot.lane.b32.xlu2 %v3880_v20, %s4361_s5  ;;  %1478 = vrot.lane.b32.xlu1 %v3879_v34, %s4361_s5  ;;  %v3881_v34 = vld [vmem:[%s8616_s0 + $0x159] sm:$0xff] }
 0x243   :  { %1476 = vrot.lane.b32.xlu0 %v3878_v38, %s4361_s5 }
 0x244   :  { %v5625_v13 = vpop.permute.xlu2 %1286  ;;  %v5627_v44 = vpop.permute.xlu1 %1266 }
 0x245   :  { %8773 = vst [vmem:[#allocation157_spill] sm:$0xff] %v5627_v44  ;;  %v5629_v14 = vpop.permute.xlu0 %1264 }
 0x246   :  { %8774 = vst [vmem:[#allocation158_spill] sm:$0xff] %v5629_v14  ;;  %v3886_v14 = vld [vmem:[%s8616_s0 + $0x1c9] sm:$0xff] }
 0x24a   :  { %1486 = vrot.lane.b32.xlu2 %v3883_v19, %s4361_s5  ;;  %1484 = vrot.lane.b32.xlu1 %v3882_v59, %s4361_s5  ;;  %v3884_v59 = vld [vmem:[%s8616_s0 + $0x181] sm:$0xff] }
 0x24b   :  { %1482 = vrot.lane.b32.xlu0 %v3881_v34, %s4361_s5 }
 0x24c   :  { %v5643_v20 = vpop.permute.xlu2 %1292  ;;  %v5645_v38 = vpop.permute.xlu1 %1272 }
 0x24d   :  { %8775 = vst [vmem:[#allocation159_spill] sm:$0xff] %v5643_v20  ;;  %v5647_v44 = vpop.permute.xlu0 %1270  ;;  %v4089_v20 = vld [vmem:[%s8616_s0 + $0x261] sm:$0xff] }
 0x24e   :  { %8776 = vst [vmem:[#allocation160_spill] sm:$0xff] %v5645_v38 }
 0x24f   :  { %8777 = vst [vmem:[#allocation161_spill] sm:$0xff] %v5647_v44  ;;  %v3889_v44 = vld [vmem:[%s8616_s0 + $0x1e9] sm:$0xff] }
 0x252   :  { %1492 = vrot.lane.b32.xlu2 %v3886_v14, %s4361_s5  ;;  %1490 = vrot.lane.b32.xlu1 %v3885_v52, %s4361_s5  ;;  %v3887_v52 = vld [vmem:[%s8616_s0 + $0x1d1] sm:$0xff] }
 0x253   :  { %1488 = vrot.lane.b32.xlu0 %v3884_v59, %s4361_s5 }
 0x254   :  { %v5661_v19 = vpop.permute.xlu2 %1298  ;;  %v5663_v34 = vpop.permute.xlu1 %1278 }
 0x255   :  { %8778 = vst [vmem:[#allocation162_spill] sm:$0xff] %v5661_v19  ;;  %v5665_v38 = vpop.permute.xlu0 %1276  ;;  %v4011_v19 = vld [vmem:[%s8616_s0 + $0x188] sm:$0xff] }
 0x256   :  { %8779 = vst [vmem:[#allocation163_spill] sm:$0xff] %v5663_v34 }
 0x257   :  { %8780 = vst [vmem:[#allocation164_spill] sm:$0xff] %v5665_v38  ;;  %v3892_v38 = vld [vmem:[%s8616_s0 + $0x211] sm:$0xff] }
 0x25a   :  { %1498 = vrot.lane.b32.xlu2 %v3889_v44, %s4361_s5  ;;  %1496 = vrot.lane.b32.xlu1 %v3888_v17, %s4361_s5  ;;  %v3890_v17 = vld [vmem:[%s8616_s0 + $0x1f9] sm:$0xff] }
 0x25b   :  { %1494 = vrot.lane.b32.xlu0 %v3887_v52, %s4361_s5 }
 0x25c   :  { %v5679_v14 = vpop.permute.xlu2 %1432  ;;  %v5681_v59 = vpop.permute.xlu1 %1284 }
 0x25d   :  { %8781 = vst [vmem:[#allocation165_spill] sm:$0xff] %v5679_v14  ;;  %v5683_v34 = vpop.permute.xlu0 %1282  ;;  %v3903_v14 = vld [vmem:[%s8616_s0 + $0x291] sm:$0xff] }
 0x262   :  { %1504 = vrot.lane.b32.xlu2 %v3892_v38, %s4361_s5  ;;  %1502 = vrot.lane.b32.xlu1 %v3891_v0, %s4361_s5  ;;  %v3893_v0 = vld [vmem:[%s8616_s0 + $0x219] sm:$0xff] }
 0x263   :  { %1500 = vrot.lane.b32.xlu0 %v3890_v17, %s4361_s5 }
 0x264   :  { %v5697_v44 = vpop.permute.xlu2 %1438  ;;  %v5699_v52 = vpop.permute.xlu1 %1290 }
 0x265   :  { %8782 = vst [vmem:[#allocation166_spill] sm:$0xff] %v5697_v44  ;;  %v5701_v63 = vpop.permute.xlu0 %1288 }
 0x26a   :  { %1510 = vrot.lane.b32.xlu2 %v3895_v28, %s4361_s5  ;;  %1508 = vrot.lane.b32.xlu1 %v3894_v26, %s4361_s5  ;;  %v3896_v26 = vld [vmem:[%s8616_s0 + $0x241] sm:$0xff] }
 0x26b   :  { %1506 = vrot.lane.b32.xlu0 %v3893_v0, %s4361_s5 }
 0x26c   :  { %v5715_v38 = vpop.permute.xlu2 %1444  ;;  %v5717_v17 = vpop.permute.xlu1 %1296 }
 0x26d   :  { %8783 = vst [vmem:[#allocation167_spill] sm:$0xff] %v5715_v38  ;;  %v5719_v44 = vpop.permute.xlu0 %1294 }
 0x272   :  { %1516 = vrot.lane.b32.xlu2 %v3898_v21, %s4361_s5  ;;  %1514 = vrot.lane.b32.xlu1 %v3897_v2, %s4361_s5  ;;  %v3899_v2 = vld [vmem:[%s8616_s0 + $0x261] sm:$0xff] }
 0x273   :  { %1512 = vrot.lane.b32.xlu0 %v3896_v26, %s4361_s5 }
 0x274   :  { %v5733_v28 = vpop.permute.xlu2 %1450  ;;  %v5735_v0 = vpop.permute.xlu1 %1430 }
 0x275   :  { %8784 = vst [vmem:[#allocation168_spill] sm:$0xff] %v5733_v28  ;;  %v5737_v38 = vpop.permute.xlu0 %1428 }
 0x276   :  { %8785 = vst [vmem:[#allocation169_spill] sm:$0xff] %v5735_v0  ;;  %v3958_v0 = vld [vmem:[%s8616_s0 + $0x22a] sm:$0xff] }
 0x277   :  { %8786 = vst [vmem:[#allocation170_spill] sm:$0xff] %v5737_v38  ;;  %v4018_v38 = vld [vmem:[%s8616_s0 + $0x210] sm:$0xff] }
 0x27a   :  { %1522 = vrot.lane.b32.xlu2 %v3901_v55, %s4361_s5  ;;  %1520 = vrot.lane.b32.xlu1 %v3900_v40, %s4361_s5  ;;  %v3902_v40 = vld [vmem:[%s8616_s0 + $0x289] sm:$0xff] }
 0x27b   :  { %1518 = vrot.lane.b32.xlu0 %v3899_v2, %s4361_s5 }
 0x27c   :  { %v5751_v21 = vpop.permute.xlu2 %1456  ;;  %v5753_v26 = vpop.permute.xlu1 %1436 }
 0x27d   :  { %8787 = vst [vmem:[#allocation171_spill] sm:$0xff] %v5751_v21  ;;  %v5755_v28 = vpop.permute.xlu0 %1434 }
 0x27e   :  { %8788 = vst [vmem:[#allocation172_spill] sm:$0xff] %v5753_v26  ;;  %v3907_v26 = vld [vmem:[%s8616_s0 + $0x2c1] sm:$0xff] }
 0x27f   :  { %8789 = vst [vmem:[#allocation173_spill] sm:$0xff] %v5755_v28  ;;  %v3906_v28 = vld [vmem:[%s8616_s0 + $0x2b9] sm:$0xff] }
 0x282   :  { %1528 = vrot.lane.b32.xlu2 %v3904_v36, %s4361_s5  ;;  %1526 = vrot.lane.b32.xlu1 %v3903_v14, %s4361_s5  ;;  %v3905_v36 = vld [vmem:[%s8616_s0 + $0x2a9] sm:$0xff] }
 0x283   :  { %1524 = vrot.lane.b32.xlu0 %v3902_v40, %s4361_s5 }
 0x284   :  { %v5769_v55 = vpop.permute.xlu2 %1462  ;;  %v5771_v2 = vpop.permute.xlu1 %1442 }
 0x285   :  { %8790 = vst [vmem:[#allocation174_spill] sm:$0xff] %v5769_v55  ;;  %v5773_v21 = vpop.permute.xlu0 %1440  ;;  %v3954_v55 = vld [vmem:[%s8616_s0 + $0x1fa] sm:$0xff] }
 0x286   :  { %8791 = vst [vmem:[#allocation175_spill] sm:$0xff] %v5771_v2  ;;  %v4092_v2 = vld [vmem:[%s8616_s0 + $0x289] sm:$0xff] }
 0x287   :  { %8792 = vst [vmem:[#allocation176_spill] sm:$0xff] %v5773_v21 }
 0x28a   :  { %1534 = vrot.lane.b32.xlu2 %v3907_v26, %s4361_s5  ;;  %1532 = vrot.lane.b32.xlu1 %v3906_v28, %s4361_s5  ;;  %v3908_v28 = vld [vmem:[%s8616_s0 + $0x2d1] sm:$0xff] }
 0x28b   :  { %1530 = vrot.lane.b32.xlu0 %v3905_v36, %s4361_s5 }
 0x28c   :  { %v5787_v14 = vpop.permute.xlu2 %1468  ;;  %v5789_v40 = vpop.permute.xlu1 %1448 }
 0x28d   :  { %8793 = vst [vmem:[#allocation177_spill] sm:$0xff] %v5787_v14  ;;  %v5791_v21 = vpop.permute.xlu0 %1446  ;;  %v3912_v14 = vld [vmem:[%s8616_s0 + $0x301] sm:$0xff] }
 0x28e   :  { %8794 = vst [vmem:[#allocation178_spill] sm:$0xff] %v5789_v40 }
 0x28f   :  { %8795 = vst [vmem:[#allocation179_spill] sm:$0xff] %v5791_v21  ;;  %v3913_v21 = vld [vmem:[%s8616_s0 + $0x309] sm:$0xff] }
 0x292   :  { %1540 = vrot.lane.b32.xlu2 %v3910_v24, %s4361_s5  ;;  %1538 = vrot.lane.b32.xlu1 %v3909_v27, %s4361_s5  ;;  %v3911_v27 = vld [vmem:[%s8616_s0 + $0x2f1] sm:$0xff] }
 0x293   :  { %1536 = vrot.lane.b32.xlu0 %v3908_v28, %s4361_s5 }
 0x294   :  { %v5805_v26 = vpop.permute.xlu2 %1474  ;;  %v5807_v36 = vpop.permute.xlu1 %1454 }
 0x295   :  { %8796 = vst [vmem:[#allocation180_spill] sm:$0xff] %v5805_v26  ;;  %v5809_v40 = vpop.permute.xlu0 %1452  ;;  %v3915_v26 = vld [vmem:[%s8616_s0 + $0x321] sm:$0xff] }
 0x296   :  { %8797 = vst [vmem:[#allocation181_spill] sm:$0xff] %v5807_v36 }
 0x297   :  { %8798 = vst [vmem:[#allocation182_spill] sm:$0xff] %v5809_v40  ;;  %v3916_v40 = vld [vmem:[%s8616_s0 + $0x331] sm:$0xff] }
 0x29a   :  { %1546 = vrot.lane.b32.xlu2 %v3913_v21, %s4361_s5  ;;  %1544 = vrot.lane.b32.xlu1 %v3912_v14, %s4361_s5  ;;  %v3914_v21 = vld [vmem:[%s8616_s0 + $0x319] sm:$0xff] }
 0x29b   :  { %1542 = vrot.lane.b32.xlu0 %v3911_v27, %s4361_s5 }
 0x29c   :  { %v5823_v24 = vpop.permute.xlu2 %1480  ;;  %v5825_v28 = vpop.permute.xlu1 %1460 }
 0x29d   :  { %8799 = vst [vmem:[#allocation183_spill] sm:$0xff] %v5823_v24  ;;  %v5827_v36 = vpop.permute.xlu0 %1458  ;;  %v3919_v24 = vld [vmem:[%s8616_s0 + $0x22] sm:$0xff] }
 0x29e   :  { %8800 = vst [vmem:[#allocation184_spill] sm:$0xff] %v5825_v28  ;;  %v4014_v28 = vld [vmem:[%s8616_s0 + $0x1e0] sm:$0xff] }
 0x29f   :  { %8801 = vst [vmem:[#allocation185_spill] sm:$0xff] %v5827_v36 }
 0x2a2   :  { %1552 = vrot.lane.b32.xlu2 %v3916_v40, %s4361_s5  ;;  %1550 = vrot.lane.b32.xlu1 %v3915_v26, %s4361_s5  ;;  %v3917_v40 = vld [vmem:[%s8616_s0 + $0x339] sm:$0xff] }
 0x2a3   :  { %1548 = vrot.lane.b32.xlu0 %v3914_v21, %s4361_s5 }
 0x2a4   :  { %v5841_v14 = vpop.permute.xlu2 %1486  ;;  %v5843_v27 = vpop.permute.xlu1 %1466 }
 0x2a5   :  { %8802 = vst [vmem:[#allocation186_spill] sm:$0xff] %v5841_v14  ;;  %v5845_v36 = vpop.permute.xlu0 %1464 }
 0x2a6   :  { %8803 = vst [vmem:[#allocation187_spill] sm:$0xff] %v5843_v27  ;;  %v3922_v27 = vld [vmem:[%s8616_s0 + $0x4a] sm:$0xff] }
 0x2a7   :  { %8804 = vst [vmem:[#allocation188_spill] sm:$0xff] %v5845_v36  ;;  %v3921_v36 = vld [vmem:[%s8616_s0 + $0x3a] sm:$0xff] }
 0x2aa   :  { %1686 = vrot.lane.b32.xlu2 %v3919_v24, %s4362_s6  ;;  %1684 = vrot.lane.b32.xlu1 %v3918_v3, %s4362_s6  ;;  %v3920_v3 = vld [vmem:[%s8616_s0 + $0x32] sm:$0xff] }
 0x2ab   :  { %1554 = vrot.lane.b32.xlu0 %v3917_v40, %s4361_s5 }
 0x2ac   :  { %v5859_v26 = vpop.permute.xlu2 %1492  ;;  %v5861_v21 = vpop.permute.xlu1 %1472 }
 0x2ad   :  { %8805 = vst [vmem:[#allocation189_spill] sm:$0xff] %v5859_v26  ;;  %v5863_v14 = vpop.permute.xlu0 %1470  ;;  %v3924_v26 = vld [vmem:[%s8616_s0 + $0x62] sm:$0xff] }
 0x2ae   :  { %8806 = vst [vmem:[#allocation190_spill] sm:$0xff] %v5861_v21 }
 0x2af   :  { %8807 = vst [vmem:[#allocation191_spill] sm:$0xff] %v5863_v14  ;;  %v3925_v14 = vld [vmem:[%s8616_s0 + $0x6a] sm:$0xff] }
 0x2b2   :  { %1692 = vrot.lane.b32.xlu2 %v3922_v27, %s4362_s6  ;;  %1690 = vrot.lane.b32.xlu1 %v3921_v36, %s4362_s6  ;;  %v3923_v36 = vld [vmem:[%s8616_s0 + $0x52] sm:$0xff] }
 0x2b3   :  { %1688 = vrot.lane.b32.xlu0 %v3920_v3, %s4362_s6 }
 0x2b4   :  { %v5877_v24 = vpop.permute.xlu2 %1498  ;;  %v5879_v40 = vpop.permute.xlu1 %1478 }
 0x2b5   :  { %8808 = vst [vmem:[#allocation192_spill] sm:$0xff] %v5877_v24  ;;  %v5881_v21 = vpop.permute.xlu0 %1476  ;;  %v3927_v24 = vld [vmem:[%s8616_s0 + $0x82] sm:$0xff] }
 0x2b6   :  { %8809 = vst [vmem:[#allocation193_spill] sm:$0xff] %v5879_v40 }
 0x2b7   :  { %8810 = vst [vmem:[#allocation194_spill] sm:$0xff] %v5881_v21  ;;  %v3928_v21 = vld [vmem:[%s8616_s0 + $0x92] sm:$0xff] }
 0x2ba   :  { %1698 = vrot.lane.b32.xlu2 %v3925_v14, %s4362_s6  ;;  %1696 = vrot.lane.b32.xlu1 %v3924_v26, %s4362_s6  ;;  %v3926_v14 = vld [vmem:[%s8616_s0 + $0x7a] sm:$0xff] }
 0x2bb   :  { %1694 = vrot.lane.b32.xlu0 %v3923_v36, %s4362_s6 }
 0x2bc   :  { %v5895_v27 = vpop.permute.xlu2 %1504  ;;  %v5897_v3 = vpop.permute.xlu1 %1484 }
 0x2bd   :  { %8811 = vst [vmem:[#allocation195_spill] sm:$0xff] %v5895_v27  ;;  %v5899_v40 = vpop.permute.xlu0 %1482  ;;  %v3930_v27 = vld [vmem:[%s8616_s0 + $0xaa] sm:$0xff] }
 0x2be   :  { %8812 = vst [vmem:[#allocation196_spill] sm:$0xff] %v5897_v3 }
 0x2bf   :  { %8813 = vst [vmem:[#allocation197_spill] sm:$0xff] %v5899_v40  ;;  %v3931_v40 = vld [vmem:[%s8616_s0 + $0xb2] sm:$0xff] }
 0x2c2   :  { %1704 = vrot.lane.b32.xlu2 %v3928_v21, %s4362_s6  ;;  %1702 = vrot.lane.b32.xlu1 %v3927_v24, %s4362_s6  ;;  %v3929_v21 = vld [vmem:[%s8616_s0 + $0x9a] sm:$0xff] }
 0x2c3   :  { %1700 = vrot.lane.b32.xlu0 %v3926_v14, %s4362_s6 }
 0x2c4   :  { %v5913_v26 = vpop.permute.xlu2 %1510  ;;  %v5915_v36 = vpop.permute.xlu1 %1490 }
 0x2c5   :  { %8814 = vst [vmem:[#allocation198_spill] sm:$0xff] %v5913_v26  ;;  %v5917_v3 = vpop.permute.xlu0 %1488  ;;  %v3933_v26 = vld [vmem:[%s8616_s0 + $0xca] sm:$0xff] }
 0x2c6   :  { %8815 = vst [vmem:[#allocation199_spill] sm:$0xff] %v5915_v36 }
 0x2c7   :  { %8816 = vst [vmem:[#allocation200_spill] sm:$0xff] %v5917_v3  ;;  %v3934_v3 = vld [vmem:[%s8616_s0 + $0xda] sm:$0xff] }
 0x2ca   :  { %1710 = vrot.lane.b32.xlu2 %v3931_v40, %s4362_s6  ;;  %1708 = vrot.lane.b32.xlu1 %v3930_v27, %s4362_s6  ;;  %v3932_v40 = vld [vmem:[%s8616_s0 + $0xc2] sm:$0xff] }
 0x2cb   :  { %1706 = vrot.lane.b32.xlu0 %v3929_v21, %s4362_s6 }
 0x2cc   :  { %v5931_v24 = vpop.permute.xlu2 %1516  ;;  %v5933_v14 = vpop.permute.xlu1 %1496 }
 0x2cd   :  { %8817 = vst [vmem:[#allocation201_spill] sm:$0xff] %v5931_v24  ;;  %v5935_v36 = vpop.permute.xlu0 %1494 }
 0x2ce   :  { %8818 = vst [vmem:[#allocation202_spill] sm:$0xff] %v5933_v14  ;;  %v3937_v14 = vld [vmem:[%s8616_s0 + $0xfa] sm:$0xff] }
 0x2cf   :  { %8819 = vst [vmem:[#allocation203_spill] sm:$0xff] %v5935_v36  ;;  %v3936_v36 = vld [vmem:[%s8616_s0 + $0xf2] sm:$0xff] }
 0x2d2   :  { %1716 = vrot.lane.b32.xlu2 %v3934_v3, %s4362_s6  ;;  %1714 = vrot.lane.b32.xlu1 %v3933_v26, %s4362_s6  ;;  %v3935_v3 = vld [vmem:[%s8616_s0 + $0xe2] sm:$0xff] }
 0x2d3   :  { %1712 = vrot.lane.b32.xlu0 %v3932_v40, %s4362_s6 }
 0x2d4   :  { %v5949_v27 = vpop.permute.xlu2 %1522  ;;  %v5951_v21 = vpop.permute.xlu1 %1502 }
 0x2d5   :  { %8820 = vst [vmem:[#allocation204_spill] sm:$0xff] %v5949_v27  ;;  %v5953_v24 = vpop.permute.xlu0 %1500 }
 0x2d6   :  { %8821 = vst [vmem:[#allocation205_spill] sm:$0xff] %v5951_v21  ;;  %v3940_v21 = vld [vmem:[%s8616_s0 + $0x122] sm:$0xff] }
 0x2d7   :  { %8822 = vst [vmem:[#allocation206_spill] sm:$0xff] %v5953_v24  ;;  %v3939_v24 = vld [vmem:[%s8616_s0 + $0x112] sm:$0xff] }
 0x2da   :  { %1722 = vrot.lane.b32.xlu2 %v3937_v14, %s4362_s6  ;;  %1720 = vrot.lane.b32.xlu1 %v3936_v36, %s4362_s6  ;;  %v3938_v36 = vld [vmem:[%s8616_s0 + $0x10a] sm:$0xff] }
 0x2db   :  { %1718 = vrot.lane.b32.xlu0 %v3935_v3, %s4362_s6 }
 0x2dc   :  { %v5967_v26 = vpop.permute.xlu2 %1528  ;;  %v5969_v40 = vpop.permute.xlu1 %1508 }
 0x2dd   :  { %8823 = vst [vmem:[#allocation207_spill] sm:$0xff] %v5967_v26  ;;  %v5971_v27 = vpop.permute.xlu0 %1506  ;;  %v3942_v26 = vld [vmem:[%s8616_s0 + $0x13a] sm:$0xff] }
 0x2de   :  { %8824 = vst [vmem:[#allocation208_spill] sm:$0xff] %v5969_v40 }
 0x2df   :  { %8825 = vst [vmem:[#allocation209_spill] sm:$0xff] %v5971_v27  ;;  %v3943_v27 = vld [vmem:[%s8616_s0 + $0x142] sm:$0xff] }
 0x2e2   :  { %1728 = vrot.lane.b32.xlu2 %v3940_v21, %s4362_s6  ;;  %1726 = vrot.lane.b32.xlu1 %v3939_v24, %s4362_s6  ;;  %v3941_v24 = vld [vmem:[%s8616_s0 + $0x12a] sm:$0xff] }
 0x2e3   :  { %1724 = vrot.lane.b32.xlu0 %v3938_v36, %s4362_s6 }
 0x2e4   :  { %v5985_v14 = vpop.permute.xlu2 %1534  ;;  %v5987_v3 = vpop.permute.xlu1 %1514 }
 0x2e5   :  { %8826 = vst [vmem:[#allocation210_spill] sm:$0xff] %v5985_v14  ;;  %v5989_v40 = vpop.permute.xlu0 %1512  ;;  %v3945_v14 = vld [vmem:[%s8616_s0 + $0x15a] sm:$0xff] }
 0x2e6   :  { %8827 = vst [vmem:[#allocation211_spill] sm:$0xff] %v5987_v3 }
 0x2e7   :  { %8828 = vst [vmem:[#allocation212_spill] sm:$0xff] %v5989_v40  ;;  %v3946_v40 = vld [vmem:[%s8616_s0 + $0x16a] sm:$0xff] }
 0x2ea   :  { %1734 = vrot.lane.b32.xlu2 %v3943_v27, %s4362_s6  ;;  %1732 = vrot.lane.b32.xlu1 %v3942_v26, %s4362_s6  ;;  %v3944_v27 = vld [vmem:[%s8616_s0 + $0x152] sm:$0xff] }
 0x2eb   :  { %1730 = vrot.lane.b32.xlu0 %v3941_v24, %s4362_s6 }
 0x2ec   :  { %v6003_v21 = vpop.permute.xlu2 %1540  ;;  %v6005_v36 = vpop.permute.xlu1 %1520 }
 0x2ed   :  { %8829 = vst [vmem:[#allocation213_spill] sm:$0xff] %v6005_v36  ;;  %v6007_v3 = vpop.permute.xlu0 %1518 }
 0x2ee   :  { %8830 = vst [vmem:[#allocation214_spill] sm:$0xff] %v6007_v3  ;;  %v3949_v3 = vld [vmem:[%s8616_s0 + $0x18a] sm:$0xff] }
 0x2f2   :  { %1740 = vrot.lane.b32.xlu2 %v3946_v40, %s4362_s6  ;;  %1738 = vrot.lane.b32.xlu1 %v3945_v14, %s4362_s6  ;;  %v3947_v40 = vld [vmem:[%s8616_s0 + $0x172] sm:$0xff] }
 0x2f3   :  { %1736 = vrot.lane.b32.xlu0 %v3944_v27, %s4362_s6 }
 0x2f4   :  { %v6021_v26 = vpop.permute.xlu2 %1546  ;;  %v6023_v24 = vpop.permute.xlu1 %1526 }
 0x2f5   :  { %8831 = vst [vmem:[#allocation215_spill] sm:$0xff] %v6023_v24  ;;  %v6025_v36 = vpop.permute.xlu0 %1524 }
 0x2f6   :  { %8832 = vst [vmem:[#allocation216_spill] sm:$0xff] %v6025_v36  ;;  %v3952_v36 = vld [vmem:[%s8616_s0 + $0x1e2] sm:$0xff] }
 0x2fa   :  { %1746 = vrot.lane.b32.xlu2 %v3949_v3, %s4362_s6  ;;  %1744 = vrot.lane.b32.xlu1 %v3948_v41, %s4362_s6  ;;  %v3950_v41 = vld [vmem:[%s8616_s0 + $0x1ca] sm:$0xff] }
 0x2fb   :  { %1742 = vrot.lane.b32.xlu0 %v3947_v40, %s4362_s6 }
 0x2fc   :  { %v6039_v14 = vpop.permute.xlu2 %1552  ;;  %v6041_v27 = vpop.permute.xlu1 %1532 }
 0x2fd   :  { %8833 = vst [vmem:[#allocation217_spill] sm:$0xff] %v6041_v27  ;;  %v6043_v24 = vpop.permute.xlu0 %1530 }
 0x302   :  { %1752 = vrot.lane.b32.xlu2 %v3952_v36, %s4362_s6  ;;  %1750 = vrot.lane.b32.xlu1 %v3951_v22, %s4362_s6  ;;  %v3953_v22 = vld [vmem:[%s8616_s0 + $0x1ea] sm:$0xff] }
 0x303   :  { %1748 = vrot.lane.b32.xlu0 %v3950_v41, %s4362_s6 }
 0x304   :  { %v6057_v3 = vpop.permute.xlu2 %1686  ;;  %v6059_v40 = vpop.permute.xlu1 %1538 }
 0x305   :  { %8834 = vst [vmem:[#allocation218_spill] sm:$0xff] %v6057_v3  ;;  %v6061_v27 = vpop.permute.xlu0 %1536 }
 0x30a   :  { %1758 = vrot.lane.b32.xlu2 %v3955_v49, %s4362_s6  ;;  %1756 = vrot.lane.b32.xlu1 %v3954_v55, %s4362_s6  ;;  %v3956_v49 = vld [vmem:[%s8616_s0 + $0x212] sm:$0xff] }
 0x30b   :  { %1754 = vrot.lane.b32.xlu0 %v3953_v22, %s4362_s6 }
 0x30c   :  { %v6075_v36 = vpop.permute.xlu2 %1692  ;;  %v6077_v41 = vpop.permute.xlu1 %1544 }
 0x30d   :  { %8835 = vst [vmem:[#allocation219_spill] sm:$0xff] %v6075_v36  ;;  %v6079_v3 = vpop.permute.xlu0 %1542 }
 0x312   :  { %1764 = vrot.lane.b32.xlu2 %v3958_v0, %s4362_s6  ;;  %1762 = vrot.lane.b32.xlu1 %v3957_v11, %s4362_s6  ;;  %v3959_v11 = vld [vmem:[%s8616_s0 + $0x232] sm:$0xff] }
 0x313   :  { %1760 = vrot.lane.b32.xlu0 %v3956_v49, %s4362_s6 }
 0x314   :  { %v6093_v55 = vpop.permute.xlu2 %1698  ;;  %v6095_v22 = vpop.permute.xlu1 %1550 }
 0x315   :  { %8836 = vst [vmem:[#allocation220_spill] sm:$0xff] %v6093_v55  ;;  %v6097_v36 = vpop.permute.xlu0 %1548  ;;  %v4090_v55 = vld [vmem:[%s8616_s0 + $0x271] sm:$0xff] }
 0x316   :  { %8837 = vst [vmem:[#allocation221_spill] sm:$0xff] %v6095_v22  ;;  %v4086_v22 = vld [vmem:[%s8616_s0 + $0x241] sm:$0xff] }
 0x317   :  { %8838 = vst [vmem:[#allocation222_spill] sm:$0xff] %v6097_v36  ;;  %v4087_v36 = vld [vmem:[%s8616_s0 + $0x249] sm:$0xff] }
 0x31a   :  { %1770 = vrot.lane.b32.xlu2 %v3961_v32, %s4362_s6  ;;  %1768 = vrot.lane.b32.xlu1 %v3960_v48, %s4362_s6  ;;  %v3962_v48 = vld [vmem:[%s8616_s0 + $0x25a] sm:$0xff] }
 0x31b   :  { %1766 = vrot.lane.b32.xlu0 %v3959_v11, %s4362_s6 }
 0x31c   :  { %v6111_v0 = vpop.permute.xlu2 %1704  ;;  %v6113_v49 = vpop.permute.xlu1 %1684 }
 0x31d   :  { %8839 = vst [vmem:[#allocation223_spill] sm:$0xff] %v6111_v0  ;;  %v6115_v5 = vpop.permute.xlu0 %1554 }
 0x31e   :  { %8840 = vst [vmem:[#allocation224_spill] sm:$0xff] %v6113_v49  ;;  %v3966_v49 = vld [vmem:[%s8616_s0 + $0x28a] sm:$0xff] }
 0x31f   :  { %8841 = vst [vmem:[#allocation225_spill] sm:$0xff] %v6115_v5  ;;  %v3967_v5 = vld [vmem:[%s8616_s0 + $0x292] sm:$0xff] }
 0x322   :  { %1776 = vrot.lane.b32.xlu2 %v3964_v60, %s4362_s6  ;;  %1774 = vrot.lane.b32.xlu1 %v3963_v56, %s4362_s6  ;;  %v3965_v56 = vld [vmem:[%s8616_s0 + $0x27a] sm:$0xff] }
 0x323   :  { %1772 = vrot.lane.b32.xlu0 %v3962_v48, %s4362_s6 }
 0x324   :  { %v6129_v32 = vpop.permute.xlu2 %1710  ;;  %v6131_v11 = vpop.permute.xlu1 %1690 }
 0x325   :  { %8842 = vst [vmem:[#allocation226_spill] sm:$0xff] %v6129_v32  ;;  %v6133_v0 = vpop.permute.xlu0 %1688 }
 0x326   :  { %8843 = vst [vmem:[#allocation227_spill] sm:$0xff] %v6131_v11  ;;  %v3970_v11 = vld [vmem:[%s8616_s0 + $0x2ba] sm:$0xff] }
 0x327   :  { %8844 = vst [vmem:[#allocation228_spill] sm:$0xff] %v6133_v0  ;;  %v3969_v0 = vld [vmem:[%s8616_s0 + $0x2aa] sm:$0xff] }
 0x32a   :  { %1782 = vrot.lane.b32.xlu2 %v3967_v5, %s4362_s6  ;;  %1780 = vrot.lane.b32.xlu1 %v3966_v49, %s4362_s6  ;;  %v3968_v5 = vld [vmem:[%s8616_s0 + $0x2a2] sm:$0xff] }
 0x32b   :  { %1778 = vrot.lane.b32.xlu0 %v3965_v56, %s4362_s6 }
 0x32c   :  { %v6147_v60 = vpop.permute.xlu2 %1716  ;;  %v6149_v48 = vpop.permute.xlu1 %1696 }
 0x32d   :  { %8845 = vst [vmem:[#allocation229_spill] sm:$0xff] %v6147_v60  ;;  %v6151_v32 = vpop.permute.xlu0 %1694  ;;  %v3972_v60 = vld [vmem:[%s8616_s0 + $0x2d2] sm:$0xff] }
 0x32e   :  { %8846 = vst [vmem:[#allocation230_spill] sm:$0xff] %v6149_v48 }
 0x32f   :  { %8847 = vst [vmem:[#allocation231_spill] sm:$0xff] %v6151_v32  ;;  %v3973_v32 = vld [vmem:[%s8616_s0 + $0x2da] sm:$0xff] }
 0x332   :  { %1788 = vrot.lane.b32.xlu2 %v3970_v11, %s4362_s6  ;;  %1786 = vrot.lane.b32.xlu1 %v3969_v0, %s4362_s6  ;;  %v3971_v0 = vld [vmem:[%s8616_s0 + $0x2c2] sm:$0xff] }
 0x333   :  { %1784 = vrot.lane.b32.xlu0 %v3968_v5, %s4362_s6 }
 0x334   :  { %v6165_v49 = vpop.permute.xlu2 %1722  ;;  %v6167_v56 = vpop.permute.xlu1 %1702 }
 0x335   :  { %8848 = vst [vmem:[#allocation232_spill] sm:$0xff] %v6165_v49  ;;  %v6169_v48 = vpop.permute.xlu0 %1700  ;;  %v3975_v49 = vld [vmem:[%s8616_s0 + $0x2f2] sm:$0xff] }
 0x336   :  { %8849 = vst [vmem:[#allocation233_spill] sm:$0xff] %v6167_v56 }
 0x337   :  { %8850 = vst [vmem:[#allocation234_spill] sm:$0xff] %v6169_v48  ;;  %v3976_v48 = vld [vmem:[%s8616_s0 + $0x302] sm:$0xff] }
 0x33a   :  { %1794 = vrot.lane.b32.xlu2 %v3973_v32, %s4362_s6  ;;  %1792 = vrot.lane.b32.xlu1 %v3972_v60, %s4362_s6  ;;  %v3974_v32 = vld [vmem:[%s8616_s0 + $0x2ea] sm:$0xff] }
 0x33b   :  { %1790 = vrot.lane.b32.xlu0 %v3971_v0, %s4362_s6 }
 0x33c   :  { %v6183_v11 = vpop.permute.xlu2 %1728  ;;  %v6185_v5 = vpop.permute.xlu1 %1708 }
 0x33d   :  { %8851 = vst [vmem:[#allocation235_spill] sm:$0xff] %v6183_v11  ;;  %v6187_v56 = vpop.permute.xlu0 %1706  ;;  %v3978_v11 = vld [vmem:[%s8616_s0 + $0x31a] sm:$0xff] }
 0x33e   :  { %8852 = vst [vmem:[#allocation236_spill] sm:$0xff] %v6185_v5 }
 0x33f   :  { %8853 = vst [vmem:[#allocation237_spill] sm:$0xff] %v6187_v56  ;;  %v3979_v56 = vld [vmem:[%s8616_s0 + $0x322] sm:$0xff] }
 0x342   :  { %1800 = vrot.lane.b32.xlu2 %v3976_v48, %s4362_s6  ;;  %1798 = vrot.lane.b32.xlu1 %v3975_v49, %s4362_s6  ;;  %v3977_v48 = vld [vmem:[%s8616_s0 + $0x30a] sm:$0xff] }
 0x343   :  { %1796 = vrot.lane.b32.xlu0 %v3974_v32, %s4362_s6 }
 0x344   :  { %v6201_v60 = vpop.permute.xlu2 %1734  ;;  %v6203_v0 = vpop.permute.xlu1 %1714 }
 0x345   :  { %8854 = vst [vmem:[#allocation238_spill] sm:$0xff] %v6201_v60  ;;  %v6205_v5 = vpop.permute.xlu0 %1712  ;;  %v3981_v60 = vld [vmem:[%s8616_s0 + $0x33a] sm:$0xff] }
 0x346   :  { %8855 = vst [vmem:[#allocation239_spill] sm:$0xff] %v6203_v0 }
 0x347   :  { %8856 = vst [vmem:[#allocation240_spill] sm:$0xff] %v6205_v5  ;;  %v3982_v5 = vld [vmem:[%s8616_s0 + $0x30] sm:$0xff] }
 0x34a   :  { %1806 = vrot.lane.b32.xlu2 %v3979_v56, %s4362_s6  ;;  %1804 = vrot.lane.b32.xlu1 %v3978_v11, %s4362_s6  ;;  %v3980_v56 = vld [vmem:[%s8616_s0 + $0x332] sm:$0xff] }
 0x34b   :  { %1802 = vrot.lane.b32.xlu0 %v3977_v48, %s4362_s6 }
 0x34c   :  { %v6219_v49 = vpop.permute.xlu2 %1740  ;;  %v6221_v32 = vpop.permute.xlu1 %1720 }
 0x34d   :  { %8857 = vst [vmem:[#allocation241_spill] sm:$0xff] %v6219_v49  ;;  %v6223_v0 = vpop.permute.xlu0 %1718 }
 0x34e   :  { %8858 = vst [vmem:[#allocation242_spill] sm:$0xff] %v6221_v32  ;;  %v3985_v32 = vld [vmem:[%s8616_s0 + $0x50] sm:$0xff] }
 0x34f   :  { %8859 = vst [vmem:[#allocation243_spill] sm:$0xff] %v6223_v0  ;;  %v3984_v0 = vld [vmem:[%s8616_s0 + $0x48] sm:$0xff] }
 0x352   :  { %1940 = vrot.lane.b32.xlu2 %v3982_v5, %s4363_s13  ;;  %1810 = vrot.lane.b32.xlu1 %v3981_v60, %s4362_s6  ;;  %v3983_v5 = vld [vmem:[%s8616_s0 + $0x38] sm:$0xff] }
 0x353   :  { %1808 = vrot.lane.b32.xlu0 %v3980_v56, %s4362_s6 }
 0x354   :  { %v6237_v11 = vpop.permute.xlu2 %1746  ;;  %v6239_v48 = vpop.permute.xlu1 %1726 }
 0x355   :  { %8860 = vst [vmem:[#allocation244_spill] sm:$0xff] %v6237_v11  ;;  %v6241_v49 = vpop.permute.xlu0 %1724 }
 0x356   :  { %8861 = vst [vmem:[#allocation245_spill] sm:$0xff] %v6239_v48  ;;  %v3988_v48 = vld [vmem:[%s8616_s0 + $0x78] sm:$0xff] }
 0x357   :  { %8862 = vst [vmem:[#allocation246_spill] sm:$0xff] %v6241_v49  ;;  %v3987_v49 = vld [vmem:[%s8616_s0 + $0x68] sm:$0xff] }
 0x35a   :  { %1946 = vrot.lane.b32.xlu2 %v3985_v32, %s4363_s13  ;;  %1944 = vrot.lane.b32.xlu1 %v3984_v0, %s4363_s13  ;;  %v3986_v0 = vld [vmem:[%s8616_s0 + $0x60] sm:$0xff] }
 0x35b   :  { %1942 = vrot.lane.b32.xlu0 %v3983_v5, %s4363_s13 }
 0x35c   :  { %v6255_v60 = vpop.permute.xlu2 %1752  ;;  %v6257_v56 = vpop.permute.xlu1 %1732 }
 0x35d   :  { %8863 = vst [vmem:[#allocation247_spill] sm:$0xff] %v6255_v60  ;;  %v6259_v11 = vpop.permute.xlu0 %1730  ;;  %v3990_v60 = vld [vmem:[%s8616_s0 + $0x90] sm:$0xff] }
 0x35e   :  { %8864 = vst [vmem:[#allocation248_spill] sm:$0xff] %v6257_v56 }
 0x35f   :  { %8865 = vst [vmem:[#allocation249_spill] sm:$0xff] %v6259_v11  ;;  %v3991_v11 = vld [vmem:[%s8616_s0 + $0x98] sm:$0xff] }
 0x362   :  { %1952 = vrot.lane.b32.xlu2 %v3988_v48, %s4363_s13  ;;  %1950 = vrot.lane.b32.xlu1 %v3987_v49, %s4363_s13  ;;  %v3989_v49 = vld [vmem:[%s8616_s0 + $0x80] sm:$0xff] }
 0x363   :  { %1948 = vrot.lane.b32.xlu0 %v3986_v0, %s4363_s13 }
 0x364   :  { %v6273_v32 = vpop.permute.xlu2 %1758  ;;  %v6275_v5 = vpop.permute.xlu1 %1738 }
 0x365   :  { %8866 = vst [vmem:[#allocation250_spill] sm:$0xff] %v6273_v32  ;;  %v6277_v56 = vpop.permute.xlu0 %1736  ;;  %v3993_v32 = vld [vmem:[%s8616_s0 + $0xb0] sm:$0xff] }
 0x366   :  { %8867 = vst [vmem:[#allocation251_spill] sm:$0xff] %v6275_v5 }
 0x367   :  { %8868 = vst [vmem:[#allocation252_spill] sm:$0xff] %v6277_v56  ;;  %v3994_v56 = vld [vmem:[%s8616_s0 + $0xc0] sm:$0xff] }
 0x36a   :  { %1958 = vrot.lane.b32.xlu2 %v3991_v11, %s4363_s13  ;;  %1956 = vrot.lane.b32.xlu1 %v3990_v60, %s4363_s13  ;;  %v3992_v11 = vld [vmem:[%s8616_s0 + $0xa8] sm:$0xff] }
 0x36b   :  { %1954 = vrot.lane.b32.xlu0 %v3989_v49, %s4363_s13 }
 0x36c   :  { %v6291_v48 = vpop.permute.xlu2 %1764  ;;  %v6293_v0 = vpop.permute.xlu1 %1744 }
 0x36d   :  { %8869 = vst [vmem:[#allocation253_spill] sm:$0xff] %v6291_v48  ;;  %v6295_v5 = vpop.permute.xlu0 %1742  ;;  %v3996_v48 = vld [vmem:[%s8616_s0 + $0xd8] sm:$0xff] }
 0x36e   :  { %8870 = vst [vmem:[#allocation254_spill] sm:$0xff] %v6293_v0 }
 0x36f   :  { %8871 = vst [vmem:[#allocation255_spill] sm:$0xff] %v6295_v5  ;;  %v3997_v5 = vld [vmem:[%s8616_s0 + $0xe0] sm:$0xff] }
 0x372   :  { %1964 = vrot.lane.b32.xlu2 %v3994_v56, %s4363_s13  ;;  %1962 = vrot.lane.b32.xlu1 %v3993_v32, %s4363_s13  ;;  %v3995_v56 = vld [vmem:[%s8616_s0 + $0xc8] sm:$0xff] }
 0x373   :  { %1960 = vrot.lane.b32.xlu0 %v3992_v11, %s4363_s13 }
 0x374   :  { %v6309_v60 = vpop.permute.xlu2 %1770  ;;  %v6311_v49 = vpop.permute.xlu1 %1750 }
 0x375   :  { %8872 = vst [vmem:[#allocation256_spill] sm:$0xff] %v6309_v60  ;;  %v6313_v0 = vpop.permute.xlu0 %1748 }
 0x376   :  { %8873 = vst [vmem:[#allocation257_spill] sm:$0xff] %v6311_v49  ;;  %v4000_v49 = vld [vmem:[%s8616_s0 + $0x108] sm:$0xff] }
 0x377   :  { %8874 = vst [vmem:[#allocation258_spill] sm:$0xff] %v6313_v0  ;;  %v3999_v0 = vld [vmem:[%s8616_s0 + $0xf8] sm:$0xff] }
 0x37a   :  { %1970 = vrot.lane.b32.xlu2 %v3997_v5, %s4363_s13  ;;  %1968 = vrot.lane.b32.xlu1 %v3996_v48, %s4363_s13  ;;  %v3998_v5 = vld [vmem:[%s8616_s0 + $0xf0] sm:$0xff] }
 0x37b   :  { %1966 = vrot.lane.b32.xlu0 %v3995_v56, %s4363_s13 }
 0x37c   :  { %v6327_v32 = vpop.permute.xlu2 %1776  ;;  %v6329_v11 = vpop.permute.xlu1 %1756 }
 0x37d   :  { %8875 = vst [vmem:[#allocation259_spill] sm:$0xff] %v6327_v32  ;;  %v6331_v60 = vpop.permute.xlu0 %1754 }
 0x37e   :  { %8876 = vst [vmem:[#allocation260_spill] sm:$0xff] %v6329_v11  ;;  %v4003_v11 = vld [vmem:[%s8616_s0 + $0x128] sm:$0xff] }
 0x37f   :  { %8877 = vst [vmem:[#allocation261_spill] sm:$0xff] %v6331_v60  ;;  %v4002_v60 = vld [vmem:[%s8616_s0 + $0x120] sm:$0xff] }
 0x382   :  { %1976 = vrot.lane.b32.xlu2 %v4000_v49, %s4363_s13  ;;  %1974 = vrot.lane.b32.xlu1 %v3999_v0, %s4363_s13  ;;  %v4001_v0 = vld [vmem:[%s8616_s0 + $0x110] sm:$0xff] }
 0x383   :  { %1972 = vrot.lane.b32.xlu0 %v3998_v5, %s4363_s13 }
 0x384   :  { %v6345_v48 = vpop.permute.xlu2 %1782  ;;  %v6347_v56 = vpop.permute.xlu1 %1762 }
 0x385   :  { %8878 = vst [vmem:[#allocation262_spill] sm:$0xff] %v6345_v48  ;;  %v6349_v32 = vpop.permute.xlu0 %1760  ;;  %v4005_v48 = vld [vmem:[%s8616_s0 + $0x140] sm:$0xff] }
 0x386   :  { %8879 = vst [vmem:[#allocation263_spill] sm:$0xff] %v6347_v56 }
 0x387   :  { %8880 = vst [vmem:[#allocation264_spill] sm:$0xff] %v6349_v32  ;;  %v4006_v32 = vld [vmem:[%s8616_s0 + $0x150] sm:$0xff] }
 0x38a   :  { %1982 = vrot.lane.b32.xlu2 %v4003_v11, %s4363_s13  ;;  %1980 = vrot.lane.b32.xlu1 %v4002_v60, %s4363_s13  ;;  %v4004_v60 = vld [vmem:[%s8616_s0 + $0x138] sm:$0xff] }
 0x38b   :  { %1978 = vrot.lane.b32.xlu0 %v4001_v0, %s4363_s13 }
 0x38c   :  { %v6363_v49 = vpop.permute.xlu2 %1788  ;;  %v6365_v5 = vpop.permute.xlu1 %1768 }
 0x38d   :  { %8881 = vst [vmem:[#allocation265_spill] sm:$0xff] %v6363_v49  ;;  %v6367_v56 = vpop.permute.xlu0 %1766  ;;  %v4008_v49 = vld [vmem:[%s8616_s0 + $0x168] sm:$0xff] }
 0x38e   :  { %8882 = vst [vmem:[#allocation266_spill] sm:$0xff] %v6365_v5 }
 0x38f   :  { %8883 = vst [vmem:[#allocation267_spill] sm:$0xff] %v6367_v56  ;;  %v4009_v56 = vld [vmem:[%s8616_s0 + $0x170] sm:$0xff] }
 0x392   :  { %1988 = vrot.lane.b32.xlu2 %v4006_v32, %s4363_s13  ;;  %1986 = vrot.lane.b32.xlu1 %v4005_v48, %s4363_s13  ;;  %v4007_v32 = vld [vmem:[%s8616_s0 + $0x158] sm:$0xff] }
 0x393   :  { %1984 = vrot.lane.b32.xlu0 %v4004_v60, %s4363_s13 }
 0x394   :  { %v6381_v11 = vpop.permute.xlu2 %1794  ;;  %v6383_v0 = vpop.permute.xlu1 %1774 }
 0x395   :  { %8884 = vst [vmem:[#allocation268_spill] sm:$0xff] %v6383_v0  ;;  %v6385_v5 = vpop.permute.xlu0 %1772 }
 0x396   :  { %8885 = vst [vmem:[#allocation269_spill] sm:$0xff] %v6385_v5  ;;  %v4012_v5 = vld [vmem:[%s8616_s0 + $0x198] sm:$0xff] }
 0x39a   :  { %1994 = vrot.lane.b32.xlu2 %v4009_v56, %s4363_s13  ;;  %1992 = vrot.lane.b32.xlu1 %v4008_v49, %s4363_s13  ;;  %v4010_v56 = vld [vmem:[%s8616_s0 + $0x180] sm:$0xff] }
 0x39b   :  { %1990 = vrot.lane.b32.xlu0 %v4007_v32, %s4363_s13 }
 0x39c   :  { %v6399_v48 = vpop.permute.xlu2 %1800  ;;  %v6401_v60 = vpop.permute.xlu1 %1780 }
 0x39d   :  { %8886 = vst [vmem:[#allocation270_spill] sm:$0xff] %v6401_v60  ;;  %v6403_v0 = vpop.permute.xlu0 %1778  ;;  %v4015_v60 = vld [vmem:[%s8616_s0 + $0x1e8] sm:$0xff] }
 0x39e   :  { %8887 = vst [vmem:[#allocation271_spill] sm:$0xff] %v6403_v0 }
 0x3a2   :  { %2000 = vrot.lane.b32.xlu2 %v4012_v5, %s4363_s13  ;;  %1998 = vrot.lane.b32.xlu1 %v4011_v19, %s4363_s13  ;;  %v4013_v19 = vld [vmem:[%s8616_s0 + $0x1a0] sm:$0xff] }
 0x3a3   :  { %1996 = vrot.lane.b32.xlu0 %v4010_v56, %s4363_s13 }
 0x3a4   :  { %v6417_v49 = vpop.permute.xlu2 %1806  ;;  %v6419_v32 = vpop.permute.xlu1 %1786 }
 0x3a5   :  { %8888 = vst [vmem:[#allocation272_spill] sm:$0xff] %v6417_v49  ;;  %v6421_v0 = vpop.permute.xlu0 %1784  ;;  %v4077_v49 = vld [vmem:[%s8616_s0 + $0x1a1] sm:$0xff] }
 0x3a6   :  { %8889 = vst [vmem:[#allocation273_spill] sm:$0xff] %v6421_v0 }
 0x3aa   :  { %2006 = vrot.lane.b32.xlu2 %v4015_v60, %s4363_s13  ;;  %2004 = vrot.lane.b32.xlu1 %v4014_v28, %s4363_s13  ;;  %v4016_v28 = vld [vmem:[%s8616_s0 + $0x1f8] sm:$0xff] }
 0x3ab   :  { %2002 = vrot.lane.b32.xlu0 %v4013_v19, %s4363_s13 }
 0x3ac   :  { %v6435_v5 = vpop.permute.xlu2 %1940  ;;  %v6437_v56 = vpop.permute.xlu1 %1792 }
 0x3ad   :  { %8890 = vst [vmem:[#allocation274_spill] sm:$0xff] %v6435_v5  ;;  %v6439_v0 = vpop.permute.xlu0 %1790  ;;  %v4021_v5 = vld [vmem:[%s8616_s0 + $0x230] sm:$0xff] }
 0x3ae   :  { %8891 = vst [vmem:[#allocation275_spill] sm:$0xff] %v6439_v0 }
 0x3b2   :  { %2012 = vrot.lane.b32.xlu2 %v4018_v38, %s4363_s13  ;;  %2010 = vrot.lane.b32.xlu1 %v4017_v54, %s4363_s13  ;;  %v4019_v54 = vld [vmem:[%s8616_s0 + $0x218] sm:$0xff] }
 0x3b3   :  { %2008 = vrot.lane.b32.xlu0 %v4016_v28, %s4363_s13 }
 0x3b4   :  { %v6453_v60 = vpop.permute.xlu2 %1946  ;;  %v6455_v19 = vpop.permute.xlu1 %1798 }
 0x3b5   :  { %8892 = vst [vmem:[#allocation276_spill] sm:$0xff] %v6453_v60  ;;  %v6457_v0 = vpop.permute.xlu0 %1796 }
 0x3ba   :  { %2018 = vrot.lane.b32.xlu2 %v4021_v5, %s4363_s13  ;;  %2016 = vrot.lane.b32.xlu1 %v4020_v37, %s4363_s13  ;;  %v4022_v37 = vld [vmem:[%s8616_s0 + $0x240] sm:$0xff] }
 0x3bb   :  { %2014 = vrot.lane.b32.xlu0 %v4019_v54, %s4363_s13 }
 0x3bc   :  { %v6471_v38 = vpop.permute.xlu2 %1952  ;;  %v6473_v28 = vpop.permute.xlu1 %1804 }
 0x3bd   :  { %8893 = vst [vmem:[#allocation277_spill] sm:$0xff] %v6471_v38  ;;  %v6475_v60 = vpop.permute.xlu0 %1802 }
 0x3be   :  { %8894 = vst [vmem:[#allocation278_spill] sm:$0xff] %v6473_v28  ;;  %v4071_v28 = vld [vmem:[%s8616_s0 + $0x159] sm:$0xff] }
 0x3c2   :  { %2024 = vrot.lane.b32.xlu2 %v4024_v42, %s4363_s13  ;;  %2022 = vrot.lane.b32.xlu1 %v4023_v9, %s4363_s13  ;;  %v4025_v9 = vld [vmem:[%s8616_s0 + $0x260] sm:$0xff] }
 0x3c3   :  { %2020 = vrot.lane.b32.xlu0 %v4022_v37, %s4363_s13 }
 0x3c4   :  { %v6489_v5 = vpop.permute.xlu2 %1958  ;;  %v6491_v54 = vpop.permute.xlu1 %1810 }
 0x3c5   :  { %8895 = vst [vmem:[#allocation279_spill] sm:$0xff] %v6489_v5  ;;  %v6493_v38 = vpop.permute.xlu0 %1808 }
 0x3c6   :  { %8896 = vst [vmem:[#allocation280_spill] sm:$0xff] %v6491_v54  ;;  %v4030_v54 = vld [vmem:[%s8616_s0 + $0x2a0] sm:$0xff] }
 0x3ca   :  { %2030 = vrot.lane.b32.xlu2 %v4027_v57, %s4363_s13  ;;  %2028 = vrot.lane.b32.xlu1 %v4026_v16, %s4363_s13  ;;  %v4028_v16 = vld [vmem:[%s8616_s0 + $0x288] sm:$0xff] }
 0x3cb   :  { %2026 = vrot.lane.b32.xlu0 %v4025_v9, %s4363_s13 }
 0x3cc   :  { %v6507_v42 = vpop.permute.xlu2 %1964  ;;  %v6509_v37 = vpop.permute.xlu1 %1944 }
 0x3cd   :  { %8897 = vst [vmem:[#allocation281_spill] sm:$0xff] %v6507_v42  ;;  %v6511_v5 = vpop.permute.xlu0 %1942 }
 0x3ce   :  { %8898 = vst [vmem:[#allocation282_spill] sm:$0xff] %v6509_v37  ;;  %v4033_v37 = vld [vmem:[%s8616_s0 + $0x2c0] sm:$0xff] }
 0x3cf   :  { %8899 = vst [vmem:[#allocation283_spill] sm:$0xff] %v6511_v5  ;;  %v4032_v5 = vld [vmem:[%s8616_s0 + $0x2b8] sm:$0xff] }
 0x3d2   :  { %2036 = vrot.lane.b32.xlu2 %v4030_v54, %s4363_s13  ;;  %2034 = vrot.lane.b32.xlu1 %v4029_v15, %s4363_s13  ;;  %v4031_v15 = vld [vmem:[%s8616_s0 + $0x2a8] sm:$0xff] }
 0x3d3   :  { %2032 = vrot.lane.b32.xlu0 %v4028_v16, %s4363_s13 }
 0x3d4   :  { %v6525_v57 = vpop.permute.xlu2 %1970  ;;  %v6527_v9 = vpop.permute.xlu1 %1950 }
 0x3d5   :  { %8900 = vst [vmem:[#allocation284_spill] sm:$0xff] %v6525_v57  ;;  %v6529_v42 = vpop.permute.xlu0 %1948 }
 0x3d6   :  { %8901 = vst [vmem:[#allocation285_spill] sm:$0xff] %v6527_v9  ;;  %v4036_v9 = vld [vmem:[%s8616_s0 + $0x2e8] sm:$0xff] }
 0x3d7   :  { %8902 = vst [vmem:[#allocation286_spill] sm:$0xff] %v6529_v42  ;;  %v4035_v42 = vld [vmem:[%s8616_s0 + $0x2d8] sm:$0xff] }
 0x3da   :  { %2042 = vrot.lane.b32.xlu2 %v4033_v37, %s4363_s13  ;;  %2040 = vrot.lane.b32.xlu1 %v4032_v5, %s4363_s13  ;;  %v4034_v5 = vld [vmem:[%s8616_s0 + $0x2d0] sm:$0xff] }
 0x3db   :  { %2038 = vrot.lane.b32.xlu0 %v4031_v15, %s4363_s13 }
 0x3dc   :  { %v6543_v54 = vpop.permute.xlu2 %1976  ;;  %v6545_v16 = vpop.permute.xlu1 %1956 }
 0x3dd   :  { %8903 = vst [vmem:[#allocation287_spill] sm:$0xff] %v6543_v54  ;;  %v6547_v57 = vpop.permute.xlu0 %1954  ;;  %v4039_v54 = vld [vmem:[%s8616_s0 + $0x308] sm:$0xff] }
 0x3de   :  { %8904 = vst [vmem:[#allocation288_spill] sm:$0xff] %v6545_v16 }
 0x3df   :  { %8905 = vst [vmem:[#allocation289_spill] sm:$0xff] %v6547_v57  ;;  %v4074_v57 = vld [vmem:[%s8616_s0 + $0x181] sm:$0xff] }
 0x3e2   :  { %2048 = vrot.lane.b32.xlu2 %v4036_v9, %s4363_s13  ;;  %2046 = vrot.lane.b32.xlu1 %v4035_v42, %s4363_s13  ;;  %v4037_v42 = vld [vmem:[%s8616_s0 + $0x2f0] sm:$0xff] }
 0x3e3   :  { %2044 = vrot.lane.b32.xlu0 %v4034_v5, %s4363_s13 }
 0x3e4   :  { %v6561_v37 = vpop.permute.xlu2 %1982  ;;  %v6563_v15 = vpop.permute.xlu1 %1962 }
 0x3e5   :  { %8906 = vst [vmem:[#allocation290_spill] sm:$0xff] %v6561_v37  ;;  %v6565_v16 = vpop.permute.xlu0 %1960  ;;  %v4041_v37 = vld [vmem:[%s8616_s0 + $0x320] sm:$0xff] }
 0x3e6   :  { %8907 = vst [vmem:[#allocation291_spill] sm:$0xff] %v6563_v15 }
 0x3e7   :  { %8908 = vst [vmem:[#allocation292_spill] sm:$0xff] %v6565_v16  ;;  %v4042_v16 = vld [vmem:[%s8616_s0 + $0x330] sm:$0xff] }
 0x3ea   :  { %2054 = vrot.lane.b32.xlu2 %v4039_v54, %s4363_s13  ;;  %2052 = vrot.lane.b32.xlu1 %v4038_v50, %s4363_s13  ;;  %v4040_v50 = vld [vmem:[%s8616_s0 + $0x318] sm:$0xff] }
 0x3eb   :  { %2050 = vrot.lane.b32.xlu0 %v4037_v42, %s4363_s13 }
 0x3ec   :  { %v6579_v9 = vpop.permute.xlu2 %1988  ;;  %v6581_v5 = vpop.permute.xlu1 %1968 }
 0x3ed   :  { %8909 = vst [vmem:[#allocation293_spill] sm:$0xff] %v6579_v9  ;;  %v6583_v15 = vpop.permute.xlu0 %1966  ;;  %v4044_v9 = vld [vmem:[%s8616_s0 + $0x348] sm:$0xff] }
 0x3ee   :  { %8910 = vst [vmem:[#allocation294_spill] sm:$0xff] %v6581_v5 }
 0x3ef   :  { %8911 = vst [vmem:[#allocation295_spill] sm:$0xff] %v6583_v15  ;;  %v4045_v15 = vld [vmem:[%s8616_s0 + $0x350] sm:$0xff] }
 0x3f2   :  { %2060 = vrot.lane.b32.xlu2 %v4042_v16, %s4363_s13  ;;  %2058 = vrot.lane.b32.xlu1 %v4041_v37, %s4363_s13  ;;  %v4043_v16 = vld [vmem:[%s8616_s0 + $0x338] sm:$0xff] }
 0x3f3   :  { %2056 = vrot.lane.b32.xlu0 %v4040_v50, %s4363_s13 }
 0x3f4   :  { %v6597_v54 = vpop.permute.xlu2 %1994  ;;  %v6599_v42 = vpop.permute.xlu1 %1974 }
 0x3f5   :  { %8912 = vst [vmem:[#allocation296_spill] sm:$0xff] %v6597_v54  ;;  %v6601_v5 = vpop.permute.xlu0 %1972 }
 0x3f6   :  { %8913 = vst [vmem:[#allocation297_spill] sm:$0xff] %v6599_v42  ;;  %v4048_v42 = vld [vmem:[%s8616_s0 + $0x49] sm:$0xff] }
 0x3f7   :  { %8914 = vst [vmem:[#allocation298_spill] sm:$0xff] %v6601_v5  ;;  %v4047_v5 = vld [vmem:[%s8616_s0 + $0x39] sm:$0xff] }
 0x3fa   :  { %2066 = vrot.lane.b32.xlu2 %v4045_v15, %s4363_s13  ;;  %2064 = vrot.lane.b32.xlu1 %v4044_v9, %s4363_s13  ;;  %v4046_v15 = vld [vmem:[%s8616_s0 + $0x31] sm:$0xff] }
 0x3fb   :  { %2062 = vrot.lane.b32.xlu0 %v4043_v16, %s4363_s13 }
 0x3fc   :  { %v6615_v37 = vpop.permute.xlu2 %2000  ;;  %v6617_v50 = vpop.permute.xlu1 %1980 }
 0x3fd   :  { %8915 = vst [vmem:[#allocation299_spill] sm:$0xff] %v6615_v37  ;;  %v6619_v54 = vpop.permute.xlu0 %1978 }
 0x3fe   :  { %8916 = vst [vmem:[#allocation300_spill] sm:$0xff] %v6617_v50  ;;  %v4051_v50 = vld [vmem:[%s8616_s0 + $0x69] sm:$0xff] }
 0x3ff   :  { %8917 = vst [vmem:[#allocation301_spill] sm:$0xff] %v6619_v54  ;;  %v4050_v54 = vld [vmem:[%s8616_s0 + $0x61] sm:$0xff] }
 0x402   :  { %2200 = vrot.lane.b32.xlu2 %v4048_v42, %s4364_s28  ;;  %2198 = vrot.lane.b32.xlu1 %v4047_v5, %s4364_s28  ;;  %v4049_v5 = vld [vmem:[%s8616_s0 + $0x51] sm:$0xff] }
 0x403   :  { %2196 = vrot.lane.b32.xlu0 %v4046_v15, %s4364_s28 }
 0x404   :  { %v6633_v9 = vpop.permute.xlu2 %2006  ;;  %v6635_v16 = vpop.permute.xlu1 %1986 }
 0x405   :  { %8918 = vst [vmem:[#allocation302_spill] sm:$0xff] %v6633_v9  ;;  %v6637_v37 = vpop.permute.xlu0 %1984  ;;  %v4053_v9 = vld [vmem:[%s8616_s0 + $0x81] sm:$0xff] }
 0x406   :  { %8919 = vst [vmem:[#allocation303_spill] sm:$0xff] %v6635_v16 }
 0x407   :  { %8920 = vst [vmem:[#allocation304_spill] sm:$0xff] %v6637_v37  ;;  %v4054_v37 = vld [vmem:[%s8616_s0 + $0x91] sm:$0xff] }
 0x40a   :  { %2206 = vrot.lane.b32.xlu2 %v4051_v50, %s4364_s28  ;;  %2204 = vrot.lane.b32.xlu1 %v4050_v54, %s4364_s28  ;;  %v4052_v54 = vld [vmem:[%s8616_s0 + $0x79] sm:$0xff] }
 0x40b   :  { %2202 = vrot.lane.b32.xlu0 %v4049_v5, %s4364_s28 }
 0x40c   :  { %v6651_v42 = vpop.permute.xlu2 %2012  ;;  %v6653_v15 = vpop.permute.xlu1 %1992 }
 0x40d   :  { %8921 = vst [vmem:[#allocation305_spill] sm:$0xff] %v6651_v42  ;;  %v6655_v16 = vpop.permute.xlu0 %1990  ;;  %v4056_v42 = vld [vmem:[%s8616_s0 + $0xa9] sm:$0xff] }
 0x40e   :  { %8922 = vst [vmem:[#allocation306_spill] sm:$0xff] %v6653_v15 }
 0x40f   :  { %8923 = vst [vmem:[#allocation307_spill] sm:$0xff] %v6655_v16  ;;  %v4057_v16 = vld [vmem:[%s8616_s0 + $0xb1] sm:$0xff] }
 0x412   :  { %2212 = vrot.lane.b32.xlu2 %v4054_v37, %s4364_s28  ;;  %2210 = vrot.lane.b32.xlu1 %v4053_v9, %s4364_s28  ;;  %v4055_v37 = vld [vmem:[%s8616_s0 + $0x99] sm:$0xff] }
 0x413   :  { %2208 = vrot.lane.b32.xlu0 %v4052_v54, %s4364_s28 }
 0x414   :  { %v6669_v50 = vpop.permute.xlu2 %2018  ;;  %v6671_v5 = vpop.permute.xlu1 %1998 }
 0x415   :  { %8924 = vst [vmem:[#allocation308_spill] sm:$0xff] %v6669_v50  ;;  %v6673_v15 = vpop.permute.xlu0 %1996  ;;  %v4059_v50 = vld [vmem:[%s8616_s0 + $0xc9] sm:$0xff] }
 0x416   :  { %8925 = vst [vmem:[#allocation309_spill] sm:$0xff] %v6671_v5 }
 0x417   :  { %8926 = vst [vmem:[#allocation310_spill] sm:$0xff] %v6673_v15  ;;  %v4060_v15 = vld [vmem:[%s8616_s0 + $0xd9] sm:$0xff] }
 0x41a   :  { %2218 = vrot.lane.b32.xlu2 %v4057_v16, %s4364_s28  ;;  %2216 = vrot.lane.b32.xlu1 %v4056_v42, %s4364_s28  ;;  %v4058_v16 = vld [vmem:[%s8616_s0 + $0xc1] sm:$0xff] }
 0x41b   :  { %2214 = vrot.lane.b32.xlu0 %v4055_v37, %s4364_s28 }
 0x41c   :  { %v6687_v9 = vpop.permute.xlu2 %2024  ;;  %v6689_v54 = vpop.permute.xlu1 %2004 }
 0x41d   :  { %8927 = vst [vmem:[#allocation311_spill] sm:$0xff] %v6687_v9  ;;  %v6691_v5 = vpop.permute.xlu0 %2002  ;;  %v4063_v9 = vld [vmem:[%s8616_s0 + $0xf9] sm:$0xff] }
 0x41e   :  { %8928 = vst [vmem:[#allocation312_spill] sm:$0xff] %v6689_v54  ;;  %v4062_v54 = vld [vmem:[%s8616_s0 + $0xf1] sm:$0xff] }
 0x41f   :  { %8929 = vst [vmem:[#allocation313_spill] sm:$0xff] %v6691_v5 }
 0x422   :  { %2224 = vrot.lane.b32.xlu2 %v4060_v15, %s4364_s28  ;;  %2222 = vrot.lane.b32.xlu1 %v4059_v50, %s4364_s28  ;;  %v4061_v15 = vld [vmem:[%s8616_s0 + $0xe1] sm:$0xff] }
 0x423   :  { %2220 = vrot.lane.b32.xlu0 %v4058_v16, %s4364_s28 }
 0x424   :  { %v6705_v42 = vpop.permute.xlu2 %2030  ;;  %v6707_v37 = vpop.permute.xlu1 %2010 }
 0x425   :  { %8930 = vst [vmem:[#allocation314_spill] sm:$0xff] %v6705_v42  ;;  %v6709_v5 = vpop.permute.xlu0 %2008 }
 0x426   :  { %8931 = vst [vmem:[#allocation315_spill] sm:$0xff] %v6707_v37  ;;  %v4066_v37 = vld [vmem:[%s8616_s0 + $0x121] sm:$0xff] }
 0x427   :  { %8932 = vst [vmem:[#allocation316_spill] sm:$0xff] %v6709_v5  ;;  %v4065_v5 = vld [vmem:[%s8616_s0 + $0x111] sm:$0xff] }
 0x42a   :  { %2230 = vrot.lane.b32.xlu2 %v4063_v9, %s4364_s28  ;;  %2228 = vrot.lane.b32.xlu1 %v4062_v54, %s4364_s28  ;;  %v4064_v9 = vld [vmem:[%s8616_s0 + $0x109] sm:$0xff] }
 0x42b   :  { %2226 = vrot.lane.b32.xlu0 %v4061_v15, %s4364_s28 }
 0x42c   :  { %v6723_v50 = vpop.permute.xlu2 %2036  ;;  %v6725_v16 = vpop.permute.xlu1 %2016 }
 0x42d   :  { %8933 = vst [vmem:[#allocation317_spill] sm:$0xff] %v6723_v50  ;;  %v6727_v42 = vpop.permute.xlu0 %2014  ;;  %v4068_v50 = vld [vmem:[%s8616_s0 + $0x139] sm:$0xff] }
 0x42e   :  { %8934 = vst [vmem:[#allocation318_spill] sm:$0xff] %v6725_v16 }
 0x42f   :  { %8935 = vst [vmem:[#allocation319_spill] sm:$0xff] %v6727_v42  ;;  %v4069_v42 = vld [vmem:[%s8616_s0 + $0x141] sm:$0xff] }
 0x432   :  { %2236 = vrot.lane.b32.xlu2 %v4066_v37, %s4364_s28  ;;  %2234 = vrot.lane.b32.xlu1 %v4065_v5, %s4364_s28  ;;  %v4067_v5 = vld [vmem:[%s8616_s0 + $0x129] sm:$0xff] }
 0x433   :  { %2232 = vrot.lane.b32.xlu0 %v4064_v9, %s4364_s28 }
 0x434   :  { %v6741_v54 = vpop.permute.xlu2 %2042  ;;  %v6743_v15 = vpop.permute.xlu1 %2022 }
 0x435   :  { %8936 = vst [vmem:[#allocation320_spill] sm:$0xff] %v6743_v15  ;;  %v6745_v16 = vpop.permute.xlu0 %2020 }
 0x436   :  { %8937 = vst [vmem:[#allocation321_spill] sm:$0xff] %v6745_v16  ;;  %v4072_v16 = vld [vmem:[%s8616_s0 + $0x169] sm:$0xff] }
 0x43a   :  { %2242 = vrot.lane.b32.xlu2 %v4069_v42, %s4364_s28  ;;  %2240 = vrot.lane.b32.xlu1 %v4068_v50, %s4364_s28  ;;  %v4070_v42 = vld [vmem:[%s8616_s0 + $0x151] sm:$0xff] }
 0x43b   :  { %2238 = vrot.lane.b32.xlu0 %v4067_v5, %s4364_s28 }
 0x43c   :  { %v6759_v37 = vpop.permute.xlu2 %2048  ;;  %v6761_v9 = vpop.permute.xlu1 %2028 }
 0x43d   :  { %8938 = vst [vmem:[#allocation322_spill] sm:$0xff] %v6761_v9  ;;  %v6763_v15 = vpop.permute.xlu0 %2026 }
 0x43e   :  { %8939 = vst [vmem:[#allocation323_spill] sm:$0xff] %v6763_v15  ;;  %v4075_v15 = vld [vmem:[%s8616_s0 + $0x189] sm:$0xff] }
 0x442   :  { %2248 = vrot.lane.b32.xlu2 %v4072_v16, %s4364_s28  ;;  %2246 = vrot.lane.b32.xlu1 %v4071_v28, %s4364_s28  ;;  %v4073_v28 = vld [vmem:[%s8616_s0 + $0x171] sm:$0xff] }
 0x443   :  { %2244 = vrot.lane.b32.xlu0 %v4070_v42, %s4364_s28 }
 0x444   :  { %v6777_v50 = vpop.permute.xlu2 %2054  ;;  %v6779_v5 = vpop.permute.xlu1 %2034 }
 0x445   :  { %8940 = vst [vmem:[#allocation324_spill] sm:$0xff] %v6779_v5  ;;  %v6781_v9 = vpop.permute.xlu0 %2032 }
 0x446   :  { %8941 = vst [vmem:[#allocation325_spill] sm:$0xff] %v6781_v9  ;;  %v4078_v9 = vld [vmem:[%s8616_s0 + $0x1e1] sm:$0xff] }
 0x44a   :  { %2254 = vrot.lane.b32.xlu2 %v4075_v15, %s4364_s28  ;;  %2252 = vrot.lane.b32.xlu1 %v4074_v57, %s4364_s28  ;;  %v4076_v57 = vld [vmem:[%s8616_s0 + $0x199] sm:$0xff] }
 0x44b   :  { %2250 = vrot.lane.b32.xlu0 %v4073_v28, %s4364_s28 }
 0x44c   :  { %v6795_v16 = vpop.permute.xlu2 %2060  ;;  %v6797_v42 = vpop.permute.xlu1 %2040 }
 0x44d   :  { %8942 = vst [vmem:[#allocation326_spill] sm:$0xff] %v6795_v16  ;;  %v6799_v5 = vpop.permute.xlu0 %2038  ;;  %v4080_v16 = vld [vmem:[%s8616_s0 + $0x1f9] sm:$0xff] }
 0x44e   :  { %8943 = vst [vmem:[#allocation327_spill] sm:$0xff] %v6797_v42 }
 0x44f   :  { %8944 = vst [vmem:[#allocation328_spill] sm:$0xff] %v6799_v5  ;;  %v4081_v5 = vld [vmem:[%s8616_s0 + $0x201] sm:$0xff] }
 0x452   :  { %2260 = vrot.lane.b32.xlu2 %v4078_v9, %s4364_s28  ;;  %2258 = vrot.lane.b32.xlu1 %v4077_v49, %s4364_s28  ;;  %v4079_v49 = vld [vmem:[%s8616_s0 + $0x1e9] sm:$0xff] }
 0x453   :  { %2256 = vrot.lane.b32.xlu0 %v4076_v57, %s4364_s28 }
 0x454   :  { %v6813_v15 = vpop.permute.xlu2 %2066  ;;  %v6815_v28 = vpop.permute.xlu1 %2046 }
 0x455   :  { %8945 = vst [vmem:[#allocation329_spill] sm:$0xff] %v6813_v15  ;;  %v6817_v42 = vpop.permute.xlu0 %2044  ;;  %v4083_v15 = vld [vmem:[%s8616_s0 + $0x219] sm:$0xff] }
 0x456   :  { %8946 = vst [vmem:[#allocation330_spill] sm:$0xff] %v6815_v28 }
 0x457   :  { %8947 = vst [vmem:[#allocation331_spill] sm:$0xff] %v6817_v42  ;;  %v4084_v42 = vld [vmem:[%s8616_s0 + $0x229] sm:$0xff] }
 0x45a   :  { %2266 = vrot.lane.b32.xlu2 %v4081_v5, %s4364_s28  ;;  %2264 = vrot.lane.b32.xlu1 %v4080_v16, %s4364_s28  ;;  %v4082_v5 = vld [vmem:[%s8616_s0 + $0x211] sm:$0xff] }
 0x45b   :  { %2262 = vrot.lane.b32.xlu0 %v4079_v49, %s4364_s28 }
 0x45c   :  { %v6831_v9 = vpop.permute.xlu2 %2200  ;;  %v6833_v57 = vpop.permute.xlu1 %2052 }
 0x45d   :  { %8948 = vst [vmem:[#allocation332_spill] sm:$0xff] %v6831_v9  ;;  %v6835_v28 = vpop.permute.xlu0 %2050 }
 0x462   :  { %2272 = vrot.lane.b32.xlu2 %v4084_v42, %s4364_s28  ;;  %2270 = vrot.lane.b32.xlu1 %v4083_v15, %s4364_s28  ;;  %v4085_v42 = vld [vmem:[%s8616_s0 + $0x231] sm:$0xff] }
 0x463   :  { %2268 = vrot.lane.b32.xlu0 %v4082_v5, %s4364_s28 }
 0x464   :  { %v6849_v16 = vpop.permute.xlu2 %2206  ;;  %v6851_v49 = vpop.permute.xlu1 %2058 }
 0x465   :  { %8949 = vst [vmem:[#allocation333_spill] sm:$0xff] %v6849_v16  ;;  %v6853_v9 = vpop.permute.xlu0 %2056 }
 0x46a   :  { %2278 = vrot.lane.b32.xlu2 %v4087_v36, %s4364_s28  ;;  %2276 = vrot.lane.b32.xlu1 %v4086_v22, %s4364_s28  ;;  %v4088_v36 = vld [vmem:[%s8616_s0 + $0x259] sm:$0xff] }
 0x46b   :  { %2274 = vrot.lane.b32.xlu0 %v4085_v42, %s4364_s28 }
 0x46c   :  { %v6867_v15 = vpop.permute.xlu2 %2212  ;;  %v6869_v5 = vpop.permute.xlu1 %2064 }
 0x46d   :  { %8950 = vst [vmem:[#allocation334_spill] sm:$0xff] %v6867_v15  ;;  %v6871_v16 = vpop.permute.xlu0 %2062 }
 0x46e   :  { %8951 = vst [vmem:[#allocation335_spill] sm:$0xff] %v6871_v16  ;;  %v4093_v16 = vld [vmem:[%s8616_s0 + $0x291] sm:$0xff] }
 0x472   :  { %2284 = vrot.lane.b32.xlu2 %v4090_v55, %s4364_s28  ;;  %2282 = vrot.lane.b32.xlu1 %v4089_v20, %s4364_s28  ;;  %v4091_v20 = vld [vmem:[%s8616_s0 + $0x279] sm:$0xff] }
 0x473   :  { %2280 = vrot.lane.b32.xlu0 %v4088_v36, %s4364_s28 }
 0x474   :  { %v6885_v22 = vpop.permute.xlu2 %2218  ;;  %v6887_v42 = vpop.permute.xlu1 %2198 }
 0x475   :  { %8952 = vst [vmem:[#allocation336_spill] sm:$0xff] %v6885_v22  ;;  %v6889_v15 = vpop.permute.xlu0 %2196 }
 0x476   :  { %8953 = vst [vmem:[#allocation337_spill] sm:$0xff] %v6887_v42  ;;  %v4096_v42 = vld [vmem:[%s8616_s0 + $0x2b9] sm:$0xff] }
 0x477   :  { %8954 = vst [vmem:[#allocation338_spill] sm:$0xff] %v6889_v15  ;;  %v4095_v15 = vld [vmem:[%s8616_s0 + $0x2a9] sm:$0xff] }
 0x47a   :  { %2290 = vrot.lane.b32.xlu2 %v4093_v16, %s4364_s28  ;;  %2288 = vrot.lane.b32.xlu1 %v4092_v2, %s4364_s28  ;;  %v4094_v2 = vld [vmem:[%s8616_s0 + $0x2a1] sm:$0xff] }
 0x47b   :  { %2286 = vrot.lane.b32.xlu0 %v4091_v20, %s4364_s28 }
 0x47c   :  { %v6903_v55 = vpop.permute.xlu2 %2224  ;;  %v6905_v36 = vpop.permute.xlu1 %2204 }
 0x47d   :  { %8955 = vst [vmem:[#allocation339_spill] sm:$0xff] %v6903_v55  ;;  %v6907_v22 = vpop.permute.xlu0 %2202 }
 0x47e   :  { %8956 = vst [vmem:[#allocation340_spill] sm:$0xff] %v6905_v36  ;;  %v4099_v36 = vld [vmem:[%s8616_s0 + $0x2d9] sm:$0xff] }
 0x47f   :  { %8957 = vst [vmem:[#allocation341_spill] sm:$0xff] %v6907_v22  ;;  %v4098_v22 = vld [vmem:[%s8616_s0 + $0x2d1] sm:$0xff] }
 0x482   :  { %2296 = vrot.lane.b32.xlu2 %v4096_v42, %s4364_s28  ;;  %2294 = vrot.lane.b32.xlu1 %v4095_v15, %s4364_s28  ;;  %v4097_v15 = vld [vmem:[%s8616_s0 + $0x2c1] sm:$0xff] }
 0x483   :  { %2292 = vrot.lane.b32.xlu0 %v4094_v2, %s4364_s28 }
 0x484   :  { %v6921_v16 = vpop.permute.xlu2 %2230  ;;  %v6923_v20 = vpop.permute.xlu1 %2210 }
 0x485   :  { %8958 = vst [vmem:[#allocation342_spill] sm:$0xff] %v6921_v16  ;;  %v6925_v55 = vpop.permute.xlu0 %2208  ;;  %v4102_v16 = vld [vmem:[%s8616_s0 + $0x301] sm:$0xff] }
 0x486   :  { %8959 = vst [vmem:[#allocation343_spill] sm:$0xff] %v6923_v20  ;;  %v4101_v20 = vld [vmem:[%s8616_s0 + $0x2f1] sm:$0xff] }
 0x487   :  { %8960 = vst [vmem:[#allocation344_spill] sm:$0xff] %v6925_v55 }
 0x48a   :  { %2302 = vrot.lane.b32.xlu2 %v4099_v36, %s4364_s28  ;;  %2300 = vrot.lane.b32.xlu1 %v4098_v22, %s4364_s28  ;;  %v4100_v22 = vld [vmem:[%s8616_s0 + $0x2e9] sm:$0xff] }
 0x48b   :  { %2298 = vrot.lane.b32.xlu0 %v4097_v15, %s4364_s28 }
 0x48c   :  { %v6939_v42 = vpop.permute.xlu2 %2236  ;;  %v6941_v2 = vpop.permute.xlu1 %2216 }
 0x48d   :  { %8961 = vst [vmem:[#allocation345_spill] sm:$0xff] %v6939_v42  ;;  %v6943_v55 = vpop.permute.xlu0 %2214  ;;  %v4104_v42 = vld [vmem:[%s8616_s0 + $0x319] sm:$0xff] }
 0x48e   :  { %8962 = vst [vmem:[#allocation346_spill] sm:$0xff] %v6941_v2 }
 0x48f   :  { %8963 = vst [vmem:[#allocation347_spill] sm:$0xff] %v6943_v55  ;;  %v4105_v55 = vld [vmem:[%s8616_s0 + $0x321] sm:$0xff] }
 0x492   :  { %2308 = vrot.lane.b32.xlu2 %v4102_v16, %s4364_s28  ;;  %2306 = vrot.lane.b32.xlu1 %v4101_v20, %s4364_s28  ;;  %v4103_v16 = vld [vmem:[%s8616_s0 + $0x309] sm:$0xff] }
 0x493   :  { %2304 = vrot.lane.b32.xlu0 %v4100_v22, %s4364_s28 }
 0x494   :  { %v6957_v36 = vpop.permute.xlu2 %2242  ;;  %v6959_v15 = vpop.permute.xlu1 %2222 }
 0x495   :  { %8964 = vst [vmem:[#allocation348_spill] sm:$0xff] %v6957_v36  ;;  %v6961_v2 = vpop.permute.xlu0 %2220  ;;  %v4107_v36 = vld [vmem:[%s8616_s0 + $0x339] sm:$0xff] }
 0x496   :  { %8965 = vst [vmem:[#allocation349_spill] sm:$0xff] %v6959_v15 }
 0x497   :  { %8966 = vst [vmem:[#allocation350_spill] sm:$0xff] %v6961_v2  ;;  %v4108_v2 = vld [vmem:[%s8616_s0 + $0x349] sm:$0xff] }
 0x49a   :  { %2314 = vrot.lane.b32.xlu2 %v4105_v55, %s4364_s28  ;;  %2312 = vrot.lane.b32.xlu1 %v4104_v42, %s4364_s28  ;;  %v4106_v55 = vld [vmem:[%s8616_s0 + $0x331] sm:$0xff] }
 0x49b   :  { %2310 = vrot.lane.b32.xlu0 %v4103_v16, %s4364_s28 }
 0x49c   :  { %v6975_v20 = vpop.permute.xlu2 %2248  ;;  %v6977_v22 = vpop.permute.xlu1 %2228 }
 0x49d   :  { %8967 = vst [vmem:[#allocation351_spill] sm:$0xff] %v6975_v20  ;;  %v6979_v15 = vpop.permute.xlu0 %2226  ;;  %v4111_v20 = vld [vmem:[%s8616_s0 + $0x3a] sm:$0xff] }
 0x49e   :  { %8968 = vst [vmem:[#allocation352_spill] sm:$0xff] %v6977_v22  ;;  %v4110_v22 = vld [vmem:[%s8616_s0 + $0x32] sm:$0xff] }
 0x49f   :  { %8969 = vst [vmem:[#allocation353_spill] sm:$0xff] %v6979_v15 }
 0x4a2   :  { %2320 = vrot.lane.b32.xlu2 %v4108_v2, %s4364_s28  ;;  %2318 = vrot.lane.b32.xlu1 %v4107_v36, %s4364_s28  ;;  %v4109_v2 = vld [vmem:[%s8616_s0 + $0x351] sm:$0xff] }
 0x4a3   :  { %2316 = vrot.lane.b32.xlu0 %v4106_v55, %s4364_s28 }
 0x4a4   :  { %v6993_v42 = vpop.permute.xlu2 %2254  ;;  %v6995_v16 = vpop.permute.xlu1 %2234 }
 0x4a5   :  { %8970 = vst [vmem:[#allocation354_spill] sm:$0xff] %v6993_v42  ;;  %v6997_v15 = vpop.permute.xlu0 %2232 }
 0x4a6   :  { %8971 = vst [vmem:[#allocation355_spill] sm:$0xff] %v6995_v16  ;;  %v4114_v16 = vld [vmem:[%s8616_s0 + $0x62] sm:$0xff] }
 0x4a7   :  { %8972 = vst [vmem:[#allocation356_spill] sm:$0xff] %v6997_v15  ;;  %v4113_v15 = vld [vmem:[%s8616_s0 + $0x52] sm:$0xff] }
 0x4aa   :  { %2454 = vrot.lane.b32.xlu2 %v4111_v20, %s4365_s7  ;;  %2452 = vrot.lane.b32.xlu1 %v4110_v22, %s4365_s7  ;;  %v4112_v20 = vld [vmem:[%s8616_s0 + $0x4a] sm:$0xff] }
 0x4ab   :  { %2322 = vrot.lane.b32.xlu0 %v4109_v2, %s4364_s28 }
 0x4ac   :  { %v7011_v36 = vpop.permute.xlu2 %2260  ;;  %v7013_v55 = vpop.permute.xlu1 %2240 }
 0x4ad   :  { %8973 = vst [vmem:[#allocation357_spill] sm:$0xff] %v7011_v36  ;;  %v7015_v42 = vpop.permute.xlu0 %2238  ;;  %v4116_v36 = vld [vmem:[%s8616_s0 + $0x7a] sm:$0xff] }
 0x4ae   :  { %8974 = vst [vmem:[#allocation358_spill] sm:$0xff] %v7013_v55 }
 0x4af   :  { %8975 = vst [vmem:[#allocation359_spill] sm:$0xff] %v7015_v42  ;;  %v4117_v42 = vld [vmem:[%s8616_s0 + $0x82] sm:$0xff] }
 0x4b2   :  { %2460 = vrot.lane.b32.xlu2 %v4114_v16, %s4365_s7  ;;  %2458 = vrot.lane.b32.xlu1 %v4113_v15, %s4365_s7  ;;  %v4115_v15 = vld [vmem:[%s8616_s0 + $0x6a] sm:$0xff] }
 0x4b3   :  { %2456 = vrot.lane.b32.xlu0 %v4112_v20, %s4365_s7 }
 0x4b4   :  { %v7029_v22 = vpop.permute.xlu2 %2266  ;;  %v7031_v2 = vpop.permute.xlu1 %2246 }
 0x4b5   :  { %8976 = vst [vmem:[#allocation360_spill] sm:$0xff] %v7029_v22  ;;  %v7033_v55 = vpop.permute.xlu0 %2244  ;;  %v4158_v22 = vld [vmem:[%s8616_s0 + $0x2a2] sm:$0xff] }
 0x4b6   :  { %8977 = vst [vmem:[#allocation361_spill] sm:$0xff] %v7031_v2 }
 0x4b7   :  { %8978 = vst [vmem:[#allocation362_spill] sm:$0xff] %v7033_v55  ;;  %v4126_v55 = vld [vmem:[%s8616_s0 + $0xf2] sm:$0xff] }
 0x4ba   :  { %2466 = vrot.lane.b32.xlu2 %v4117_v42, %s4365_s7  ;;  %2464 = vrot.lane.b32.xlu1 %v4116_v36, %s4365_s7  ;;  %v4142_v42 = vld [vmem:[%s8616_s0 + $0x1e2] sm:$0xff] }
 0x4bb   :  { %2462 = vrot.lane.b32.xlu0 %v4115_v15, %s4365_s7 }
 0x4bc   :  { %v7047_v16 = vpop.permute.xlu2 %2272  ;;  %v7049_v20 = vpop.permute.xlu1 %2252 }
 0x4bd   :  { %8979 = vst [vmem:[#allocation363_spill] sm:$0xff] %v7047_v16  ;;  %v7051_v2 = vpop.permute.xlu0 %2250  ;;  %v4159_v16 = vld [vmem:[%s8616_s0 + $0x2aa] sm:$0xff] }
 0x4be   :  { %8980 = vst [vmem:[#allocation364_spill] sm:$0xff] %v7049_v20 }
 0x4bf   :  { %8981 = vst [vmem:[#allocation365_spill] sm:$0xff] %v7051_v2  ;;  %v4127_v2 = vld [vmem:[%s8616_s0 + $0xfa] sm:$0xff] }
 0x4c2   :  { %2484 = vrot.lane.b32.xlu2 %v4126_v55, %s4365_s7  ;;  %2548 = vrot.lane.b32.xlu1 %v4158_v22, %s4365_s7  ;;  %v4143_v55 = vld [vmem:[%s8616_s0 + $0x1ea] sm:$0xff] }
 0x4c3   :  { %2516 = vrot.lane.b32.xlu0 %v4142_v42, %s4365_s7 }
 0x4c4   :  { %v7065_v36 = vpop.permute.xlu2 %2278  ;;  %v7067_v15 = vpop.permute.xlu1 %2258 }
 0x4c5   :  { %8982 = vst [vmem:[#allocation366_spill] sm:$0xff] %v7065_v36  ;;  %v7069_v20 = vpop.permute.xlu0 %2256  ;;  %v4160_v36 = vld [vmem:[%s8616_s0 + $0x2ba] sm:$0xff] }
 0x4c6   :  { %8983 = vst [vmem:[#allocation367_spill] sm:$0xff] %v7067_v15 }
 0x4c7   :  { %8984 = vst [vmem:[#allocation368_spill] sm:$0xff] %v7069_v20  ;;  %v4128_v20 = vld [vmem:[%s8616_s0 + $0x10a] sm:$0xff] }
 0x4ca   :  { %2486 = vrot.lane.b32.xlu2 %v4127_v2, %s4365_s7  ;;  %2550 = vrot.lane.b32.xlu1 %v4159_v16, %s4365_s7  ;;  %v4144_v2 = vld [vmem:[%s8616_s0 + $0x1fa] sm:$0xff] }
 0x4cb   :  { %2518 = vrot.lane.b32.xlu0 %v4143_v55, %s4365_s7 }
 0x4cc   :  { %v7083_v22 = vpop.permute.xlu2 %2284  ;;  %v7085_v42 = vpop.permute.xlu1 %2264 }
 0x4cd   :  { %8985 = vst [vmem:[#allocation369_spill] sm:$0xff] %v7083_v22  ;;  %v7087_v15 = vpop.permute.xlu0 %2262 }
 0x4ce   :  { %8986 = vst [vmem:[#allocation370_spill] sm:$0xff] %v7085_v42  ;;  %v4129_v42 = vld [vmem:[%s8616_s0 + $0x112] sm:$0xff] }
 0x4cf   :  { %8987 = vst [vmem:[#allocation371_spill] sm:$0xff] %v7087_v15  ;;  %v4161_v15 = vld [vmem:[%s8616_s0 + $0x2c2] sm:$0xff] }
 0x4d2   :  { %2488 = vrot.lane.b32.xlu2 %v4128_v20, %s4365_s7  ;;  %2552 = vrot.lane.b32.xlu1 %v4160_v36, %s4365_s7  ;;  %v4145_v20 = vld [vmem:[%s8616_s0 + $0x202] sm:$0xff] }
 0x4d3   :  { %2520 = vrot.lane.b32.xlu0 %v4144_v2, %s4365_s7 }
 0x4d4   :  { %v7101_v16 = vpop.permute.xlu2 %2290  ;;  %v7103_v55 = vpop.permute.xlu1 %2270 }
 0x4d5   :  { %8988 = vst [vmem:[#allocation372_spill] sm:$0xff] %v7101_v16  ;;  %v7105_v22 = vpop.permute.xlu0 %2268 }
 0x4d6   :  { %8989 = vst [vmem:[#allocation373_spill] sm:$0xff] %v7103_v55  ;;  %v4130_v55 = vld [vmem:[%s8616_s0 + $0x122] sm:$0xff] }
 0x4d7   :  { %8990 = vst [vmem:[#allocation374_spill] sm:$0xff] %v7105_v22  ;;  %v4162_v22 = vld [vmem:[%s8616_s0 + $0x2d2] sm:$0xff] }
 0x4da   :  { %2490 = vrot.lane.b32.xlu2 %v4129_v42, %s4365_s7  ;;  %2554 = vrot.lane.b32.xlu1 %v4161_v15, %s4365_s7  ;;  %v4146_v15 = vld [vmem:[%s8616_s0 + $0x212] sm:$0xff] }
 0x4db   :  { %2522 = vrot.lane.b32.xlu0 %v4145_v20, %s4365_s7 }
 0x4dc   :  { %v7119_v36 = vpop.permute.xlu2 %2296  ;;  %v7121_v2 = vpop.permute.xlu1 %2276 }
 0x4dd   :  { %8991 = vst [vmem:[#allocation375_spill] sm:$0xff] %v7119_v36  ;;  %v7123_v16 = vpop.permute.xlu0 %2274 }
 0x4de   :  { %8992 = vst [vmem:[#allocation376_spill] sm:$0xff] %v7121_v2 }
 0x4df   :  { %8993 = vst [vmem:[#allocation377_spill] sm:$0xff] %v7123_v16  ;;  %v4272_v16 = vld [vmem:[%s8616_s0 + $0x2d0] sm:$0xff] }
 0x4e0   :  { %v2701_v36 = vsel %vm2644_vm0, %v4272_v16, %v4851_v46 }
 0x4e2   :  { %2492 = vrot.lane.b32.xlu2 %v4130_v55, %s4365_s7  ;;  %2556 = vrot.lane.b32.xlu1 %v4162_v22, %s4365_s7  ;;  %v4131_v22 = vld [vmem:[%s8616_s0 + $0x12a] sm:$0xff]  ;;  %v4163_v55 = vld [vmem:[%s8616_s0 + $0x2da] sm:$0xff] }
 0x4e3   :  { %2524 = vrot.lane.b32.xlu0 %v4146_v15, %s4365_s7  ;;  %v2766_v15 = vsel %vm2709_vm1, %v2701_v36, %v5305_v7 }
 0x4e4   :  { %v7137_v42 = vpop.permute.xlu2 %2302  ;;  %v7139_v20 = vpop.permute.xlu1 %2282  ;;  %v2831_v46 = vsel %vm2774_vm2, %v2766_v15, %v5681_v59 }
 0x4e5   :  { %8994 = vst [vmem:[#allocation378_spill] sm:$0xff] %v7139_v20  ;;  %v7141_v2 = vpop.permute.xlu0 %2280  ;;  %v4147_v20 = vld [vmem:[%s8616_s0 + $0x21a] sm:$0xff]  ;;  %v2896_v16 = vsel %vm2839_vm3, %v2831_v46, %v6003_v21 }
 0x4e6   :  { %8995 = vst [vmem:[#allocation379_spill] sm:$0xff] %v7141_v2  ;;  %v2961_v7 = vsel %vm2904_vm4, %v2896_v16, %v6457_v0 }
 0x4e7   :  { %v3026_v36 = vsel %vm2969_vm5, %v2961_v7, %v6833_v57  ;;  %v4164_v57 = vld [vmem:[%s8616_s0 + $0x2ea] sm:$0xff] }
 0x4ea   :  { %2494 = vrot.lane.b32.xlu2 %v4131_v22, %s4365_s7  ;;  %2558 = vrot.lane.b32.xlu1 %v4163_v55, %s4365_s7  ;;  %v4273_v22 = vld [vmem:[%s8616_s0 + $0x2f0] sm:$0xff] }
 0x4eb   :  { %2526 = vrot.lane.b32.xlu0 %v4147_v20, %s4365_s7  ;;  %v2704_v0 = vsel %vm2644_vm0, %v4273_v22, %v4869_v6  ;;  %v4132_v20 = vld [vmem:[%s8616_s0 + $0x13a] sm:$0xff]  ;;  %v4148_v55 = vld [vmem:[%s8616_s0 + $0x22a] sm:$0xff] }
 0x4ec   :  { %v2309_v2 = vpop.permute.xlu2 %2308  ;;  %v7170_v59 = vpop.permute.xlu1 %2288 }
 0x4ed   :  { %v7173_v21 = vsel %vm3034_vm6, %v3026_v36, %v2309_v2  ;;  %v7175_v15 = vpop.permute.xlu0 %2286  ;;  %v2769_v2 = vsel %vm2709_vm1, %v2704_v0, %v5323_v62 }
 0x4ee   :  { %v2834_v46 = vsel %vm2774_vm2, %v2769_v2, %v5699_v52  ;;  %v4275_v2 = vld [vmem:[%s8616_s0 + $0x290] sm:$0xff] }
 0x4ef   :  { %v2899_v6 = vsel %vm2839_vm3, %v2834_v46, %v6021_v26  ;;  %v3168_v26 = vld [vmem:[%s8617_s1 + $0x20] sm:$0xf]  ;;  %v4149_v46 = vld [vmem:[%s8616_s0 + $0x232] sm:$0xff] }
 0x4f0   :  { %v2964_v16 = vsel %vm2904_vm4, %v2899_v6, %v6475_v60  ;;  %4174 = vmatpush.msk.msra.mxu0 %vm3362_vm7, %v3168_v26  ;;  %4239 = vmatpush.msk.msra.mxu1 %vm3362_vm7, %v3168_v26  ;;  %v3167_v60 = vld [vmem:[%s8617_s1 + $0x18] sm:$0xff]  ;;  %v3166_v6 = vld [vmem:[%s8617_s1 + $0x10] sm:$0xff] }
 0x4f1   :  { %v3029_v62 = vsel %vm2969_vm5, %v2964_v16, %v6851_v49  ;;  %v4274_v49 = vld [vmem:[%s8616_s0 + $0x318] sm:$0xff]  ;;  %4240 = vmatpush.msk.msra.mxu2 %vm3362_vm7, %v3168_v26  ;;  %4241 = vmatpush.msk.msra.mxu3 %vm3362_vm7, %v3168_v26 }
 0x4f2   :  { %2496 = vrot.lane.b32.xlu2 %v4132_v20, %s4365_s7  ;;  %2560 = vrot.lane.b32.xlu1 %v4164_v57, %s4365_s7  ;;  %v2707_v0 = vsel %vm2644_vm0, %v4274_v49, %v4887_v30  ;;  %v4133_v20 = vld [vmem:[%s8616_s0 + $0x142] sm:$0xff]  ;;  %v4165_v57 = vld [vmem:[%s8616_s0 + $0x2f2] sm:$0xff] }
 0x4f3   :  { %2528 = vrot.lane.b32.xlu0 %v4148_v55, %s4365_s7  ;;  %v2696_v55 = vsel %vm2644_vm0, %v4275_v2, %v4891_v43  ;;  %v2772_v30 = vsel %vm2709_vm1, %v2707_v0, %v5341_v35  ;;  %3378 = vmatpush.msra.mxu0 %v3167_v60  ;;  %v4276_v0 = vld [vmem:[%s8616_s0 + $0x2c0] sm:$0xff]  ;;  %v4277_v2 = vld [vmem:[%s8616_s0 + $0x2b8] sm:$0xff] }
 0x4f4   :  { %v2315_v7 = vpop.permute.xlu2 %2314  ;;  %v7204_v36 = vpop.permute.xlu1 %2294  ;;  %4242 = vmatpush.msra.mxu1 %v3167_v60  ;;  %v2761_v16 = vsel %vm2709_vm1, %v2696_v55, %v5267_v10  ;;  %4243 = vmatpush.msra.mxu2 %v3167_v60  ;;  %v2699_v55 = vsel %vm2644_vm0, %v4277_v2, %v4909_v25  ;;  %v4282_v2 = vld [vmem:[%s8616_s0 + $0x300] sm:$0xff] }
 0x4f5   :  { %v7207_v52 = vsel %vm3034_vm6, %v3029_v62, %v2315_v7  ;;  %v7209_v22 = vpop.permute.xlu0 %2292  ;;  %v2837_v62 = vsel %vm2774_vm2, %v2772_v30, %v5717_v17  ;;  %4244 = vmatpush.msra.mxu3 %v3167_v60  ;;  %v2826_v43 = vsel %vm2774_vm2, %v2761_v16, %v5589_v58  ;;  %3379 = vmatpush.msra.mxu0 %v3166_v6  ;;  %v3165_v58 = vld [vmem:[%s8617_s1 + $0x8] sm:$0xff] }
 0x4f6   :  { %v2902_v35 = vsel %vm2839_vm3, %v2837_v62, %v6039_v14  ;;  %v2891_v7 = vsel %vm2839_vm3, %v2826_v43, %v6043_v24  ;;  %4245 = vmatpush.msra.mxu1 %v3166_v6  ;;  %4246 = vmatpush.msra.mxu2 %v3166_v6  ;;  %v4150_v30 = vld [vmem:[%s8616_s0 + $0x242] sm:$0xff] }
 0x4f7   :  { %v2967_v10 = vsel %vm2904_vm4, %v2902_v35, %v6493_v38  ;;  %v2956_v17 = vsel %vm2904_vm4, %v2891_v7, %v6419_v32  ;;  %3380 = vmatpush.msra.mxu0 %v3165_v58  ;;  %v3164_v32 = vld [vmem:[%s8617_s1] sm:$0xff]  ;;  %4247 = vmatpush.msra.mxu3 %v3166_v6  ;;  %v4167_v7 = vld [vmem:[%s8616_s0 + $0x30a] sm:$0xff] }
 0x4f8   :  { %v3032_v14 = vsel %vm2969_vm5, %v2967_v10, %v6869_v5  ;;  %v3021_v24 = vsel %vm2969_vm5, %v2956_v17, %v6741_v54  ;;  %4248 = vmatpush.msra.mxu1 %v3165_v58  ;;  %4249 = vmatpush.msra.mxu2 %v3165_v58  ;;  %v2700_v54 = vsel %vm2644_vm0, %v4276_v0, %v4907_v18  ;;  %v4279_v10 = vld [vmem:[%s8616_s0 + $0x2d8] sm:$0xff] }
 0x4f9   :  { %3381 = vmatpush.msra.mxu0 %v3164_v32  ;;  %4250 = vmatpush.msra.mxu3 %v3165_v58  ;;  %v2765_v18 = vsel %vm2709_vm1, %v2700_v54, %v5229_v39  ;;  %v2702_v58 = vsel %vm2644_vm0, %v4279_v10, %v4927_v51  ;;  %v9005_v10 = vld [vmem:[#allocation343_spill] sm:$0xff] }
 0x4fa   :  { %2498 = vrot.lane.b32.xlu2 %v4133_v20, %s4365_s7  ;;  %2562 = vrot.lane.b32.xlu1 %v4165_v57, %s4365_s7  ;;  %v4118_v20 = vld [vmem:[%s8616_s0 + $0x92] sm:$0xff]  ;;  %v4166_v57 = vld [vmem:[%s8616_s0 + $0x302] sm:$0xff]  ;;  %v2830_v6 = vsel %vm2774_vm2, %v2765_v18, %v5683_v34 }
 0x4fb   :  { %2530 = vrot.lane.b32.xlu0 %v4149_v46, %s4365_s7  ;;  %4251 = vmatpush.msra.mxu1 %v3164_v32  ;;  %v2764_v46 = vsel %vm2709_vm1, %v2699_v55, %v5285_v33  ;;  %v2895_v25 = vsel %vm2839_vm3, %v2830_v6, %v6059_v40  ;;  %v4119_v18 = vld [vmem:[%s8616_s0 + $0x9a] sm:$0xff]  ;;  %v8996_v6 = vld [vmem:[#allocation175_spill] sm:$0xff] }
 0x4fc   :  { %v2321_v26 = vpop.permute.xlu2 %2320  ;;  %v7263_v60 = vpop.permute.xlu1 %2300  ;;  %4252 = vmatpush.msra.mxu2 %v3164_v32  ;;  %4253 = vmatpush.msra.mxu3 %v3164_v32  ;;  %v2829_v16 = vsel %vm2774_vm2, %v2764_v46, %v5607_v23  ;;  %v2960_v33 = vsel %vm2904_vm4, %v2895_v25, %v6381_v11 }
 0x4fd   :  { %v7268_v38 = vsel %vm3034_vm6, %v3032_v14, %v2321_v26  ;;  %v2299_v49 = vpop.permute.xlu0 %2298  ;;  %v2894_v39 = vsel %vm2839_vm3, %v2829_v16, %v6061_v27  ;;  %v3025_v23 = vsel %vm2969_vm5, %v2960_v33, %v6835_v28  ;;  %v2767_v14 = vsel %vm2709_vm1, %v2702_v58, %v5303_v12 }
 0x4fe   :  { %v7274_v5 = vsel %vm3034_vm6, %v3021_v24, %v2299_v49  ;;  %v2959_v34 = vsel %vm2904_vm4, %v2894_v39, %v6437_v56  ;;  %v4278_v56 = vld [vmem:[%s8616_s0 + $0x2e8] sm:$0xff]  ;;  %v2832_v24 = vsel %vm2774_vm2, %v2767_v14, %v5625_v13 }
 0x4ff   :  { %v3024_v43 = vsel %vm2969_vm5, %v2959_v34, %v6759_v37  ;;  %v2703_v28 = vsel %vm2644_vm0, %v4278_v56, %v4925_v1  ;;  %v4151_v37 = vld [vmem:[%s8616_s0 + $0x24a] sm:$0xff]  ;;  %v4134_v1 = vld [vmem:[%s8616_s0 + $0x152] sm:$0xff]  ;;  %v2897_v51 = vsel %vm2839_vm3, %v2832_v24, %v6079_v3 }
 0x500   :  { %v2768_v17 = vsel %vm2709_vm1, %v2703_v28, %v5247_v47  ;;  %v9003_v56 = vld [vmem:[#allocation278_spill] sm:$0xff] }
 0x501   :  { %v2833_v26 = vsel %vm2774_vm2, %v2768_v17, %v5701_v63  ;;  %v2962_v63 = vsel %vm2904_vm4, %v2897_v51, %v6455_v19  ;;  %v9006_v14 = vld [vmem:[#allocation326_spill] sm:$0xff] }
 0x502   :  { %2468 = vrot.lane.b32.xlu2 %v4118_v20, %s4365_s7  ;;  %2564 = vrot.lane.b32.xlu1 %v4166_v57, %s4365_s7  ;;  %v2898_v49 = vsel %vm2839_vm3, %v2833_v26, %v6077_v41  ;;  %v3027_v32 = vsel %vm2969_vm5, %v2962_v63, %v6777_v50  ;;  %v4281_v50 = vld [vmem:[%s8616_s0 + $0x308] sm:$0xff]  ;;  %v4152_v57 = vld [vmem:[%s8616_s0 + $0x25a] sm:$0xff] }
 0x503   :  { %2532 = vrot.lane.b32.xlu0 %v4150_v30, %s4365_s7  ;;  %v2963_v47 = vsel %vm2904_vm4, %v2898_v49, %v6399_v48  ;;  %v4280_v48 = vld [vmem:[%s8616_s0 + $0x50] sm:$0xff]  ;;  %v2706_v20 = vsel %vm2644_vm0, %v4281_v50, %v4943_v45 }
 0x504   :  { %v7316_v62 = vpop.permute.xlu2 %2454  ;;  %v2307_v40 = vpop.permute.xlu1 %2306  ;;  %v3028_v12 = vsel %vm2969_vm5, %v2963_v47, %v6853_v9  ;;  %v2652_v19 = vsel %vm2644_vm0, %v4280_v48, %v4619_v61  ;;  %v4135_v61 = vld [vmem:[%s8616_s0 + $0x15a] sm:$0xff]  ;;  %v2771_v55 = vsel %vm2709_vm1, %v2706_v20, %v5265_v31  ;;  %v9007_v47 = vld [vmem:[#allocation10_spill] sm:$0xff] }
 0x505   :  { %v7321_v35 = vsel %vm3034_vm6, %v3025_v23, %v2307_v40  ;;  %v2305_v27 = vpop.permute.xlu0 %2304  ;;  %v2717_v9 = vsel %vm2709_vm1, %v2652_v19, %v4941_v29  ;;  %v2705_v29 = vsel %vm2644_vm0, %v4282_v2, %v4945_v53  ;;  %v2836_v46 = vsel %vm2774_vm2, %v2771_v55, %v5719_v44  ;;  %v8997_v53 = vld [vmem:[#allocation159_spill] sm:$0xff]  ;;  %v8998_v31 = vld [vmem:[#allocation220_spill] sm:$0xff]  ;;  %v9000_v44 = vld [vmem:[#allocation222_spill] sm:$0xff] }
 0x506   :  { %v7324_v11 = vsel %vm3034_vm6, %v3024_v43, %v2305_v27  ;;  %v2782_v45 = vsel %vm2774_vm2, %v2717_v9, %v5395_v4  ;;  %v2770_v30 = vsel %vm2709_vm1, %v2705_v29, %v5321_v8  ;;  %v8999_v4 = vld [vmem:[#allocation221_spill] sm:$0xff]  ;;  %v9001_v23 = vld [vmem:[#allocation272_spill] sm:$0xff]  ;;  %v4136_v20 = vld [vmem:[%s8616_s0 + $0x16a] sm:$0xff] }
 0x507   :  { %v2847_v16 = vsel %vm2839_vm3, %v2782_v45, %v8996_v6  ;;  %v2835_v25 = vsel %vm2774_vm2, %v2770_v30, %v8997_v53  ;;  %v2901_v33 = vsel %vm2839_vm3, %v2836_v46, %v8999_v4  ;;  %v18_v8 = vld [vmem:[%s8616_s0] sm:$0xff]  ;;  %v9009_v48 = vld [vmem:[#allocation60_spill] sm:$0xff]  ;;  %v9014_v6 = vld [vmem:[#allocation114_spill] sm:$0xff] }
 0x508   :  { %v2912_v39 = vsel %vm2904_vm4, %v2847_v16, %v8998_v31  ;;  %v2900_v34 = vsel %vm2839_vm3, %v2835_v25, %v9000_v44  ;;  %v2966_v40 = vsel %vm2904_vm4, %v2901_v33, %v9001_v23  ;;  %v9002_v43 = vld [vmem:[#allocation289_spill] sm:$0xff]  ;;  %v2645_v63 = vsel %vm2644_vm0, %v18_v8, %v9007_v47  ;;  %v9015_v53 = vld [vmem:[#allocation170_spill] sm:$0xff]  ;;  %v9016_v31 = vld [vmem:[#allocation184_spill] sm:$0xff] }
 0x509   :  { %v2977_v27 = vsel %vm2969_vm5, %v2912_v39, %v9002_v43  ;;  %v2965_v28 = vsel %vm2904_vm4, %v2900_v34, %v9003_v56  ;;  %v2710_v19 = vsel %vm2709_vm1, %v2645_v63, %v9009_v48  ;;  %v9010_v9 = vld [vmem:[#allocation65_spill] sm:$0xff]  ;;  %v9017_v4 = vld [vmem:[#allocation162_spill] sm:$0xff]  ;;  %v9018_v8 = vld [vmem:[#allocation224_spill] sm:$0xff] }
 0x50a   :  { %2566 = vrot.lane.b32.xlu2 %v4167_v7, %s4365_s7  ;;  %2534 = vrot.lane.b32.xlu1 %v4151_v37, %s4365_s7  ;;  %v9004_v7 = vld [vmem:[#allocation335_spill] sm:$0xff]  ;;  %v3042_v58 = vsel %vm3034_vm6, %v2977_v27, %v9005_v10  ;;  %v3030_v26 = vsel %vm2969_vm5, %v2965_v28, %v9006_v14  ;;  %v9011_v2 = vld [vmem:[#allocation61_spill] sm:$0xff]  ;;  %v9021_v56 = vld [vmem:[#allocation274_spill] sm:$0xff] }
 0x50b   :  { %2500 = vrot.lane.b32.xlu0 %v4134_v1, %s4365_s7  ;;  %v3031_v37 = vsel %vm2969_vm5, %v2966_v40, %v9004_v7  ;;  %v9012_v55 = vld [vmem:[#allocation109_spill] sm:$0xff]  ;;  %v19_v40 = vld [vmem:[%s8616_s0 + $0x8] sm:$0xff]  ;;  %v9023_v10 = vld [vmem:[#allocation280_spill] sm:$0xff] }
 0x50c   :  { %v7366_v13 = vpop.permute.xlu2 %2460  ;;  %v2313_v41 = vpop.permute.xlu1 %2312  ;;  %v2775_v45 = vsel %vm2774_vm2, %v2710_v19, %v9012_v55  ;;  %v4168_v46 = vld [vmem:[%s8616_s0 + $0x31a] sm:$0xff]  ;;  %v9022_v7 = vld [vmem:[#allocation298_spill] sm:$0xff]  ;;  %v9030_v55 = vld [vmem:[#allocation79_spill] sm:$0xff] }
 0x50d   :  { %v7371_v0 = vsel %vm3034_vm6, %v3028_v12, %v2313_v41  ;;  %v2311_v3 = vpop.permute.xlu0 %2310  ;;  %v4283_v12 = vld [vmem:[%s8616_s0 + $0xc0] sm:$0xff]  ;;  %v9008_v41 = vld [vmem:[#allocation23_spill] sm:$0xff]  ;;  %v2840_v25 = vsel %vm2839_vm3, %v2775_v45, %v9015_v53  ;;  %v9025_v14 = vld [vmem:[#allocation352_spill] sm:$0xff] }
 0x50e   :  { %v7379_v54 = vsel %vm3034_vm6, %v3027_v32, %v2311_v3  ;;  %v2661_v32 = vsel %vm2644_vm0, %v4283_v12, %v9008_v41  ;;  %v2905_v44 = vsel %vm2904_vm4, %v2840_v25, %v9018_v8  ;;  %v9019_v34 = vld [vmem:[#allocation229_spill] sm:$0xff]  ;;  %v9035_v8 = vld [vmem:[#allocation218_spill] sm:$0xff] }
 0x50f   :  { %v2726_v50 = vsel %vm2709_vm1, %v2661_v32, %v9010_v9  ;;  %v9020_v43 = vld [vmem:[#allocation225_spill] sm:$0xff]  ;;  %v2970_v28 = vsel %vm2969_vm5, %v2905_v44, %v9021_v56 }
 0x510   :  { %v9026_v63 = vld [vmem:[#allocation329_spill] sm:$0xff] }
 0x511   :  { %v9027_v19 = vld [vmem:[#allocation13_spill] sm:$0xff] }
 0x512   :  { %2536 = vrot.lane.b32.xlu2 %v4152_v57, %s4365_s7  ;;  %2502 = vrot.lane.b32.xlu1 %v4135_v61, %s4365_s7  ;;  %v4120_v57 = vld [vmem:[%s8616_s0 + $0xaa] sm:$0xff]  ;;  %v4284_v61 = vld [vmem:[%s8616_s0 + $0x320] sm:$0xff]  ;;  %v2646_v9 = vsel %vm2644_vm0, %v19_v40, %v9027_v19 }
 0x513   :  { %2470 = vrot.lane.b32.xlu0 %v4119_v18, %s4365_s7  ;;  %v2708_v29 = vsel %vm2644_vm0, %v4284_v61, %v9011_v2  ;;  %v9013_v18 = vld [vmem:[#allocation131_spill] sm:$0xff]  ;;  %v9029_v2 = vld [vmem:[#allocation57_spill] sm:$0xff]  ;;  %v9044_v19 = vld [vmem:[#allocation78_spill] sm:$0xff] }
 0x514   :  { %v2467_v17 = vpop.permute.xlu2 %2466  ;;  %v2319_v1 = vpop.permute.xlu1 %2318  ;;  %v2791_v30 = vsel %vm2774_vm2, %v2726_v50, %v9013_v18  ;;  %v2773_v16 = vsel %vm2709_vm1, %v2708_v29, %v9014_v6  ;;  %v4285_v50 = vld [vmem:[%s8616_s0 + $0xc8] sm:$0xff]  ;;  %v2711_v29 = vsel %vm2709_vm1, %v2646_v9, %v9029_v2  ;;  %v4121_v18 = vld [vmem:[%s8616_s0 + $0xb2] sm:$0xff] }
 0x515   :  { %v7439_v24 = vsel %vm3034_vm6, %v3031_v37, %v2319_v1  ;;  %v2317_v49 = vpop.permute.xlu0 %2316  ;;  %v7442_v51 = vsel %vm3099_vm8, %v3042_v58, %v2467_v17  ;;  %v2856_v39 = vsel %vm2839_vm3, %v2791_v30, %v9016_v31  ;;  %v2838_v33 = vsel %vm2774_vm2, %v2773_v16, %v9017_v4  ;;  %v9024_v17 = vld [vmem:[#allocation338_spill] sm:$0xff]  ;;  %v9033_v31 = vld [vmem:[#allocation169_spill] sm:$0xff]  ;;  %v9037_v40 = vld [vmem:[#allocation283_spill] sm:$0xff] }
 0x516   :  { %v7452_v3 = vsel %vm3034_vm6, %v3030_v26, %v2317_v49  ;;  %v2921_v23 = vsel %vm2904_vm4, %v2856_v39, %v9019_v34  ;;  %v2903_v27 = vsel %vm2839_vm3, %v2838_v33, %v9020_v43  ;;  %v3035_v1 = vsel %vm3034_vm6, %v2970_v28, %v9024_v17  ;;  %v4169_v30 = vld [vmem:[%s8616_s0 + $0x322] sm:$0xff]  ;;  %v9036_v34 = vld [vmem:[#allocation243_spill] sm:$0xff] }
 0x517   :  { %v2986_v37 = vsel %vm2969_vm5, %v2921_v23, %v9022_v7  ;;  %v2968_v58 = vsel %vm2904_vm4, %v2903_v27, %v9023_v10  ;;  %v9032_v16 = vld [vmem:[#allocation130_spill] sm:$0xff]  ;;  %v9038_v27 = vld [vmem:[#allocation297_spill] sm:$0xff] }
 0x518   :  { %v3051_v26 = vsel %vm3034_vm6, %v2986_v37, %v9025_v14  ;;  %v3033_v12 = vsel %vm2969_vm5, %v2968_v58, %v9026_v63  ;;  %v4153_v25 = vld [vmem:[%s8616_s0 + $0x262] sm:$0xff] }
 0x519   :  { %v9034_v4 = vld [vmem:[#allocation174_spill] sm:$0xff]  ;;  %v9039_v28 = vld [vmem:[#allocation337_spill] sm:$0xff] }
 0x51a   :  { %2504 = vrot.lane.b32.xlu2 %v4136_v20, %s4365_s7  ;;  %2472 = vrot.lane.b32.xlu1 %v4120_v57, %s4365_s7  ;;  %v9028_v20 = vld [vmem:[#allocation14_spill] sm:$0xff] }
 0x51b   :  { %2568 = vrot.lane.b32.xlu0 %v4168_v46, %s4365_s7  ;;  %v2662_v57 = vsel %vm2644_vm0, %v4285_v50, %v9028_v20  ;;  %v9031_v46 = vld [vmem:[#allocation117_spill] sm:$0xff]  ;;  %v9040_v37 = vld [vmem:[#allocation342_spill] sm:$0xff]  ;;  %v4170_v50 = vld [vmem:[%s8616_s0 + $0x332] sm:$0xff] }
 0x51c   :  { %v2485_v49 = vpop.permute.xlu2 %2484  ;;  %v2453_v47 = vpop.permute.xlu1 %2452  ;;  %v2727_v45 = vsel %vm2709_vm1, %v2662_v57, %v9030_v55  ;;  %v2776_v6 = vsel %vm2774_vm2, %v2711_v29, %v9031_v46  ;;  %v4154_v20 = vld [vmem:[%s8616_s0 + $0x272] sm:$0xff]  ;;  %v9046_v29 = vld [vmem:[#allocation121_spill] sm:$0xff] }
 0x51d   :  { %v2323_v41 = vpop.permute.xlu0 %2322  ;;  %v3100_v32 = vsel %vm3099_vm8, %v3035_v1, %v2453_v47  ;;  %v3116_v48 = vsel %vm3099_vm8, %v3051_v26, %v2485_v49  ;;  %v2792_v53 = vsel %vm2774_vm2, %v2727_v45, %v9032_v16  ;;  %v2841_v39 = vsel %vm2839_vm3, %v2776_v6, %v9033_v31  ;;  %v4286_v49 = vld [vmem:[%s8616_s0 + $0x18] sm:$0xff]  ;;  %v9041_v47 = vld [vmem:[#allocation9_spill] sm:$0xff]  ;;  %v4288_v16 = vld [vmem:[%s8616_s0 + $0x30] sm:$0xff] }
 0x51e   :  { %v7518_v61 = vsel %vm3034_vm6, %v3033_v12, %v2323_v41  ;;  %4175 = vmatmul.msk.f32.vlgmr.msra.gmra.mxu0 %vm3169_vm9, %v3100_v32  ;;  %4191 = vmatmul.msk.f32.vlgmr.msra.gmra.mxu1 %vm3169_vm9, %v3116_v48  ;;  %v2857_v33 = vsel %vm2839_vm3, %v2792_v53, %v9034_v4  ;;  %v2906_v44 = vsel %vm2904_vm4, %v2841_v39, %v9035_v8  ;;  %v4287_v12 = vld [vmem:[%s8616_s0 + $0xd8] sm:$0xff]  ;;  %v9042_v41 = vld [vmem:[#allocation27_spill] sm:$0xff]  ;;  %v9049_v53 = vld [vmem:[#allocation5_spill] sm:$0xff] }
 0x51f   :  { %v2922_v23 = vsel %vm2904_vm4, %v2857_v33, %v9036_v34  ;;  %v2971_v43 = vsel %vm2969_vm5, %v2906_v44, %v9037_v40  ;;  %v2647_v63 = vsel %vm2644_vm0, %v4286_v49, %v9041_v47  ;;  %v2663_v32 = vsel %vm2644_vm0, %v4287_v12, %v9042_v41  ;;  %v9045_v57 = vld [vmem:[#allocation116_spill] sm:$0xff]  ;;  %v50_v31 = vld [vmem:[%s8616_s0 + $0x1b0] sm:$0xff]  ;;  %v9051_v33 = vld [vmem:[#allocation242_spill] sm:$0xff] }
 0x520   :  { %v2987_v56 = vsel %vm2969_vm5, %v2922_v23, %v9038_v27  ;;  %v3036_v7 = vsel %vm3034_vm6, %v2971_v43, %v9039_v28  ;;  %v2728_v9 = vsel %vm2709_vm1, %v2663_v32, %v9044_v19  ;;  %v4137_v45 = vld [vmem:[%s8616_s0 + $0x172] sm:$0xff]  ;;  %v9052_v34 = vld [vmem:[#allocation6_spill] sm:$0xff]  ;;  %v4290_v40 = vld [vmem:[%s8616_s0 + $0x20] sm:$0xff] }
 0x521   :  { %v3052_v10 = vsel %vm3034_vm6, %v2987_v56, %v9040_v37  ;;  %v3101_v14 = vsel %vm3099_vm8, %v3036_v7, %v7316_v62  ;;  %v9043_v62 = vld [vmem:[#allocation64_spill] sm:$0xff]  ;;  %v2793_v55 = vsel %vm2774_vm2, %v2728_v9, %v9046_v29  ;;  %v9054_v28 = vld [vmem:[#allocation282_spill] sm:$0xff]  ;;  %v9055_v37 = vld [vmem:[#allocation287_spill] sm:$0xff] }
 0x522   :  { %2474 = vrot.lane.b32.xlu2 %v4121_v18, %s4365_s7  ;;  %2570 = vrot.lane.b32.xlu1 %v4169_v30, %s4365_s7  ;;  %v2712_v48 = vsel %vm2709_vm1, %v2647_v63, %v9043_v62  ;;  %v9047_v18 = vld [vmem:[#allocation165_spill] sm:$0xff]  ;;  %v9048_v46 = vld [vmem:[#allocation188_spill] sm:$0xff]  ;;  %v9057_v47 = vld [vmem:[#allocation26_spill] sm:$0xff] }
 0x523   :  { %2538 = vrot.lane.b32.xlu0 %v4153_v25, %s4365_s7  ;;  %v2777_v2 = vsel %vm2774_vm2, %v2712_v48, %v9045_v57  ;;  %v2858_v6 = vsel %vm2839_vm3, %v2793_v55, %v9048_v46  ;;  %v7601_v25 = vsel %vm2644_vm0, %v4288_v16, %v9049_v53  ;;  %v9050_v39 = vld [vmem:[#allocation228_spill] sm:$0xff]  ;;  %v4292_v49 = vld [vmem:[%s8616_s0 + $0xe0] sm:$0xff]  ;;  %v9061_v57 = vld [vmem:[#allocation30_spill] sm:$0xff] }
 0x524   :  { %v2487_v58 = vpop.permute.xlu2 %2486  ;;  %v7558_v17 = vpop.permute.xlu1 %2458  ;;  %v2842_v30 = vsel %vm2839_vm3, %v2777_v2, %v9047_v18  ;;  %v2923_v8 = vsel %vm2904_vm4, %v2858_v6, %v9051_v33  ;;  %v4289_v44 = vld [vmem:[%s8616_s0 + $0x38] sm:$0xff]  ;;  %v2664_v63 = vsel %vm2644_vm0, %v4292_v49, %v9057_v47  ;;  %v4294_v18 = vld [vmem:[%s8616_s0 + $0x1c8] sm:$0xff]  ;;  %v4295_v53 = vld [vmem:[%s8616_s0 + $0x270] sm:$0xff] }
 0x525   :  { %v2457_v1 = vpop.permute.xlu0 %2456  ;;  %v3117_v26 = vsel %vm3099_vm8, %v3052_v10, %v2487_v58  ;;  %v2907_v4 = vsel %vm2904_vm4, %v2842_v30, %v9050_v39  ;;  %v7617_v23 = vsel %vm2644_vm0, %v4289_v44, %v9052_v34  ;;  %v9053_v43 = vld [vmem:[#allocation12_spill] sm:$0xff]  ;;  %v2988_v10 = vsel %vm2969_vm5, %v2923_v8, %v9055_v37  ;;  %v4291_v58 = vld [vmem:[%s8616_s0 + $0xf0] sm:$0xff]  ;;  %v9062_v30 = vld [vmem:[#allocation41_spill] sm:$0xff] }
 0x526   :  { %4176 = vmatmul.msk.f32.gmra.mxu0 %vm3169_vm9, %v3101_v14  ;;  %4192 = vmatmul.msk.f32.gmra.mxu1 %vm3169_vm9, %v3117_v26  ;;  %v2648_v27 = vsel %vm2644_vm0, %v4290_v40, %v9053_v43  ;;  %v51_v56 = vld [vmem:[%s8616_s0 + $0x1b8] sm:$0xff]  ;;  %v2972_v7 = vsel %vm2969_vm5, %v2907_v4, %v9054_v28  ;;  %v7668_v46 = vsel %vm2644_vm0, %v4294_v18, %v9062_v30  ;;  %v9063_v6 = vld [vmem:[#allocation42_spill] sm:$0xff]  ;;  %v9065_v39 = vld [vmem:[#allocation63_spill] sm:$0xff] }
 0x527   :  { %v9056_v14 = vld [vmem:[#allocation16_spill] sm:$0xff]  ;;  %v2678_v16 = vsel %vm2644_vm0, %v51_v56, %v9063_v6  ;;  %v2713_v4 = vsel %vm2709_vm1, %v2648_v27, %v9065_v39  ;;  %v9067_v44 = vld [vmem:[#allocation94_spill] sm:$0xff] }
 0x528   :  { %v7637_v26 = vsel %vm2644_vm0, %v4291_v58, %v9056_v14  ;;  %v9058_v12 = vld [vmem:[#allocation332_spill] sm:$0xff]  ;;  %v9068_v40 = vld [vmem:[#allocation106_spill] sm:$0xff]  ;;  %v9071_v58 = vld [vmem:[#allocation145_spill] sm:$0xff] }
 0x529   :  { %v3037_v41 = vsel %vm3034_vm6, %v2972_v7, %v9058_v12  ;;  %v9059_v32 = vld [vmem:[#allocation356_spill] sm:$0xff]  ;;  %v4138_v28 = vld [vmem:[%s8616_s0 + $0x182] sm:$0xff]  ;;  %v9069_v7 = vld [vmem:[#allocation111_spill] sm:$0xff] }
 0x52a   :  { %2572 = vrot.lane.b32.xlu2 %v4170_v50, %s4365_s7  ;;  %2540 = vrot.lane.b32.xlu1 %v4154_v20, %s4365_s7  ;;  %v3053_v62 = vsel %vm3034_vm6, %v2988_v10, %v9059_v32  ;;  %v9060_v9 = vld [vmem:[#allocation28_spill] sm:$0xff]  ;;  %v3102_v55 = vsel %vm3099_vm8, %v3037_v41, %v2457_v1  ;;  %v2778_v27 = vsel %vm2774_vm2, %v2713_v4, %v9069_v7  ;;  %v9070_v37 = vld [vmem:[#allocation134_spill] sm:$0xff]  ;;  %v9073_v12 = vld [vmem:[#allocation173_spill] sm:$0xff] }
 0x52b   :  { %2506 = vrot.lane.b32.xlu0 %v4137_v45, %s4365_s7  ;;  %v2677_v50 = vsel %vm2644_vm0, %v50_v31, %v9060_v9  ;;  %v4293_v20 = vld [vmem:[%s8616_s0 + $0xf8] sm:$0xff]  ;;  %v9064_v31 = vld [vmem:[#allocation55_spill] sm:$0xff]  ;;  %v9072_v49 = vld [vmem:[#allocation150_spill] sm:$0xff]  ;;  %v2843_v41 = vsel %vm2839_vm3, %v2778_v27, %v9073_v12 }
 0x52c   :  { %v2489_v48 = vpop.permute.xlu2 %2488  ;;  %v7648_v19 = vpop.permute.xlu1 %2464  ;;  %v7657_v2 = vsel %vm2644_vm0, %v4293_v20, %v9061_v57  ;;  %v2693_v1 = vsel %vm2644_vm0, %v4295_v53, %v9064_v31  ;;  %v9066_v33 = vld [vmem:[#allocation68_spill] sm:$0xff]  ;;  %v2742_v34 = vsel %vm2709_vm1, %v2677_v50, %v9067_v44  ;;  %v9074_v32 = vld [vmem:[#allocation187_spill] sm:$0xff]  ;;  %v9079_v30 = vld [vmem:[#allocation270_spill] sm:$0xff] }
 0x52d   :  { %v7659_v29 = vpop.permute.xlu0 %2462  ;;  %v3118_v45 = vsel %vm3099_vm8, %v3053_v62, %v2489_v48  ;;  %v2729_v8 = vsel %vm2709_vm1, %v2664_v63, %v9066_v33  ;;  %v2758_v43 = vsel %vm2709_vm1, %v2693_v1, %v9068_v40  ;;  %v4155_v56 = vld [vmem:[%s8616_s0 + $0x27a] sm:$0xff]  ;;  %v2807_v14 = vsel %vm2774_vm2, %v2742_v34, %v9071_v58  ;;  %v4122_v63 = vld [vmem:[%s8616_s0 + $0xc2] sm:$0xff]  ;;  %v9077_v57 = vld [vmem:[#allocation227_spill] sm:$0xff] }
 0x52e   :  { %4177 = vmatmul.msk.f32.gmra.mxu0 %vm3169_vm9, %v3102_v55  ;;  %4193 = vmatmul.msk.f32.gmra.mxu1 %vm3169_vm9, %v3118_v45  ;;  %v2794_v10 = vsel %vm2774_vm2, %v2729_v8, %v9070_v37  ;;  %v2823_v47 = vsel %vm2774_vm2, %v2758_v43, %v9072_v49  ;;  %v9075_v48 = vld [vmem:[#allocation189_spill] sm:$0xff]  ;;  %v9076_v50 = vld [vmem:[#allocation216_spill] sm:$0xff]  ;;  %v2908_v55 = vsel %vm2904_vm4, %v2843_v41, %v9077_v57  ;;  %v9080_v53 = vld [vmem:[#allocation258_spill] sm:$0xff] }
 0x52f   :  { %v2859_v62 = vsel %vm2839_vm3, %v2794_v10, %v9074_v32  ;;  %v2872_v9 = vsel %vm2839_vm3, %v2807_v14, %v9075_v48  ;;  %v2888_v20 = vsel %vm2839_vm3, %v2823_v47, %v9076_v50  ;;  %v9078_v45 = vld [vmem:[#allocation232_spill] sm:$0xff]  ;;  %v9082_v4 = vld [vmem:[#allocation301_spill] sm:$0xff]  ;;  %v9088_v32 = vld [vmem:[#allocation54_spill] sm:$0xff] }
 0x530   :  { %v2924_v18 = vsel %vm2904_vm4, %v2859_v62, %v9078_v45  ;;  %v2953_v6 = vsel %vm2904_vm4, %v2888_v20, %v9079_v30  ;;  %v2937_v31 = vsel %vm2904_vm4, %v2872_v9, %v9080_v53  ;;  %v9081_v1 = vld [vmem:[#allocation276_spill] sm:$0xff]  ;;  %v9083_v8 = vld [vmem:[#allocation317_spill] sm:$0xff]  ;;  %v9089_v62 = vld [vmem:[#allocation58_spill] sm:$0xff] }
 0x531   :  { %v2973_v39 = vsel %vm2969_vm5, %v2908_v55, %v9081_v1  ;;  %v2989_v33 = vsel %vm2969_vm5, %v2924_v18, %v9082_v4  ;;  %v3018_v44 = vsel %vm2969_vm5, %v2953_v6, %v9083_v8  ;;  %v9084_v34 = vld [vmem:[#allocation312_spill] sm:$0xff]  ;;  %v9085_v43 = vld [vmem:[#allocation341_spill] sm:$0xff]  ;;  %v2714_v48 = vsel %vm2709_vm1, %v7601_v25, %v9089_v62  ;;  %v9090_v9 = vld [vmem:[#allocation82_spill] sm:$0xff] }
 0x532   :  { %2542 = vrot.lane.b32.xlu2 %v4155_v56, %s4365_s7  ;;  %2508 = vrot.lane.b32.xlu1 %v4138_v28, %s4365_s7  ;;  %v3002_v40 = vsel %vm2969_vm5, %v2937_v31, %v9084_v34  ;;  %v3038_v56 = vsel %vm3034_vm6, %v2973_v39, %v9085_v43  ;;  %v9086_v28 = vld [vmem:[#allocation355_spill] sm:$0xff]  ;;  %v3083_v27 = vsel %vm3034_vm6, %v3018_v44, %v7209_v22  ;;  %v9087_v58 = vld [vmem:[#allocation357_spill] sm:$0xff]  ;;  %v4296_v41 = vld [vmem:[%s8616_s0 + $0x278] sm:$0xff] }
 0x533   :  { %2476 = vrot.lane.b32.xlu0 %v4122_v63, %s4365_s7  ;;  %v3054_v7 = vsel %vm3034_vm6, %v2989_v33, %v9086_v28  ;;  %v3067_v14 = vsel %vm3034_vm6, %v3002_v40, %v9087_v58  ;;  %v3103_v47 = vsel %vm3099_vm8, %v3038_v56, %v7558_v17  ;;  %v2694_v22 = vsel %vm2644_vm0, %v4296_v41, %v9088_v32  ;;  %v9091_v20 = vld [vmem:[#allocation93_spill] sm:$0xff]  ;;  %v9092_v55 = vld [vmem:[#allocation98_spill] sm:$0xff]  ;;  %v9093_v30 = vld [vmem:[#allocation120_spill] sm:$0xff] }
 0x534   :  { %v2491_v37 = vpop.permute.xlu2 %2490  ;;  %v2549_v10 = vpop.permute.xlu1 %2548  ;;  %v2730_v50 = vsel %vm2709_vm1, %v7637_v26, %v9090_v9  ;;  %v2743_v57 = vsel %vm2709_vm1, %v2678_v16, %v9091_v20  ;;  %v2759_v45 = vsel %vm2709_vm1, %v2694_v22, %v9092_v55  ;;  %v4139_v25 = vld [vmem:[%s8616_s0 + $0x18a] sm:$0xff]  ;;  %v2779_v26 = vsel %vm2774_vm2, %v2714_v48, %v9093_v30  ;;  %v9094_v6 = vld [vmem:[#allocation133_spill] sm:$0xff]  ;;  %v9097_v33 = vld [vmem:[#allocation172_spill] sm:$0xff] }
 0x535   :  { %v2517_v49 = vpop.permute.xlu0 %2516  ;;  %v3119_v63 = vsel %vm3099_vm8, %v3054_v7, %v2491_v37  ;;  %v3148_v12 = vsel %vm3099_vm8, %v3083_v27, %v2549_v10  ;;  %v4123_v18 = vld [vmem:[%s8616_s0 + $0xca] sm:$0xff]  ;;  %v2795_v16 = vsel %vm2774_vm2, %v2730_v50, %v9094_v6  ;;  %v9096_v1 = vld [vmem:[#allocation161_spill] sm:$0xff]  ;;  %v2844_v8 = vsel %vm2839_vm3, %v2779_v26, %v9097_v33  ;;  %v9106_v41 = vld [vmem:[#allocation300_spill] sm:$0xff] }
 0x536   :  { %4178 = vmatmul.msk.f32.gmra.mxu0 %vm3169_vm9, %v3103_v47  ;;  %4194 = vmatmul.msk.f32.gmra.mxu1 %vm3169_vm9, %v3119_v63  ;;  %v3132_v17 = vsel %vm3099_vm8, %v3067_v14, %v2517_v49  ;;  %v9095_v53 = vld [vmem:[#allocation135_spill] sm:$0xff]  ;;  %v2824_v39 = vsel %vm2774_vm2, %v2759_v45, %v9096_v1  ;;  %v4171_v4 = vld [vmem:[%s8616_s0 + $0x33a] sm:$0xff]  ;;  %v9102_v37 = vld [vmem:[#allocation246_spill] sm:$0xff] }
 0x537   :  { %4207 = vmatmul.msk.f32.vlgmr.msra.gmra.mxu2 %vm3169_vm9, %v3132_v17  ;;  %4223 = vmatmul.msk.f32.vlgmr.msra.gmra.mxu3 %vm3169_vm9, %v3148_v12  ;;  %v2808_v31 = vsel %vm2774_vm2, %v2743_v57, %v9095_v53  ;;  %v9098_v44 = vld [vmem:[#allocation177_spill] sm:$0xff]  ;;  %v9099_v40 = vld [vmem:[#allocation203_spill] sm:$0xff]  ;;  %v9103_v58 = vld [vmem:[#allocation262_spill] sm:$0xff] }
 0x538   :  { %v2860_v34 = vsel %vm2839_vm3, %v2795_v16, %v9098_v44  ;;  %v2873_v43 = vsel %vm2839_vm3, %v2808_v31, %v9099_v40  ;;  %v9100_v56 = vld [vmem:[#allocation215_spill] sm:$0xff]  ;;  %v9104_v49 = vld [vmem:[#allocation257_spill] sm:$0xff]  ;;  %v9105_v63 = vld [vmem:[#allocation286_spill] sm:$0xff] }
 0x539   :  { %v2889_v28 = vsel %vm2839_vm3, %v2824_v39, %v9100_v56  ;;  %v9101_v7 = vld [vmem:[#allocation219_spill] sm:$0xff]  ;;  %v2925_v10 = vsel %vm2904_vm4, %v2860_v34, %v9102_v37  ;;  %v2938_v47 = vsel %vm2904_vm4, %v2873_v43, %v9104_v49  ;;  %v9107_v22 = vld [vmem:[#allocation328_spill] sm:$0xff]  ;;  %v9108_v48 = vld [vmem:[#allocation302_spill] sm:$0xff] }
 0x53a   :  { %v2909_v27 = vsel %vm2904_vm4, %v2844_v8, %v9101_v7  ;;  %v2954_v14 = vsel %vm2904_vm4, %v2889_v28, %v9103_v58  ;;  %2510 = vrot.lane.b32.xlu2 %v4139_v25, %s4365_s7  ;;  %2478 = vrot.lane.b32.xlu1 %v4123_v18, %s4365_s7  ;;  %v2990_v32 = vsel %vm2969_vm5, %v2925_v10, %v9106_v41  ;;  %v9109_v9 = vld [vmem:[#allocation340_spill] sm:$0xff]  ;;  %v9110_v20 = vld [vmem:[#allocation345_spill] sm:$0xff]  ;;  %v9111_v18 = vld [vmem:[#allocation371_spill] sm:$0xff] }
 0x53b   :  { %v2974_v12 = vsel %vm2969_vm5, %v2909_v27, %v9105_v63  ;;  %v3019_v62 = vsel %vm2969_vm5, %v2954_v14, %v9107_v22  ;;  %2574 = vrot.lane.b32.xlu0 %v4171_v4, %s4365_s7  ;;  %v3003_v17 = vsel %vm2969_vm5, %v2938_v47, %v9108_v48  ;;  %v3055_v57 = vsel %vm3034_vm6, %v2990_v32, %v9110_v20  ;;  %v4297_v31 = vld [vmem:[%s8616_s0 + $0x288] sm:$0xff]  ;;  %v9113_v39 = vld [vmem:[#allocation67_spill] sm:$0xff]  ;;  %v9114_v33 = vld [vmem:[#allocation81_spill] sm:$0xff] }
 0x53c   :  { %v3039_v50 = vsel %vm3034_vm6, %v2974_v12, %v9109_v9  ;;  %v3084_v55 = vsel %vm3034_vm6, %v3019_v62, %v7204_v36  ;;  %v2493_v45 = vpop.permute.xlu2 %2492  ;;  %v2551_v25 = vpop.permute.xlu1 %2550  ;;  %v3068_v30 = vsel %vm3034_vm6, %v3003_v17, %v9111_v18  ;;  %v9112_v1 = vld [vmem:[#allocation46_spill] sm:$0xff]  ;;  %v2715_v4 = vsel %vm2709_vm1, %v7617_v23, %v9113_v39  ;;  %v9115_v44 = vld [vmem:[#allocation83_spill] sm:$0xff]  ;;  %v9116_v40 = vld [vmem:[#allocation108_spill] sm:$0xff] }
 0x53d   :  { %v2519_v26 = vpop.permute.xlu0 %2518  ;;  %v3104_v6 = vsel %vm3099_vm8, %v3039_v50, %v7366_v13  ;;  %v3120_v16 = vsel %vm3099_vm8, %v3055_v57, %v2493_v45  ;;  %v3149_v53 = vsel %vm3099_vm8, %v3084_v55, %v2551_v25  ;;  %v2695_v36 = vsel %vm2644_vm0, %v4297_v31, %v9112_v1  ;;  %v4124_v23 = vld [vmem:[%s8616_s0 + $0xda] sm:$0xff]  ;;  %v4172_v56 = vld [vmem:[%s8616_s0 + $0x34a] sm:$0xff] }
 0x53e   :  { %4179 = vmatmul.msk.f32.gmra.mxu0 %vm3169_vm9, %v3104_v6  ;;  %4195 = vmatmul.msk.f32.gmra.mxu1 %vm3169_vm9, %v3120_v16  ;;  %v3133_v13 = vsel %vm3099_vm8, %v3068_v30, %v2519_v26  ;;  %v2731_v8 = vsel %vm2709_vm1, %v7657_v2, %v9114_v33  ;;  %v2744_v34 = vsel %vm2709_vm1, %v7668_v46, %v9115_v44  ;;  %v9117_v2 = vld [vmem:[#allocation119_spill] sm:$0xff]  ;;  %v9119_v27 = vld [vmem:[#allocation149_spill] sm:$0xff]  ;;  %v9120_v10 = vld [vmem:[#allocation160_spill] sm:$0xff] }
 0x53f   :  { %v2760_v43 = vsel %vm2709_vm1, %v2695_v36, %v9116_v40  ;;  %4208 = vmatmul.msk.f32.gmra.mxu2 %vm3169_vm9, %v3133_v13  ;;  %4224 = vmatmul.msk.f32.gmra.mxu3 %vm3169_vm9, %v3149_v53  ;;  %v2780_v28 = vsel %vm2774_vm2, %v2715_v4, %v9117_v2  ;;  %v9118_v7 = vld [vmem:[#allocation123_spill] sm:$0xff]  ;;  %v2809_v37 = vsel %vm2774_vm2, %v2744_v34, %v9119_v27  ;;  %v9121_v49 = vld [vmem:[#allocation166_spill] sm:$0xff]  ;;  %v9126_v9 = vld [vmem:[#allocation245_spill] sm:$0xff] }
 0x540   :  { %v2796_v46 = vsel %vm2774_vm2, %v2731_v8, %v9118_v7  ;;  %v2825_v58 = vsel %vm2774_vm2, %v2760_v43, %v9120_v10  ;;  %v4156_v14 = vld [vmem:[%s8616_s0 + $0x28a] sm:$0xff]  ;;  %v2845_v47 = vsel %vm2839_vm3, %v2780_v28, %v9121_v49  ;;  %v9127_v20 = vld [vmem:[#allocation273_spill] sm:$0xff]  ;;  %v9132_v53 = vld [vmem:[#allocation316_spill] sm:$0xff] }
 0x541   :  { %v9122_v63 = vld [vmem:[#allocation191_spill] sm:$0xff]  ;;  %v9123_v41 = vld [vmem:[#allocation202_spill] sm:$0xff]  ;;  %v9129_v25 = vld [vmem:[#allocation285_spill] sm:$0xff] }
 0x542   :  { %v2861_v12 = vsel %vm2839_vm3, %v2796_v46, %v9122_v63  ;;  %v2874_v32 = vsel %vm2839_vm3, %v2809_v37, %v9123_v41  ;;  %v9124_v22 = vld [vmem:[#allocation207_spill] sm:$0xff]  ;;  %2480 = vrot.lane.b32.xlu2 %v4124_v23, %s4365_s7  ;;  %2576 = vrot.lane.b32.xlu1 %v4172_v56, %s4365_s7  ;;  %v9130_v30 = vld [vmem:[#allocation290_spill] sm:$0xff]  ;;  %v9133_v1 = vld [vmem:[#allocation333_spill] sm:$0xff] }
 0x543   :  { %v2890_v62 = vsel %vm2839_vm3, %v2825_v58, %v9124_v22  ;;  %v9125_v48 = vld [vmem:[#allocation231_spill] sm:$0xff]  ;;  %v2926_v50 = vsel %vm2904_vm4, %v2861_v12, %v9126_v9  ;;  %2544 = vrot.lane.b32.xlu0 %v4156_v14, %s4365_s7  ;;  %v9136_v34 = vld [vmem:[#allocation370_spill] sm:$0xff]  ;;  %v9138_v37 = vld [vmem:[#allocation29_spill] sm:$0xff] }
 0x544   :  { %v2910_v17 = vsel %vm2904_vm4, %v2845_v47, %v9125_v48  ;;  %v2955_v57 = vsel %vm2904_vm4, %v2890_v62, %v9127_v20  ;;  %v9128_v55 = vld [vmem:[#allocation247_spill] sm:$0xff]  ;;  %v2991_v26 = vsel %vm2969_vm5, %v2926_v50, %v9130_v30  ;;  %v2495_v8 = vpop.permute.xlu2 %2494  ;;  %v2553_v44 = vpop.permute.xlu1 %2552  ;;  %v4298_v28 = vld [vmem:[%s8616_s0 + $0x48] sm:$0xff]  ;;  %v9142_v62 = vld [vmem:[#allocation97_spill] sm:$0xff] }
 0x545   :  { %v2939_v45 = vsel %vm2904_vm4, %v2874_v32, %v9128_v55  ;;  %v2975_v18 = vsel %vm2969_vm5, %v2910_v17, %v9129_v25  ;;  %v9131_v6 = vld [vmem:[#allocation327_spill] sm:$0xff]  ;;  %v2521_v43 = vpop.permute.xlu0 %2520  ;;  %v4299_v27 = vld [vmem:[%s8616_s0 + $0x108] sm:$0xff]  ;;  %v9143_v17 = vld [vmem:[#allocation112_spill] sm:$0xff] }
 0x546   :  { %v3020_v16 = vsel %vm2969_vm5, %v2955_v57, %v9131_v6  ;;  %v3004_v31 = vsel %vm2969_vm5, %v2939_v45, %v9132_v53  ;;  %v3040_v36 = vsel %vm3034_vm6, %v2975_v18, %v9133_v1  ;;  %v9134_v39 = vld [vmem:[#allocation359_spill] sm:$0xff]  ;;  %v2667_v10 = vsel %vm2644_vm0, %v4299_v27, %v9138_v37  ;;  %v9140_v47 = vld [vmem:[#allocation66_spill] sm:$0xff]  ;;  %v9144_v50 = vld [vmem:[#allocation137_spill] sm:$0xff] }
 0x547   :  { %v3056_v4 = vsel %vm3034_vm6, %v2991_v26, %v9134_v39  ;;  %v9135_v13 = vld [vmem:[#allocation375_spill] sm:$0xff]  ;;  %v3069_v40 = vsel %vm3034_vm6, %v3004_v31, %v9136_v34  ;;  %v3105_v23 = vsel %vm3099_vm8, %v3040_v36, %v7659_v29  ;;  %v4140_v57 = vld [vmem:[%s8616_s0 + $0x19a] sm:$0xff]  ;;  %v9147_v30 = vld [vmem:[#allocation190_spill] sm:$0xff] }
 0x548   :  { %v3085_v33 = vsel %vm3034_vm6, %v3020_v16, %v9135_v13  ;;  %v3121_v56 = vsel %vm3099_vm8, %v3056_v4, %v2495_v8  ;;  %v9137_v7 = vld [vmem:[#allocation15_spill] sm:$0xff]  ;;  %4180 = vmatmul.msk.f32.gmra.mxu0 %vm3169_vm9, %v3105_v23  ;;  %v3134_v29 = vsel %vm3099_vm8, %v3069_v40, %v2521_v43  ;;  %v9145_v55 = vld [vmem:[#allocation148_spill] sm:$0xff]  ;;  %v9149_v53 = vld [vmem:[#allocation230_spill] sm:$0xff] }
 0x549   :  { %v3150_v2 = vsel %vm3099_vm8, %v3085_v33, %v2553_v44  ;;  %v2651_v46 = vsel %vm2644_vm0, %v4298_v28, %v9137_v7  ;;  %4196 = vmatmul.msk.f32.gmra.mxu1 %vm3169_vm9, %v3121_v56  ;;  %v4300_v58 = vld [vmem:[%s8616_s0 + $0x1d0] sm:$0xff]  ;;  %4209 = vmatmul.msk.f32.gmra.mxu2 %vm3169_vm9, %v3134_v29  ;;  %v9146_v25 = vld [vmem:[#allocation176_spill] sm:$0xff]  ;;  %v9151_v39 = vld [vmem:[#allocation261_spill] sm:$0xff] }
 0x54a   :  { %v9139_v14 = vld [vmem:[#allocation31_spill] sm:$0xff]  ;;  %v2716_v63 = vsel %vm2709_vm1, %v2651_v46, %v9140_v47  ;;  %4225 = vmatmul.msk.f32.gmra.mxu3 %vm3169_vm9, %v3150_v2  ;;  %v9148_v6 = vld [vmem:[#allocation192_spill] sm:$0xff]  ;;  %v9152_v13 = vld [vmem:[#allocation277_spill] sm:$0xff] }
 0x54b   :  { %v2680_v49 = vsel %vm2644_vm0, %v4300_v58, %v9139_v14  ;;  %v9141_v12 = vld [vmem:[#allocation71_spill] sm:$0xff]  ;;  %v2781_v9 = vsel %vm2774_vm2, %v2716_v63, %v9143_v17  ;;  %v9153_v8 = vld [vmem:[#allocation304_spill] sm:$0xff]  ;;  %2512 = vrot.lane.b32.xlu0 %v4140_v57, %s4365_s7  ;;  %v9156_v56 = vld [vmem:[#allocation358_spill] sm:$0xff] }
 0x54c   :  { %v2732_v41 = vsel %vm2709_vm1, %v2667_v10, %v9141_v12  ;;  %v4173_v32 = vld [vmem:[%s8616_s0 + $0x352] sm:$0xff]  ;;  %v2745_v48 = vsel %vm2709_vm1, %v2680_v49, %v9142_v62  ;;  %v2846_v18 = vsel %vm2839_vm3, %v2781_v9, %v9146_v25  ;;  %v2497_v28 = vpop.permute.xlu2 %2496  ;;  %v2555_v7 = vpop.permute.xlu1 %2554  ;;  %v4302_v63 = vld [vmem:[%s8616_s0 + $0x2a0] sm:$0xff] }
 0x54d   :  { %v4157_v22 = vld [vmem:[%s8616_s0 + $0x292] sm:$0xff]  ;;  %v2797_v20 = vsel %vm2774_vm2, %v2732_v41, %v9144_v50  ;;  %v2810_v45 = vsel %vm2774_vm2, %v2745_v48, %v9145_v55  ;;  %v2911_v31 = vsel %vm2904_vm4, %v2846_v18, %v9149_v53  ;;  %2578 = vrot.lane.b32.xlu2 %v4173_v32, %s4365_s7  ;;  %v2523_v37 = vpop.permute.xlu0 %2522  ;;  %v3151_v58 = vsel %vm3099_vm8, %v7274_v5, %v2555_v7  ;;  %v9160_v32 = vld [vmem:[#allocation45_spill] sm:$0xff] }
 0x54e   :  { %v2862_v26 = vsel %vm2839_vm3, %v2797_v20, %v9147_v30  ;;  %v2875_v16 = vsel %vm2839_vm3, %v2810_v45, %v9148_v6  ;;  %v9150_v1 = vld [vmem:[#allocation235_spill] sm:$0xff]  ;;  %2546 = vrot.lane.b32.xlu1 %v4157_v22, %s4365_s7  ;;  %v2976_v33 = vsel %vm2969_vm5, %v2911_v31, %v9152_v13  ;;  %v9155_v43 = vld [vmem:[#allocation344_spill] sm:$0xff]  ;;  %v9161_v62 = vld [vmem:[#allocation85_spill] sm:$0xff] }
 0x54f   :  { %v2927_v36 = vsel %vm2904_vm4, %v2862_v26, %v9150_v1  ;;  %v2940_v4 = vsel %vm2904_vm4, %v2875_v16, %v9151_v39  ;;  %v9154_v34 = vld [vmem:[#allocation315_spill] sm:$0xff]  ;;  %v3041_v23 = vsel %vm3034_vm6, %v2976_v33, %v9155_v43  ;;  %v9157_v46 = vld [vmem:[#allocation360_spill] sm:$0xff]  ;;  %v9162_v17 = vld [vmem:[#allocation101_spill] sm:$0xff] }
 0x550   :  { %v2992_v44 = vsel %vm2969_vm5, %v2927_v36, %v9153_v8  ;;  %v3005_v40 = vsel %vm2969_vm5, %v2940_v4, %v9154_v34  ;;  %v3106_v10 = vsel %vm3099_vm8, %v3041_v23, %v7648_v19  ;;  %v4301_v14 = vld [vmem:[%s8616_s0 + $0x110] sm:$0xff]  ;;  %v9159_v12 = vld [vmem:[#allocation56_spill] sm:$0xff]  ;;  %v4303_v19 = vld [vmem:[%s8616_s0 + $0x1e0] sm:$0xff] }
 0x551   :  { %v3057_v2 = vsel %vm3034_vm6, %v2992_v44, %v9156_v56  ;;  %v3070_v27 = vsel %vm3034_vm6, %v3005_v40, %v9157_v46  ;;  %v9158_v49 = vld [vmem:[#allocation19_spill] sm:$0xff]  ;;  %v2697_v41 = vsel %vm2644_vm0, %v4302_v63, %v9159_v12  ;;  %4181 = vmatmul.msk.f32.gmra.mxu0 %vm3169_vm9, %v3106_v10  ;;  %v2681_v22 = vsel %vm2644_vm0, %v4303_v19, %v9160_v32  ;;  %v4141_v50 = vld [vmem:[%s8616_s0 + $0x1a2] sm:$0xff]  ;;  %v9163_v20 = vld [vmem:[#allocation96_spill] sm:$0xff] }
 0x552   :  { %v3122_v29 = vsel %vm3099_vm8, %v3057_v2, %v2497_v28  ;;  %v2668_v47 = vsel %vm2644_vm0, %v4301_v14, %v9158_v49  ;;  %v3135_v5 = vsel %vm3099_vm8, %v3070_v27, %v2523_v37  ;;  %v2762_v9 = vsel %vm2709_vm1, %v2697_v41, %v9162_v17  ;;  %4226 = vmatmul.msk.f32.gmra.mxu3 %vm3169_vm9, %v3151_v58  ;;  %v9164_v55 = vld [vmem:[#allocation136_spill] sm:$0xff]  ;;  %v4125_v30 = vld [vmem:[%s8616_s0 + $0xe2] sm:$0xff]  ;;  %v9173_v40 = vld [vmem:[#allocation303_spill] sm:$0xff] }
 0x553   :  { %4197 = vmatmul.msk.f32.gmra.mxu1 %vm3169_vm9, %v3122_v29  ;;  %v2733_v48 = vsel %vm2709_vm1, %v2668_v47, %v9161_v62  ;;  %4210 = vmatmul.msk.f32.gmra.mxu2 %vm3169_vm9, %v3135_v5  ;;  %v2746_v57 = vsel %vm2709_vm1, %v2681_v22, %v9163_v20  ;;  %v9165_v25 = vld [vmem:[#allocation164_spill] sm:$0xff]  ;;  %v9166_v26 = vld [vmem:[#allocation138_spill] sm:$0xff]  ;;  %v9168_v31 = vld [vmem:[#allocation217_spill] sm:$0xff] }
 0x554   :  { %v2798_v45 = vsel %vm2774_vm2, %v2733_v48, %v9164_v55  ;;  %v2827_v18 = vsel %vm2774_vm2, %v2762_v9, %v9165_v25  ;;  %v2811_v6 = vsel %vm2774_vm2, %v2746_v57, %v9166_v26  ;;  %v9167_v16 = vld [vmem:[#allocation180_spill] sm:$0xff]  ;;  %v9169_v36 = vld [vmem:[#allocation206_spill] sm:$0xff]  ;;  %v9170_v4 = vld [vmem:[#allocation249_spill] sm:$0xff]  ;;  %2482 = vrot.lane.b32.xlu0 %v4125_v30, %s4365_s7  ;;  %v2499_v37 = vpop.permute.xlu2 %2498  ;;  %v2557_v10 = vpop.permute.xlu1 %2556 }
 0x555   :  { %v2863_v53 = vsel %vm2839_vm3, %v2798_v45, %v9167_v16  ;;  %v2892_v1 = vsel %vm2839_vm3, %v2827_v18, %v9168_v31  ;;  %v2876_v39 = vsel %vm2839_vm3, %v2811_v6, %v9169_v36  ;;  %v9171_v33 = vld [vmem:[#allocation265_spill] sm:$0xff]  ;;  %v9172_v44 = vld [vmem:[#allocation260_spill] sm:$0xff]  ;;  %v9174_v23 = vld [vmem:[#allocation331_spill] sm:$0xff]  ;;  %v2525_v14 = vpop.permute.xlu0 %2524 }
 0x556   :  { %v2928_v13 = vsel %vm2904_vm4, %v2863_v53, %v9170_v4  ;;  %v2957_v8 = vsel %vm2904_vm4, %v2892_v1, %v9171_v33  ;;  %2514 = vrot.lane.b32.xlu1 %v4141_v50, %s4365_s7  ;;  %v2941_v34 = vsel %vm2904_vm4, %v2876_v39, %v9172_v44  ;;  %v9175_v2 = vld [vmem:[#allocation305_spill] sm:$0xff]  ;;  %v9176_v7 = vld [vmem:[#allocation348_spill] sm:$0xff]  ;;  %v9177_v29 = vld [vmem:[#allocation374_spill] sm:$0xff] }
 0x557   :  { %v2993_v43 = vsel %vm2969_vm5, %v2928_v13, %v9173_v40  ;;  %v3022_v56 = vsel %vm2969_vm5, %v2957_v8, %v9174_v23  ;;  %v3006_v28 = vsel %vm2969_vm5, %v2941_v34, %v9175_v2  ;;  %v4304_v63 = vld [vmem:[%s8616_s0 + $0x60] sm:$0xff]  ;;  %v9178_v12 = vld [vmem:[#allocation7_spill] sm:$0xff]  ;;  %v4306_v22 = vld [vmem:[%s8616_s0 + $0x1e8] sm:$0xff] }
 0x558   :  { %v3058_v46 = vsel %vm3034_vm6, %v2993_v43, %v9176_v7  ;;  %v3087_v27 = vsel %vm3034_vm6, %v3022_v56, %v7263_v60  ;;  %v3071_v58 = vsel %vm3034_vm6, %v3006_v28, %v9177_v29  ;;  %v2653_v41 = vsel %vm2644_vm0, %v4304_v63, %v9178_v12  ;;  %v4305_v60 = vld [vmem:[%s8616_s0 + $0x2a8] sm:$0xff]  ;;  %v9179_v5 = vld [vmem:[#allocation49_spill] sm:$0xff]  ;;  %v9180_v62 = vld [vmem:[#allocation44_spill] sm:$0xff] }
 0x559   :  { %v3123_v49 = vsel %vm3099_vm8, %v3058_v46, %v2499_v37  ;;  %v3152_v47 = vsel %vm3099_vm8, %v3087_v27, %v2557_v10  ;;  %v2698_v19 = vsel %vm2644_vm0, %v4305_v60, %v9179_v5  ;;  %4182 = vmatmul.msk.f32.gmra.mxu0 %vm3169_vm9, %v7442_v51  ;;  %v3136_v32 = vsel %vm3099_vm8, %v3071_v58, %v2525_v14  ;;  %v9181_v17 = vld [vmem:[#allocation70_spill] sm:$0xff]  ;;  %v9185_v25 = vld [vmem:[#allocation163_spill] sm:$0xff]  ;;  %v9186_v30 = vld [vmem:[#allocation152_spill] sm:$0xff] }
 0x55a   :  { %v2682_v48 = vsel %vm2644_vm0, %v4306_v22, %v9180_v62  ;;  %v2718_v9 = vsel %vm2709_vm1, %v2653_v41, %v9181_v17  ;;  %v9182_v50 = vld [vmem:[#allocation110_spill] sm:$0xff]  ;;  %4227 = vmatmul.msk.f32.gmra.mxu3 %vm3169_vm9, %v3152_v47  ;;  %v9187_v6 = vld [vmem:[#allocation167_spill] sm:$0xff]  ;;  %v9189_v1 = vld [vmem:[#allocation205_spill] sm:$0xff] }
 0x55b   :  { %4198 = vmatmul.msk.f32.gmra.mxu1 %vm3169_vm9, %v3123_v49  ;;  %v2763_v20 = vsel %vm2709_vm1, %v2698_v19, %v9182_v50  ;;  %4211 = vmatmul.msk.f32.gmra.mxu2 %vm3169_vm9, %v3136_v32  ;;  %v9183_v51 = vld [vmem:[#allocation86_spill] sm:$0xff]  ;;  %v9191_v13 = vld [vmem:[#allocation275_spill] sm:$0xff]  ;;  %v9193_v34 = vld [vmem:[#allocation288_spill] sm:$0xff] }
 0x55c   :  { %v2747_v57 = vsel %vm2709_vm1, %v2682_v48, %v9183_v51  ;;  %v9184_v55 = vld [vmem:[#allocation122_spill] sm:$0xff]  ;;  %v2828_v18 = vsel %vm2774_vm2, %v2763_v20, %v9185_v25  ;;  %v9195_v56 = vld [vmem:[#allocation319_spill] sm:$0xff]  ;;  %v2469_v27 = vpop.permute.xlu2 %2468  ;;  %v2559_v37 = vpop.permute.xlu1 %2558  ;;  %v9197_v10 = vld [vmem:[#allocation373_spill] sm:$0xff] }
 0x55d   :  { %v2783_v45 = vsel %vm2774_vm2, %v2718_v9, %v9184_v55  ;;  %v2812_v26 = vsel %vm2774_vm2, %v2747_v57, %v9186_v30  ;;  %v9188_v53 = vld [vmem:[#allocation210_spill] sm:$0xff]  ;;  %v2527_v58 = vpop.permute.xlu0 %2526  ;;  %v4307_v63 = vld [vmem:[%s8616_s0 + $0x1f8] sm:$0xff]  ;;  %v9200_v5 = vld [vmem:[#allocation151_spill] sm:$0xff] }
 0x55e   :  { %v2848_v16 = vsel %vm2839_vm3, %v2783_v45, %v9187_v6  ;;  %v2893_v31 = vsel %vm2839_vm3, %v2828_v18, %v9188_v53  ;;  %v2877_v36 = vsel %vm2839_vm3, %v2812_v26, %v9189_v1  ;;  %v9190_v39 = vld [vmem:[#allocation234_spill] sm:$0xff]  ;;  %v9199_v41 = vld [vmem:[#allocation100_spill] sm:$0xff]  ;;  %v9201_v32 = vld [vmem:[#allocation195_spill] sm:$0xff] }
 0x55f   :  { %v2913_v4 = vsel %vm2904_vm4, %v2848_v16, %v9190_v39  ;;  %v2958_v33 = vsel %vm2904_vm4, %v2893_v31, %v9191_v13  ;;  %v9192_v8 = vld [vmem:[#allocation250_spill] sm:$0xff]  ;;  %v9202_v62 = vld [vmem:[#allocation264_spill] sm:$0xff]  ;;  %v9204_v20 = vld [vmem:[#allocation363_spill] sm:$0xff] }
 0x560   :  { %v2942_v44 = vsel %vm2904_vm4, %v2877_v36, %v9192_v8  ;;  %v2978_v40 = vsel %vm2969_vm5, %v2913_v4, %v9193_v34  ;;  %v9194_v43 = vld [vmem:[#allocation330_spill] sm:$0xff]  ;;  %v4308_v25 = vld [vmem:[%s8616_s0 + $0x200] sm:$0xff]  ;;  %v9205_v18 = vld [vmem:[#allocation48_spill] sm:$0xff] }
 0x561   :  { %v3023_v23 = vsel %vm2969_vm5, %v2958_v33, %v9194_v43  ;;  %v3007_v2 = vsel %vm2969_vm5, %v2942_v44, %v9195_v56  ;;  %v9196_v28 = vld [vmem:[#allocation334_spill] sm:$0xff]  ;;  %v2684_v30 = vsel %vm2644_vm0, %v4308_v25, %v9205_v18  ;;  %v9206_v26 = vld [vmem:[#allocation99_spill] sm:$0xff]  ;;  %v9207_v16 = vld [vmem:[#allocation141_spill] sm:$0xff] }
 0x562   :  { %v3043_v7 = vsel %vm3034_vm6, %v2978_v40, %v9196_v28  ;;  %v3088_v46 = vsel %vm3034_vm6, %v3023_v23, %v7137_v42  ;;  %v3072_v29 = vsel %vm3034_vm6, %v3007_v2, %v9197_v10  ;;  %v9198_v12 = vld [vmem:[#allocation34_spill] sm:$0xff]  ;;  %v2749_v6 = vsel %vm2709_vm1, %v2684_v30, %v9206_v26  ;;  %v9209_v1 = vld [vmem:[#allocation263_spill] sm:$0xff]  ;;  %v9210_v39 = vld [vmem:[#allocation308_spill] sm:$0xff] }
 0x563   :  { %v3108_v14 = vsel %vm3099_vm8, %v3043_v7, %v2469_v27  ;;  %v3153_v49 = vsel %vm3099_vm8, %v3088_v46, %v2559_v37  ;;  %v3137_v47 = vsel %vm3099_vm8, %v3072_v29, %v2527_v58  ;;  %v2683_v42 = vsel %vm2644_vm0, %v4307_v63, %v9198_v12  ;;  %v9203_v17 = vld [vmem:[#allocation318_spill] sm:$0xff]  ;;  %v9211_v8 = vld [vmem:[#allocation377_spill] sm:$0xff]  ;;  %v4309_v23 = vld [vmem:[%s8616_s0 + $0x210] sm:$0xff] }
 0x564   :  { %4183 = vmatmul.msk.f32.gmra.mxu0 %vm3169_vm9, %v3108_v14  ;;  %4212 = vmatmul.msk.f32.gmra.mxu2 %vm3169_vm9, %v3137_v47  ;;  %v2748_v60 = vsel %vm2709_vm1, %v2683_v42, %v9199_v41  ;;  %v2561_v50 = vpop.permute.xlu1 %2560  ;;  %v2814_v53 = vsel %vm2774_vm2, %v2749_v6, %v9207_v16  ;;  %v2567_v13 = vpop.permute.xlu2 %2566  ;;  %v9212_v56 = vld [vmem:[#allocation47_spill] sm:$0xff]  ;;  %v9213_v28 = vld [vmem:[#allocation89_spill] sm:$0xff]  ;;  %v9214_v46 = vld [vmem:[#allocation154_spill] sm:$0xff] }
 0x565   :  { %4228 = vmatmul.msk.f32.gmra.mxu3 %vm3169_vm9, %v3153_v49  ;;  %v2813_v19 = vsel %vm2774_vm2, %v2748_v60, %v9200_v5  ;;  %v2529_v57 = vpop.permute.xlu0 %2528  ;;  %v3154_v55 = vsel %vm3099_vm8, %v7324_v11, %v2561_v50  ;;  %v9208_v11 = vld [vmem:[#allocation209_spill] sm:$0xff]  ;;  %v2685_v2 = vsel %vm2644_vm0, %v4309_v23, %v9212_v56  ;;  %v9218_v47 = vld [vmem:[#allocation376_spill] sm:$0xff]  ;;  %v9226_v18 = vld [vmem:[#allocation194_spill] sm:$0xff] }
 0x566   :  { %v2878_v22 = vsel %vm2839_vm3, %v2813_v19, %v9201_v32  ;;  %v2879_v31 = vsel %vm2839_vm3, %v2814_v53, %v9208_v11  ;;  %v2750_v7 = vsel %vm2709_vm1, %v2685_v2, %v9213_v28  ;;  %v9216_v10 = vld [vmem:[#allocation253_spill] sm:$0xff]  ;;  %v4310_v41 = vld [vmem:[%s8616_s0 + $0x218] sm:$0xff]  ;;  %v9227_v26 = vld [vmem:[#allocation267_spill] sm:$0xff] }
 0x567   :  { %v2943_v48 = vsel %vm2904_vm4, %v2878_v22, %v9202_v62  ;;  %v2944_v36 = vsel %vm2904_vm4, %v2879_v31, %v9209_v1  ;;  %v2815_v27 = vsel %vm2774_vm2, %v2750_v7, %v9214_v46  ;;  %v9217_v58 = vld [vmem:[#allocation321_spill] sm:$0xff]  ;;  %v9228_v16 = vld [vmem:[#allocation248_spill] sm:$0xff]  ;;  %v4313_v28 = vld [vmem:[%s8616_s0 + $0x68] sm:$0xff] }
 0x568   :  { %v3008_v9 = vsel %vm2969_vm5, %v2943_v48, %v9203_v17  ;;  %v3009_v4 = vsel %vm2969_vm5, %v2944_v36, %v9210_v39  ;;  %v9219_v60 = vld [vmem:[#allocation37_spill] sm:$0xff]  ;;  %v9221_v17 = vld [vmem:[#allocation103_spill] sm:$0xff]  ;;  %v9229_v11 = vld [vmem:[#allocation320_spill] sm:$0xff] }
 0x569   :  { %v3073_v51 = vsel %vm3034_vm6, %v3008_v9, %v9204_v20  ;;  %v3074_v44 = vsel %vm3034_vm6, %v3009_v4, %v9211_v8  ;;  %v2686_v5 = vsel %vm2644_vm0, %v4310_v41, %v9219_v60  ;;  %v4311_v22 = vld [vmem:[%s8616_s0 + $0x120] sm:$0xff]  ;;  %v9222_v9 = vld [vmem:[#allocation84_spill] sm:$0xff]  ;;  %v9231_v39 = vld [vmem:[#allocation366_spill] sm:$0xff] }
 0x56a   :  { %v3138_v45 = vsel %vm3099_vm8, %v3073_v51, %v2529_v57  ;;  %v9220_v62 = vld [vmem:[#allocation33_spill] sm:$0xff]  ;;  %v9224_v57 = vld [vmem:[#allocation126_spill] sm:$0xff]  ;;  %v9233_v23 = vld [vmem:[#allocation32_spill] sm:$0xff] }
 0x56b   :  { %v2669_v48 = vsel %vm2644_vm0, %v4311_v22, %v9220_v62  ;;  %v9223_v20 = vld [vmem:[#allocation153_spill] sm:$0xff]  ;;  %v9232_v8 = vld [vmem:[#allocation362_spill] sm:$0xff]  ;;  %v9243_v62 = vld [vmem:[#allocation179_spill] sm:$0xff] }
 0x56c   :  { %4213 = vmatmul.msk.f32.gmra.mxu2 %vm3169_vm9, %v3138_v45  ;;  %v2563_v33 = vpop.permute.xlu1 %2562  ;;  %v8166_v19 = vpop.permute.xlu2 %2536  ;;  %v2734_v50 = vsel %vm2709_vm1, %v2669_v48, %v9222_v9  ;;  %v9225_v45 = vld [vmem:[#allocation198_spill] sm:$0xff]  ;;  %v9230_v1 = vld [vmem:[#allocation293_spill] sm:$0xff]  ;;  %v9245_v9 = vld [vmem:[#allocation212_spill] sm:$0xff] }
 0x56d   :  { %4229 = vmatmul.msk.f32.gmra.mxu3 %vm3169_vm9, %v3154_v55  ;;  %v2531_v34 = vpop.permute.xlu0 %2530  ;;  %v3155_v40 = vsel %vm3099_vm8, %v7321_v35, %v2563_v33  ;;  %v9215_v35 = vld [vmem:[#allocation208_spill] sm:$0xff]  ;;  %v2799_v55 = vsel %vm2774_vm2, %v2734_v50, %v9224_v57  ;;  %v9234_v7 = vld [vmem:[#allocation18_spill] sm:$0xff]  ;;  %v9241_v60 = vld [vmem:[#allocation193_spill] sm:$0xff] }
 0x56e   :  { %v3139_v43 = vsel %vm3099_vm8, %v3074_v44, %v2531_v34  ;;  %v2880_v37 = vsel %vm2839_vm3, %v2815_v27, %v9215_v35  ;;  %v2864_v30 = vsel %vm2839_vm3, %v2799_v55, %v9226_v18  ;;  %v2654_v46 = vsel %vm2644_vm0, %v4313_v28, %v9234_v7  ;;  %v9235_v27 = vld [vmem:[#allocation74_spill] sm:$0xff]  ;;  %v9247_v57 = vld [vmem:[#allocation307_spill] sm:$0xff] }
 0x56f   :  { %v2945_v29 = vsel %vm2904_vm4, %v2880_v37, %v9216_v10  ;;  %v2929_v53 = vsel %vm2904_vm4, %v2864_v30, %v9228_v16  ;;  %v3157_v37 = vsel %vm3099_vm8, %v7379_v54, %v2567_v13  ;;  %v4314_v10 = vld [vmem:[%s8616_s0 + $0x228] sm:$0xff]  ;;  %v9240_v54 = vld [vmem:[#allocation113_spill] sm:$0xff]  ;;  %v9249_v18 = vld [vmem:[#allocation279_spill] sm:$0xff] }
 0x570   :  { %v3010_v14 = vsel %vm2969_vm5, %v2945_v29, %v9217_v58  ;;  %v2994_v36 = vsel %vm2969_vm5, %v2929_v53, %v9230_v1  ;;  %v9236_v29 = vld [vmem:[#allocation51_spill] sm:$0xff] }
 0x571   :  { %v3075_v63 = vsel %vm3034_vm6, %v3010_v14, %v9218_v47  ;;  %v3059_v44 = vsel %vm3034_vm6, %v2994_v36, %v9232_v8  ;;  %v2687_v58 = vsel %vm2644_vm0, %v4314_v10, %v9236_v29  ;;  %v9237_v14 = vld [vmem:[#allocation69_spill] sm:$0xff]  ;;  %v9238_v47 = vld [vmem:[#allocation140_spill] sm:$0xff]  ;;  %v9251_v53 = vld [vmem:[#allocation311_spill] sm:$0xff] }
 0x572   :  { %v9259_v10 = vld [vmem:[#allocation139_spill] sm:$0xff] }
 0x574   :  { %4214 = vmatmul.msk.f32.gmra.mxu2 %vm3169_vm9, %v3139_v43  ;;  %v2565_v49 = vpop.permute.xlu1 %2564  ;;  %v4312_v43 = vld [vmem:[%s8616_s0 + $0x128] sm:$0xff] }
 0x575   :  { %4230 = vmatmul.msk.f32.gmra.mxu3 %vm3169_vm9, %v3155_v40  ;;  %v2533_v12 = vpop.permute.xlu0 %2532  ;;  %v3156_v42 = vsel %vm3099_vm8, %v7173_v21, %v2565_v49  ;;  %v2751_v21 = vsel %vm2709_vm1, %v2686_v5, %v9221_v17  ;;  %v2670_v56 = vsel %vm2644_vm0, %v4312_v43, %v9233_v23  ;;  %v2719_v49 = vsel %vm2709_vm1, %v2654_v46, %v9237_v14  ;;  %v9244_v17 = vld [vmem:[#allocation238_spill] sm:$0xff]  ;;  %v4316_v43 = vld [vmem:[%s8616_s0 + $0x138] sm:$0xff] }
 0x576   :  { %v3140_v32 = vsel %vm3099_vm8, %v3075_v63, %v2533_v12  ;;  %v2816_v51 = vsel %vm2774_vm2, %v2751_v21, %v9223_v20  ;;  %v2735_v35 = vsel %vm2709_vm1, %v2670_v56, %v9235_v27  ;;  %v2505_v12 = vpop.permute.xlu2 %2504  ;;  %v2784_v13 = vsel %vm2774_vm2, %v2719_v49, %v9240_v54  ;;  %v9246_v20 = vld [vmem:[#allocation233_spill] sm:$0xff]  ;;  %v9255_v23 = vld [vmem:[#allocation22_spill] sm:$0xff]  ;;  %v9257_v46 = vld [vmem:[#allocation88_spill] sm:$0xff] }
 0x577   :  { %v2881_v25 = vsel %vm2839_vm3, %v2816_v51, %v9225_v45  ;;  %v2800_v63 = vsel %vm2774_vm2, %v2735_v35, %v9238_v47  ;;  %v2849_v48 = vsel %vm2839_vm3, %v2784_v13, %v9243_v62  ;;  %v9248_v45 = vld [vmem:[#allocation266_spill] sm:$0xff]  ;;  %v2671_v56 = vsel %vm2644_vm0, %v4316_v43, %v9255_v23  ;;  %v9258_v35 = vld [vmem:[#allocation125_spill] sm:$0xff]  ;;  %v9261_v49 = vld [vmem:[#allocation183_spill] sm:$0xff] }
 0x578   :  { %v2946_v6 = vsel %vm2904_vm4, %v2881_v25, %v9227_v26  ;;  %v2865_v5 = vsel %vm2839_vm3, %v2800_v63, %v9241_v60  ;;  %v2914_v51 = vsel %vm2904_vm4, %v2849_v48, %v9246_v20  ;;  %v9250_v26 = vld [vmem:[#allocation361_spill] sm:$0xff]  ;;  %v2736_v27 = vsel %vm2709_vm1, %v2671_v56, %v9257_v46  ;;  %v9262_v63 = vld [vmem:[#allocation223_spill] sm:$0xff]  ;;  %v9264_v13 = vld [vmem:[#allocation292_spill] sm:$0xff] }
 0x579   :  { %v3011_v31 = vsel %vm2969_vm5, %v2946_v6, %v9229_v11  ;;  %v2930_v21 = vsel %vm2904_vm4, %v2865_v5, %v9244_v17  ;;  %v2979_v30 = vsel %vm2969_vm5, %v2914_v51, %v9249_v18  ;;  %v2801_v29 = vsel %vm2774_vm2, %v2736_v27, %v9259_v10  ;;  %v9265_v5 = vld [vmem:[#allocation306_spill] sm:$0xff]  ;;  %v9267_v17 = vld [vmem:[#allocation351_spill] sm:$0xff] }
 0x57a   :  { %v3076_v4 = vsel %vm3034_vm6, %v3011_v31, %v9231_v39  ;;  %v2995_v55 = vsel %vm2969_vm5, %v2930_v21, %v9247_v57  ;;  %v9252_v31 = vld [vmem:[#allocation347_spill] sm:$0xff]  ;;  %v2866_v47 = vsel %vm2839_vm3, %v2801_v29, %v9261_v49  ;;  %v4317_v57 = vld [vmem:[%s8616_s0 + $0x80] sm:$0xff]  ;;  %v9269_v18 = vld [vmem:[#allocation50_spill] sm:$0xff] }
 0x57b   :  { %v3060_v6 = vsel %vm3034_vm6, %v2995_v55, %v9250_v26  ;;  %v3044_v1 = vsel %vm3034_vm6, %v2979_v30, %v9252_v31  ;;  %v9268_v55 = vld [vmem:[#allocation8_spill] sm:$0xff]  ;;  %v9279_v23 = vld [vmem:[#allocation323_spill] sm:$0xff]  ;;  %v9281_v27 = vld [vmem:[#allocation378_spill] sm:$0xff] }
 0x57c   :  { %4215 = vmatmul.msk.f32.gmra.mxu2 %vm3169_vm9, %v3140_v32  ;;  %v2535_v33 = vpop.permute.xlu1 %2534  ;;  %v9242_v32 = vld [vmem:[#allocation144_spill] sm:$0xff]  ;;  %v4319_v29 = vld [vmem:[%s8616_s0 + $0x240] sm:$0xff] }
 0x57d   :  { %4231 = vmatmul.msk.f32.gmra.mxu3 %vm3169_vm9, %v3156_v42  ;;  %v2501_v34 = vpop.permute.xlu0 %2500  ;;  %v3141_v40 = vsel %vm3099_vm8, %v3076_v4, %v2535_v33  ;;  %v9239_v42 = vld [vmem:[#allocation102_spill] sm:$0xff]  ;;  %v4315_v4 = vld [vmem:[%s8616_s0 + $0x78] sm:$0xff]  ;;  %v9253_v33 = vld [vmem:[#allocation17_spill] sm:$0xff] }
 0x57e   :  { %v3124_v2 = vsel %vm3099_vm8, %v3059_v44, %v2501_v34  ;;  %v2752_v41 = vsel %vm2709_vm1, %v2687_v58, %v9239_v42  ;;  %v2655_v8 = vsel %vm2644_vm0, %v4315_v4, %v9253_v33  ;;  %v9254_v44 = vld [vmem:[#allocation379_spill] sm:$0xff]  ;;  %v9260_v58 = vld [vmem:[#allocation178_spill] sm:$0xff]  ;;  %v2475_v42 = vpop.permute.xlu2 %2474  ;;  %v9271_v26 = vld [vmem:[#allocation92_spill] sm:$0xff] }
 0x57f   :  { %4199 = vmatmul.msk.f32.gmra.mxu1 %vm3169_vm9, %v3124_v2  ;;  %v2817_v22 = vsel %vm2774_vm2, %v2752_v41, %v9242_v32  ;;  %v9256_v2 = vld [vmem:[#allocation59_spill] sm:$0xff]  ;;  %v9263_v41 = vld [vmem:[#allocation252_spill] sm:$0xff]  ;;  %v9276_v33 = vld [vmem:[#allocation237_spill] sm:$0xff] }
 0x580   :  { %v2882_v50 = vsel %vm2839_vm3, %v2817_v22, %v9245_v9  ;;  %v2720_v28 = vsel %vm2709_vm1, %v2655_v8, %v9256_v2  ;;  %v2931_v54 = vsel %vm2904_vm4, %v2866_v47, %v9263_v41  ;;  %v9266_v22 = vld [vmem:[#allocation346_spill] sm:$0xff] }
 0x581   :  { %v2947_v25 = vsel %vm2904_vm4, %v2882_v50, %v9248_v45  ;;  %v2996_v32 = vsel %vm2969_vm5, %v2931_v54, %v9265_v5  ;;  %v2656_v45 = vsel %vm2644_vm0, %v4317_v57, %v9268_v55  ;;  %v9284_v54 = vld [vmem:[#allocation105_spill] sm:$0xff]  ;;  %v9292_v57 = vld [vmem:[#allocation322_spill] sm:$0xff] }
 0x582   :  { %v3012_v11 = vsel %vm2969_vm5, %v2947_v25, %v9251_v53  ;;  %v3061_v21 = vsel %vm3034_vm6, %v2996_v32, %v9267_v17  ;;  %v4318_v25 = vld [vmem:[%s8616_s0 + $0x230] sm:$0xff]  ;;  %v9287_v32 = vld [vmem:[#allocation129_spill] sm:$0xff] }
 0x583   :  { %v3077_v34 = vsel %vm3034_vm6, %v3012_v11, %v9254_v44  ;;  %v3126_v20 = vsel %vm3099_vm8, %v3061_v21, %v2505_v12  ;;  %v2688_v30 = vsel %vm2644_vm0, %v4318_v25, %v9269_v18  ;;  %v9270_v12 = vld [vmem:[#allocation73_spill] sm:$0xff]  ;;  %v9273_v11 = vld [vmem:[#allocation156_spill] sm:$0xff] }
 0x584   :  { %4216 = vmatmul.msk.f32.gmra.mxu2 %vm3169_vm9, %v3141_v40  ;;  %v2503_v16 = vpop.permute.xlu1 %2502  ;;  %v3142_v7 = vsel %vm3099_vm8, %v3077_v34, %v8166_v19  ;;  %v9277_v44 = vld [vmem:[#allocation256_spill] sm:$0xff]  ;;  %v9289_v17 = vld [vmem:[#allocation197_spill] sm:$0xff] }
 0x585   :  { %4232 = vmatmul.msk.f32.gmra.mxu3 %vm3169_vm9, %v3157_v37  ;;  %v2471_v36 = vpop.permute.xlu0 %2470  ;;  %v3125_v39 = vsel %vm3099_vm8, %v3060_v6, %v2503_v16  ;;  %v2785_v37 = vsel %vm2774_vm2, %v2720_v28, %v9258_v35  ;;  %v2753_v6 = vsel %vm2709_vm1, %v2688_v30, %v9271_v26  ;;  %v9272_v16 = vld [vmem:[#allocation124_spill] sm:$0xff] }
 0x586   :  { %v3109_v40 = vsel %vm3099_vm8, %v3044_v1, %v2471_v36  ;;  %v2850_v14 = vsel %vm2839_vm3, %v2785_v37, %v9260_v58  ;;  %v2818_v31 = vsel %vm2774_vm2, %v2753_v6, %v9273_v11  ;;  %v9274_v1 = vld [vmem:[#allocation168_spill] sm:$0xff]  ;;  %v2573_v2 = vpop.permute.xlu2 %2572  ;;  %v9295_v6 = vld [vmem:[#allocation365_spill] sm:$0xff] }
 0x587   :  { %4184 = vmatmul.msk.f32.gmra.mxu0 %vm3169_vm9, %v3109_v40  ;;  %4200 = vmatmul.msk.f32.gmra.mxu1 %vm3169_vm9, %v3125_v39  ;;  %v2915_v19 = vsel %vm2904_vm4, %v2850_v14, %v9262_v63  ;;  %v9275_v39 = vld [vmem:[#allocation211_spill] sm:$0xff]  ;;  %v9282_v58 = vld [vmem:[#allocation40_spill] sm:$0xff]  ;;  %v4320_v63 = vld [vmem:[%s8616_s0 + $0x140] sm:$0xff] }
 0x588   :  { %v2980_v60 = vsel %vm2969_vm5, %v2915_v19, %v9264_v13  ;;  %v2883_v4 = vsel %vm2839_vm3, %v2818_v31, %v9275_v39  ;;  %v9278_v40 = vld [vmem:[#allocation291_spill] sm:$0xff]  ;;  %v2689_v14 = vsel %vm2644_vm0, %v4319_v29, %v9282_v58  ;;  %v9283_v19 = vld [vmem:[#allocation36_spill] sm:$0xff] }
 0x589   :  { %v3045_v62 = vsel %vm3034_vm6, %v2980_v60, %v9266_v22  ;;  %v2948_v34 = vsel %vm2904_vm4, %v2883_v4, %v9277_v44  ;;  %v2672_v41 = vsel %vm2644_vm0, %v4320_v63, %v9283_v19  ;;  %v9285_v13 = vld [vmem:[#allocation87_spill] sm:$0xff]  ;;  %v9293_v18 = vld [vmem:[#allocation296_spill] sm:$0xff]  ;;  %v9307_v19 = vld [vmem:[#allocation241_spill] sm:$0xff] }
 0x58a   :  { %v3013_v56 = vsel %vm2969_vm5, %v2948_v34, %v9279_v23  ;;  %v2737_v60 = vsel %vm2709_vm1, %v2672_v41, %v9285_v13  ;;  %v4321_v31 = vld [vmem:[%s8616_s0 + $0x150] sm:$0xff]  ;;  %v9298_v34 = vld [vmem:[#allocation77_spill] sm:$0xff]  ;;  %v4323_v23 = vld [vmem:[%s8616_s0 + $0x248] sm:$0xff] }
 0x58b   :  { %v3078_v35 = vsel %vm3034_vm6, %v3013_v56, %v9281_v27  ;;  %v2802_v22 = vsel %vm2774_vm2, %v2737_v60, %v9287_v32  ;;  %v9299_v56 = vld [vmem:[#allocation53_spill] sm:$0xff]  ;;  %v9301_v27 = vld [vmem:[#allocation143_spill] sm:$0xff]  ;;  %v9309_v13 = vld [vmem:[#allocation236_spill] sm:$0xff] }
 0x58c   :  { %4217 = vmatmul.msk.f32.gmra.mxu2 %vm3169_vm9, %v3142_v7  ;;  %v2473_v48 = vpop.permute.xlu1 %2472  ;;  %v9280_v7 = vld [vmem:[#allocation336_spill] sm:$0xff]  ;;  %v2867_v21 = vsel %vm2839_vm3, %v2802_v22, %v9289_v17  ;;  %v9303_v29 = vld [vmem:[#allocation115_spill] sm:$0xff]  ;;  %v9312_v17 = vld [vmem:[#allocation281_spill] sm:$0xff] }
 0x58d   :  { %v2569_v9 = vpop.permute.xlu0 %2568  ;;  %v3110_v50 = vsel %vm3099_vm8, %v3045_v62, %v2473_v48  ;;  %v9288_v62 = vld [vmem:[#allocation201_spill] sm:$0xff] }
 0x58e   :  { %v3158_v51 = vsel %vm3099_vm8, %v7371_v0, %v2569_v9  ;;  %v2721_v0 = vsel %vm2709_vm1, %v2656_v45, %v9270_v12  ;;  %v9290_v9 = vld [vmem:[#allocation269_spill] sm:$0xff]  ;;  %v2543_v39 = vpop.permute.xlu2 %2542 }
 0x58f   :  { %4185 = vmatmul.msk.f32.gmra.mxu0 %vm3169_vm9, %v3110_v50  ;;  %4201 = vmatmul.msk.f32.gmra.mxu1 %vm3169_vm9, %v3126_v20  ;;  %v2786_v53 = vsel %vm2774_vm2, %v2721_v0, %v9272_v16  ;;  %v9291_v20 = vld [vmem:[#allocation251_spill] sm:$0xff]  ;;  %v9294_v12 = vld [vmem:[#allocation369_spill] sm:$0xff] }
 0x590   :  { %4233 = vmatmul.msk.f32.gmra.mxu3 %vm3169_vm9, %v3158_v51  ;;  %v2851_v36 = vsel %vm2839_vm3, %v2786_v53, %v9274_v1  ;;  %v2932_v51 = vsel %vm2904_vm4, %v2867_v21, %v9291_v20  ;;  %v9296_v1 = vld [vmem:[#allocation35_spill] sm:$0xff] }
 0x591   :  { %v2916_v8 = vsel %vm2904_vm4, %v2851_v36, %v9276_v33  ;;  %v2997_v30 = vsel %vm2969_vm5, %v2932_v51, %v9293_v18  ;;  %v2673_v36 = vsel %vm2644_vm0, %v4321_v31, %v9296_v1  ;;  %v4322_v33 = vld [vmem:[%s8616_s0 + $0x90] sm:$0xff]  ;;  %v9314_v51 = vld [vmem:[#allocation314_spill] sm:$0xff] }
 0x592   :  { %v2981_v43 = vsel %vm2969_vm5, %v2916_v8, %v9278_v40  ;;  %v3062_v16 = vsel %vm3034_vm6, %v2997_v30, %v9295_v6  ;;  %v9297_v8 = vld [vmem:[#allocation21_spill] sm:$0xff]  ;;  %v2738_v40 = vsel %vm2709_vm1, %v2673_v36, %v9298_v34  ;;  %v4324_v30 = vld [vmem:[%s8616_s0 + $0x98] sm:$0xff]  ;;  %v9318_v31 = vld [vmem:[#allocation62_spill] sm:$0xff] }
 0x593   :  { %v3046_v46 = vsel %vm3034_vm6, %v2981_v43, %v9280_v7  ;;  %v2657_v44 = vsel %vm2644_vm0, %v4322_v33, %v9297_v8  ;;  %v3160_v43 = vsel %vm3099_vm8, %v7452_v3, %v2573_v2  ;;  %v9300_v7 = vld [vmem:[#allocation72_spill] sm:$0xff]  ;;  %v9321_v34 = vld [vmem:[#allocation142_spill] sm:$0xff] }
 0x594   :  { %v2571_v28 = vpop.permute.xlu1 %2570  ;;  %v3111_v49 = vsel %vm3099_vm8, %v3046_v46, %v2475_v42  ;;  %v9286_v42 = vld [vmem:[#allocation155_spill] sm:$0xff]  ;;  %v2722_v46 = vsel %vm2709_vm1, %v2657_v44, %v9300_v7  ;;  %v9304_v2 = vld [vmem:[#allocation196_spill] sm:$0xff]  ;;  %v9324_v7 = vld [vmem:[#allocation226_spill] sm:$0xff] }
 0x595   :  { %v2539_v37 = vpop.permute.xlu0 %2538  ;;  %v3159_v10 = vsel %vm3099_vm8, %v7207_v52, %v2571_v28  ;;  %v2754_v52 = vsel %vm2709_vm1, %v2689_v14, %v9284_v54  ;;  %v2690_v28 = vsel %vm2644_vm0, %v4323_v23, %v9299_v56  ;;  %v2787_v3 = vsel %vm2774_vm2, %v2722_v46, %v9303_v29  ;;  %v9305_v14 = vld [vmem:[#allocation147_spill] sm:$0xff]  ;;  %v9308_v54 = vld [vmem:[#allocation214_spill] sm:$0xff]  ;;  %v9320_v33 = vld [vmem:[#allocation128_spill] sm:$0xff] }
 0x596   :  { %v3143_v47 = vsel %vm3099_vm8, %v3078_v35, %v2539_v37  ;;  %v2819_v5 = vsel %vm2774_vm2, %v2754_v52, %v9286_v42  ;;  %v2803_v35 = vsel %vm2774_vm2, %v2738_v40, %v9301_v27  ;;  %v9302_v37 = vld [vmem:[#allocation104_spill] sm:$0xff]  ;;  %v9310_v42 = vld [vmem:[#allocation310_spill] sm:$0xff]  ;;  %v2511_v44 = vpop.permute.xlu2 %2510  ;;  %v9325_v46 = vld [vmem:[#allocation255_spill] sm:$0xff] }
 0x597   :  { %4186 = vmatmul.msk.f32.gmra.mxu0 %vm3169_vm9, %v3111_v49  ;;  %4218 = vmatmul.msk.f32.gmra.mxu2 %vm3169_vm9, %v3143_v47  ;;  %v2884_v48 = vsel %vm2839_vm3, %v2819_v5, %v9288_v62  ;;  %v2868_v58 = vsel %vm2839_vm3, %v2803_v35, %v9304_v2  ;;  %v9306_v47 = vld [vmem:[#allocation182_spill] sm:$0xff]  ;;  %v9311_v62 = vld [vmem:[#allocation268_spill] sm:$0xff]  ;;  %v9326_v35 = vld [vmem:[#allocation295_spill] sm:$0xff] }
 0x598   :  { %4234 = vmatmul.msk.f32.gmra.mxu3 %vm3169_vm9, %v3159_v10  ;;  %v2949_v50 = vsel %vm2904_vm4, %v2884_v48, %v9290_v9  ;;  %v2755_v10 = vsel %vm2709_vm1, %v2690_v28, %v9302_v37  ;;  %v2852_v63 = vsel %vm2839_vm3, %v2787_v3, %v9306_v47  ;;  %v2933_v41 = vsel %vm2904_vm4, %v2868_v58, %v9307_v19  ;;  %v9313_v9 = vld [vmem:[#allocation364_spill] sm:$0xff]  ;;  %v9323_v56 = vld [vmem:[#allocation186_spill] sm:$0xff]  ;;  %v9327_v3 = vld [vmem:[#allocation309_spill] sm:$0xff] }
 0x599   :  { %v3014_v55 = vsel %vm2969_vm5, %v2949_v50, %v9292_v57  ;;  %v2820_v49 = vsel %vm2774_vm2, %v2755_v10, %v9305_v14  ;;  %v2917_v60 = vsel %vm2904_vm4, %v2852_v63, %v9309_v13  ;;  %v2998_v5 = vsel %vm2969_vm5, %v2933_v41, %v9310_v42  ;;  %v9328_v58 = vld [vmem:[#allocation349_spill] sm:$0xff]  ;;  %v9329_v47 = vld [vmem:[#allocation354_spill] sm:$0xff] }
 0x59a   :  { %v3079_v0 = vsel %vm3034_vm6, %v3014_v55, %v9294_v12  ;;  %v2885_v52 = vsel %vm2839_vm3, %v2820_v49, %v9308_v54  ;;  %v2982_v21 = vsel %vm2969_vm5, %v2917_v60, %v9312_v17  ;;  %v3063_v50 = vsel %vm3034_vm6, %v2998_v5, %v9313_v9  ;;  %v9315_v55 = vld [vmem:[#allocation350_spill] sm:$0xff]  ;;  %v9316_v12 = vld [vmem:[#allocation20_spill] sm:$0xff]  ;;  %v9330_v60 = vld [vmem:[#allocation11_spill] sm:$0xff] }
 0x59b   :  { %v3383_v45 = vpop.f32.mrf.mxu0  ;;  %v3431_v25 = vpop.f32.mrf.mxu1  ;;  %v2950_v48 = vsel %vm2904_vm4, %v2885_v52, %v9311_v62  ;;  %v4326_v13 = vld [vmem:[%s8616_s0 + $0xa8] sm:$0xff]  ;;  %v4327_v5 = vld [vmem:[%s8616_s0 + $0x258] sm:$0xff] }
 0x59c   :  { %v2541_v26 = vpop.permute.xlu1 %2540  ;;  %3607 = vxpose.xlu0.b32.start [1/16] (narrow) %v3431_v25, 8  ;;  %3575 = vxpose.xlu2.b32.start [1/16] (narrow) %v3383_v45, 8  ;;  %v3015_v57 = vsel %vm2969_vm5, %v2950_v48, %v9314_v51  ;;  %v3047_v45 = vsel %vm3034_vm6, %v2982_v21, %v9315_v55  ;;  %v2659_v42 = vsel %vm2644_vm0, %v4326_v13, %v9330_v60  ;;  %v9332_v62 = vld [vmem:[#allocation76_spill] sm:$0xff]  ;;  %v9333_v48 = vld [vmem:[#allocation95_spill] sm:$0xff]  ;;  %v9337_v55 = vld [vmem:[#allocation213_spill] sm:$0xff] }
 0x59d   :  { %v2507_v53 = vpop.permute.xlu0 %2506  ;;  %v3144_v11 = vsel %vm3099_vm8, %v3079_v0, %v2541_v26  ;;  %v2658_v0 = vsel %vm2644_vm0, %v4324_v30, %v9316_v12  ;;  %v3080_v26 = vsel %vm3034_vm6, %v3015_v57, %v7175_v15  ;;  %v9334_v21 = vld [vmem:[#allocation127_spill] sm:$0xff] }
 0x59e   :  { %v3127_v4 = vsel %vm3099_vm8, %v3062_v16, %v2507_v53  ;;  %v4325_v16 = vld [vmem:[%s8616_s0 + $0x158] sm:$0xff]  ;;  %v9317_v53 = vld [vmem:[#allocation25_spill] sm:$0xff]  ;;  %v2723_v1 = vsel %vm2709_vm1, %v2658_v0, %v9318_v31  ;;  %v3145_v36 = vsel %vm3099_vm8, %v3080_v26, %v2543_v39  ;;  %v9336_v51 = vld [vmem:[#allocation171_spill] sm:$0xff] }
 0x59f   :  { %4202 = vmatmul.msk.f32.gmra.mxu1 %vm3169_vm9, %v3127_v4  ;;  %4219 = vmatmul.msk.f32.gmra.mxu2 %vm3169_vm9, %v3144_v11  ;;  %v2674_v11 = vsel %vm2644_vm0, %v4325_v16, %v9317_v53  ;;  %v9319_v4 = vld [vmem:[#allocation91_spill] sm:$0xff]  ;;  %v2788_v8 = vsel %vm2774_vm2, %v2723_v1, %v9320_v33  ;;  %v9340_v16 = vld [vmem:[#allocation294_spill] sm:$0xff] }
 0x5a0   :  { %4235 = vmatmul.msk.f32.gmra.mxu3 %vm3169_vm9, %v3160_v43  ;;  %v2739_v15 = vsel %vm2709_vm1, %v2674_v11, %v9319_v4  ;;  %v9322_v43 = vld [vmem:[#allocation181_spill] sm:$0xff]  ;;  %v9339_v12 = vld [vmem:[#allocation259_spill] sm:$0xff] }
 0x5a1   :  { %v2804_v40 = vsel %vm2774_vm2, %v2739_v15, %v9321_v34  ;;  %v2853_v23 = vsel %vm2839_vm3, %v2788_v8, %v9322_v43  ;;  %v9341_v11 = vld [vmem:[#allocation325_spill] sm:$0xff]  ;;  %v9343_v34 = vld [vmem:[#allocation43_spill] sm:$0xff] }
 0x5a2   :  { %v2869_v28 = vsel %vm2839_vm3, %v2804_v40, %v9323_v56  ;;  %v2918_v39 = vsel %vm2904_vm4, %v2853_v23, %v9324_v7  ;;  %v4329_v56 = vld [vmem:[%s8616_s0 + $0x168] sm:$0xff]  ;;  %v9345_v7 = vld [vmem:[#allocation107_spill] sm:$0xff] }
 0x5a3   :  { %v3386_v32 = vpop.f32.mrf.mxu0  ;;  %v3434_v22 = vpop.f32.mrf.mxu1  ;;  %v2934_v27 = vsel %vm2904_vm4, %v2869_v28, %v9325_v46  ;;  %v2983_v37 = vsel %vm2969_vm5, %v2918_v39, %v9326_v35  ;;  %v9346_v39 = vld [vmem:[#allocation90_spill] sm:$0xff]  ;;  %v9354_v60 = vld [vmem:[#allocation299_spill] sm:$0xff] }
 0x5a4   :  { %v2509_v20 = vpop.permute.xlu1 %2508  ;;  %3608 = vxpose.xlu0.b32.cont [2/16] (narrow) %v3434_v22, 8  ;;  %3576 = vxpose.xlu2.b32.cont [2/16] (narrow) %v3386_v32, 8  ;;  %v2999_v2 = vsel %vm2969_vm5, %v2934_v27, %v9327_v3  ;;  %v3048_v14 = vsel %vm3034_vm6, %v2983_v37, %v9328_v58  ;;  %v9331_v32 = vld [vmem:[#allocation52_spill] sm:$0xff]  ;;  %v9347_v27 = vld [vmem:[#allocation157_spill] sm:$0xff] }
 0x5a5   :  { %v2477_v25 = vpop.permute.xlu0 %2476  ;;  %v3128_v18 = vsel %vm3099_vm8, %v3063_v50, %v2509_v20  ;;  %v3064_v63 = vsel %vm3034_vm6, %v2999_v2, %v9329_v47  ;;  %v2691_v22 = vsel %vm2644_vm0, %v4327_v5, %v9331_v32  ;;  %v9335_v50 = vld [vmem:[#allocation158_spill] sm:$0xff]  ;;  %v9348_v37 = vld [vmem:[#allocation132_spill] sm:$0xff] }
 0x5a6   :  { %v3112_v6 = vsel %vm3099_vm8, %v3047_v45, %v2477_v25  ;;  %v3129_v54 = vsel %vm3099_vm8, %v3064_v63, %v2511_v44  ;;  %v2756_v17 = vsel %vm2709_vm1, %v2691_v22, %v9333_v48  ;;  %v2481_v25 = vpop.permute.xlu2 %2480  ;;  %v4328_v44 = vld [vmem:[%s8616_s0 + $0x260] sm:$0xff]  ;;  %v9350_v2 = vld [vmem:[#allocation200_spill] sm:$0xff]  ;;  %v9352_v63 = vld [vmem:[#allocation254_spill] sm:$0xff] }
 0x5a7   :  { %4187 = vmatmul.msk.f32.gmra.mxu0 %vm3169_vm9, %v3112_v6  ;;  %4203 = vmatmul.msk.f32.gmra.mxu1 %vm3169_vm9, %v3128_v18  ;;  %v2821_v20 = vsel %vm2774_vm2, %v2756_v17, %v9335_v50  ;;  %v9338_v18 = vld [vmem:[#allocation240_spill] sm:$0xff]  ;;  %v2692_v40 = vsel %vm2644_vm0, %v4328_v44, %v9343_v34  ;;  %v9357_v50 = vld [vmem:[#allocation38_spill] sm:$0xff]  ;;  %v9367_v44 = vld [vmem:[#allocation313_spill] sm:$0xff] }
 0x5a8   :  { %4220 = vmatmul.msk.f32.gmra.mxu2 %vm3169_vm9, %v3145_v36  ;;  %v2886_v45 = vsel %vm2839_vm3, %v2821_v20, %v9337_v55  ;;  %v9342_v36 = vld [vmem:[#allocation339_spill] sm:$0xff]  ;;  %v9355_v5 = vld [vmem:[#allocation372_spill] sm:$0xff] }
 0x5a9   :  { %v2951_v0 = vsel %vm2904_vm4, %v2886_v45, %v9339_v12  ;;  %v9358_v55 = vld [vmem:[#allocation24_spill] sm:$0xff]  ;;  %v9360_v12 = vld [vmem:[#allocation75_spill] sm:$0xff] }
 0x5aa   :  { %v3016_v31 = vsel %vm2969_vm5, %v2951_v0, %v9341_v11  ;;  %v9363_v11 = vld [vmem:[#allocation199_spill] sm:$0xff] }
 0x5ab   :  { %v3389_v10 = vpop.f32.mrf.mxu0  ;;  %v3437_v29 = vpop.f32.mrf.mxu1  ;;  %v3081_v15 = vsel %vm3034_vm6, %v3016_v31, %v7170_v59  ;;  %v9344_v59 = vld [vmem:[#allocation39_spill] sm:$0xff] }
 0x5ac   :  { %v2479_v49 = vpop.permute.xlu1 %2478  ;;  %3609 = vxpose.xlu0.b32.cont [3/16] (narrow) %v3437_v29, 8  ;;  %3577 = vxpose.xlu2.b32.cont [3/16] (narrow) %v3389_v10, 8  ;;  %v2675_v28 = vsel %vm2644_vm0, %v4329_v56, %v9344_v59  ;;  %v9349_v29 = vld [vmem:[#allocation204_spill] sm:$0xff]  ;;  %v9369_v59 = vld [vmem:[#allocation367_spill] sm:$0xff] }
 0x5ad   :  { %v2575_v19 = vpop.permute.xlu0 %2574  ;;  %v3113_v41 = vsel %vm3099_vm8, %v3048_v14, %v2479_v49  ;;  %v2740_v46 = vsel %vm2709_vm1, %v2675_v28, %v9346_v39  ;;  %v9351_v14 = vld [vmem:[#allocation271_spill] sm:$0xff] }
 0x5ae   :  { %v3161_v52 = vsel %vm3099_vm8, %v7439_v24, %v2575_v19  ;;  %v2724_v24 = vsel %vm2709_vm1, %v2659_v42, %v9332_v62  ;;  %v2805_v10 = vsel %vm2774_vm2, %v2740_v46, %v9348_v37  ;;  %v2579_v22 = vpop.permute.xlu2 %2578 }
 0x5af   :  { %4188 = vmatmul.msk.f32.gmra.mxu0 %vm3169_vm9, %v3113_v41  ;;  %4204 = vmatmul.msk.f32.gmra.mxu1 %vm3169_vm9, %v3129_v54  ;;  %v2789_v9 = vsel %vm2774_vm2, %v2724_v24, %v9334_v21  ;;  %v2870_v58 = vsel %vm2839_vm3, %v2805_v10, %v9350_v2  ;;  %v9353_v41 = vld [vmem:[#allocation324_spill] sm:$0xff] }
 0x5b0   :  { %4236 = vmatmul.msk.f32.gmra.mxu3 %vm3169_vm9, %v3161_v52  ;;  %v2854_v57 = vsel %vm2839_vm3, %v2789_v9, %v9336_v51  ;;  %v2935_v19 = vsel %vm2904_vm4, %v2870_v58, %v9352_v63  ;;  %v9356_v24 = vld [vmem:[#allocation368_spill] sm:$0xff]  ;;  %v4330_v9 = vld [vmem:[%s8616_s0 + $0x170] sm:$0xff] }
 0x5b1   :  { %v2919_v30 = vsel %vm2904_vm4, %v2854_v57, %v9338_v18  ;;  %v3000_v42 = vsel %vm2969_vm5, %v2935_v19, %v9354_v60  ;;  %v2676_v20 = vsel %vm2644_vm0, %v4330_v9, %v9357_v50  ;;  %v4331_v57 = vld [vmem:[%s8616_s0 + $0xb0] sm:$0xff] }
 0x5b2   :  { %v2984_v53 = vsel %vm2969_vm5, %v2919_v30, %v9340_v16  ;;  %v3065_v48 = vsel %vm3034_vm6, %v3000_v42, %v9356_v24  ;;  %v2660_v45 = vsel %vm2644_vm0, %v4331_v57, %v9358_v55  ;;  %v3163_v30 = vsel %vm3099_vm8, %v7518_v61, %v2579_v22  ;;  %v9362_v16 = vld [vmem:[#allocation118_spill] sm:$0xff] }
 0x5b3   :  { %v3392_v26 = vpop.f32.mrf.mxu0  ;;  %v3440_v6 = vpop.f32.mrf.mxu1  ;;  %v3049_v4 = vsel %vm3034_vm6, %v2984_v53, %v9342_v36  ;;  %v2725_v0 = vsel %vm2709_vm1, %v2660_v45, %v9360_v12 }
 0x5b4   :  { %v2577_v1 = vpop.permute.xlu1 %2576  ;;  %3610 = vxpose.xlu0.b32.cont [4/16] (narrow) %v3440_v6, 8  ;;  %3578 = vxpose.xlu2.b32.cont [4/16] (narrow) %v3392_v26, 8  ;;  %v3114_v43 = vsel %vm3099_vm8, %v3049_v4, %v2481_v25  ;;  %v9359_v25 = vld [vmem:[#allocation80_spill] sm:$0xff]  ;;  %v9361_v26 = vld [vmem:[#allocation146_spill] sm:$0xff]  ;;  %v2790_v53 = vsel %vm2774_vm2, %v2725_v0, %v9362_v16 }
 0x5b5   :  { %v2545_v33 = vpop.permute.xlu0 %2544  ;;  %v3162_v8 = vsel %vm3099_vm8, %v7268_v38, %v2577_v1  ;;  %v2757_v38 = vsel %vm2709_vm1, %v2692_v40, %v9345_v7  ;;  %v2741_v18 = vsel %vm2709_vm1, %v2676_v20, %v9359_v25  ;;  %v9364_v1 = vld [vmem:[#allocation185_spill] sm:$0xff]  ;;  %v9365_v4 = vld [vmem:[#allocation244_spill] sm:$0xff] }
 0x5b6   :  { %v3146_v23 = vsel %vm3099_vm8, %v3081_v15, %v2545_v33  ;;  %v2822_v35 = vsel %vm2774_vm2, %v2757_v38, %v9347_v27  ;;  %v2806_v6 = vsel %vm2774_vm2, %v2741_v18, %v9361_v26  ;;  %v2855_v36 = vsel %vm2839_vm3, %v2790_v53, %v9364_v1  ;;  %v9366_v33 = vld [vmem:[#allocation239_spill] sm:$0xff]  ;;  %v9370_v38 = vld [vmem:[#allocation353_spill] sm:$0xff] }
 0x5b7   :  { %4189 = vmatmul.msk.f32.gmra.mxu0 %vm3169_vm9, %v3114_v43  ;;  %4221 = vmatmul.msk.f32.gmra.mxu2 %vm3169_vm9, %v3146_v23  ;;  %v2887_v3 = vsel %vm2839_vm3, %v2822_v35, %v9349_v29  ;;  %v2871_v31 = vsel %vm2839_vm3, %v2806_v6, %v9363_v11  ;;  %v9368_v23 = vld [vmem:[#allocation284_spill] sm:$0xff] }
 0x5b8   :  { %4237 = vmatmul.msk.f32.gmra.mxu3 %vm3169_vm9, %v3162_v8  ;;  %v2952_v49 = vsel %vm2904_vm4, %v2887_v3, %v9351_v14  ;;  %v2936_v61 = vsel %vm2904_vm4, %v2871_v31, %v9365_v4  ;;  %v2920_v8 = vsel %vm2904_vm4, %v2855_v36, %v9366_v33 }
 0x5b9   :  { %v3017_v54 = vsel %vm2969_vm5, %v2952_v49, %v9353_v41  ;;  %v3001_v34 = vsel %vm2969_vm5, %v2936_v61, %v9367_v44  ;;  %v2985_v56 = vsel %vm2969_vm5, %v2920_v8, %v9368_v23 }
 0x5ba   :  { %v3479_v47 = vpop.f32.mrf.mxu2  ;;  %v3082_v32 = vsel %vm3034_vm6, %v3017_v54, %v9355_v5  ;;  %v3066_v28 = vsel %vm3034_vm6, %v3001_v34, %v9369_v59  ;;  %v3050_v39 = vsel %vm3034_vm6, %v2985_v56, %v9370_v38 }
 0x5bb   :  { %3639 = vxpose.xlu1.b32.start [1/16] (narrow) %v3479_v47, 8  ;;  %v3395_v52 = vpop.f32.mrf.mxu0  ;;  %v3443_v13 = vpop.f32.mrf.mxu1 }
 0x5bc   :  { %3611 = vxpose.xlu0.b32.cont [5/16] (narrow) %v3443_v13, 8  ;;  %3579 = vxpose.xlu2.b32.cont [5/16] (narrow) %v3395_v52, 8 }
 0x5bd   :  { %v2513_v17 = vpop.permute.xlu0 %2512 }
 0x5be   :  { %v3130_v51 = vsel %vm3099_vm8, %v3065_v48, %v2513_v17 }
 0x5bf   :  { %4205 = vmatmul.msk.f32.gmra.mxu1 %vm3169_vm9, %v3130_v51  ;;  %v3527_v51 = vpop.f32.mrf.mxu3 }
 0x5c0   :  { %v2547_v62 = vpop.permute.xlu1 %2546  ;;  %4238 = vmatmul.msk.f32.gmra.mxu3 %vm3169_vm9, %v3163_v30 }
 0x5c1   :  { %v3147_v21 = vsel %vm3099_vm8, %v3082_v32, %v2547_v62 }
 0x5c2   :  { %4222 = vmatmul.msk.f32.gmra.mxu2 %vm3169_vm9, %v3147_v21  ;;  %v3482_v15 = vpop.f32.mrf.mxu2 }
 0x5c3   :  { %3640 = vxpose.xlu1.b32.cont [2/16] (narrow) %v3482_v15, 8 }
 0x5c5   :  { %v3398_v40 = vpop.f32.mrf.mxu0 }
 0x5c6   :  { %v3446_v43 = vpop.f32.mrf.mxu1  ;;  %3580 = vxpose.xlu2.b32.cont [6/16] (narrow) %v3398_v40, 8  ;;  %v2483_v46 = vpop.permute.xlu0 %2482 }
 0x5c7   :  { %3612 = vxpose.xlu0.b32.cont [6/16] (narrow) %v3446_v43, 8  ;;  %v3115_v35 = vsel %vm3099_vm8, %v3050_v39, %v2483_v46  ;;  %v3530_v45 = vpop.f32.mrf.mxu3 }
 0x5c8   :  { %v2515_v7 = vpop.permute.xlu1 %2514  ;;  %4190 = vmatmul.msk.f32.gmra.mxu0 %vm3169_vm9, %v3115_v35 }
 0x5c9   :  { %v3131_v27 = vsel %vm3099_vm8, %v3066_v28, %v2515_v7 }
 0x5ca   :  { %4206 = vmatmul.msk.f32.gmra.mxu1 %vm3169_vm9, %v3131_v27 }
 0x5cc   :  { %v3485_v37 = vpop.f32.mrf.mxu2 }
 0x5cd   :  { %3641 = vxpose.xlu1.b32.cont [3/16] (narrow) %v3485_v37, 8  ;;  %v4366_v37 = vmov 512.0  }
 0x5ce   :  { %v3401_v10 = vpop.f32.mrf.mxu0  ;;  %4268 = vrcp.f32 %v4366_v37 }
 0x5cf   :  { %3581 = vxpose.xlu2.b32.cont [7/16] (narrow) %v3401_v10, 8  ;;  %v3533_v0 = vpop.f32.mrf.mxu3 }
 0x5d0   :  { %v3449_v29 = vpop.f32.mrf.mxu1 }
 0x5d1   :  { %3613 = vxpose.xlu0.b32.cont [7/16] (narrow) %v3449_v29, 8 }
 0x5d4   :  { %v4269_v10 = vpop.eup %4268 }
 0x5d5   :  { %v3709_v29 = vmul.f32 512.0, %v4269_v10  ;;  %vm3713_vm10 = vweird.f32 %v4269_v10 }
 0x5d6   :  { %v3488_v3 = vpop.f32.mrf.mxu2  ;;  %v3404_v2 = vpop.f32.mrf.mxu0 }
 0x5d7   :  { %3642 = vxpose.xlu1.b32.cont [4/16] (narrow) %v3488_v3, 8  ;;  %3582 = vxpose.xlu2.b32.cont [8/16] (narrow) %v3404_v2, 8  ;;  %v3536_v26 = vpop.f32.mrf.mxu3  ;;  %v3710_v3 = vsub.f32 1.0, %v3709_v29 }
 0x5d8   :  { %v3452_v58 = vpop.f32.mrf.mxu1 }
 0x5d9   :  { %3614 = vxpose.xlu0.b32.cont [8/16] (narrow) %v3452_v58, 8  ;;  %v3711_v2 = vmul.f32 %v4269_v10, %v3710_v3  ;;  %v4367_v58 = vmov 0  }
 0x5de   :  { %v3491_v14 = vpop.f32.mrf.mxu2 }
 0x5df   :  { %3643 = vxpose.xlu1.b32.cont [5/16] (narrow) %v3491_v14, 8  ;;  %v3539_v6 = vpop.f32.mrf.mxu3  ;;  %v3712_v14 = vadd.f32 %v4269_v10, %v3711_v2 }
 0x5e1   :  { %v3407_v49 = vpop.f32.mrf.mxu0 }
 0x5e2   :  { %3583 = vxpose.xlu2.b32.cont [9/16] (narrow) %v3407_v49, 8  ;;  %v3714_v49 = vsel %vm3713_vm10, %v4269_v10, %v3712_v14 }
 0x5e7   :  { %v3494_v47 = vpop.f32.mrf.mxu2 }
 0x5e8   :  { %3644 = vxpose.xlu1.b32.cont [6/16] (narrow) %v3494_v47, 8  ;;  %v3542_v16 = vpop.f32.mrf.mxu3 }
 0x5ef   :  { %v3497_v63 = vpop.f32.mrf.mxu2 }
 0x5f0   :  { %3645 = vxpose.xlu1.b32.cont [7/16] (narrow) %v3497_v63, 8  ;;  %v3545_v53 = vpop.f32.mrf.mxu3 }
 0x5f7   :  { %v3500_v19 = vpop.f32.mrf.mxu2 }
 0x5f8   :  { %3646 = vxpose.xlu1.b32.cont [8/16] (narrow) %v3500_v19, 8  ;;  %v3548_v11 = vpop.f32.mrf.mxu3 }
 0x5fc   :  { %v3455_v54 = vpop.f32.mrf.mxu1 }
 0x5fd   :  { %3615 = vxpose.xlu0.b32.cont [9/16] (narrow) %v3455_v54, 8 }
 0x5ff   :  { %v3503_v41 = vpop.f32.mrf.mxu2 }
 0x600   :  { %3647 = vxpose.xlu1.b32.cont [9/16] (narrow) %v3503_v41, 8  ;;  %v3551_v31 = vpop.f32.mrf.mxu3 }
 0x604   :  { %v3410_v13 = vpop.f32.mrf.mxu0  ;;  %v3458_v60 = vpop.f32.mrf.mxu1 }
 0x605   :  { %3616 = vxpose.xlu0.b32.cont [10/16] (narrow) %v3458_v60, 8  ;;  %3584 = vxpose.xlu2.b32.cont [10/16] (narrow) %v3410_v13, 8 }
 0x607   :  { %v3506_v52 = vpop.f32.mrf.mxu2 }
 0x608   :  { %3648 = vxpose.xlu1.b32.cont [10/16] (narrow) %v3506_v52, 8  ;;  %v3554_v1 = vpop.f32.mrf.mxu3 }
 0x60c   :  { %v3413_v5 = vpop.f32.mrf.mxu0  ;;  %v3461_v32 = vpop.f32.mrf.mxu1 }
 0x60d   :  { %3617 = vxpose.xlu0.b32.cont [11/16] (narrow) %v3461_v32, 8  ;;  %3585 = vxpose.xlu2.b32.cont [11/16] (narrow) %v3413_v5, 8 }
 0x60f   :  { %v3509_v42 = vpop.f32.mrf.mxu2 }
 0x610   :  { %3649 = vxpose.xlu1.b32.cont [11/16] (narrow) %v3509_v42, 8 }
 0x613   :  { %v3557_v36 = vpop.f32.mrf.mxu3 }
 0x614   :  { %v3416_v22 = vpop.f32.mrf.mxu0 }
 0x615   :  { %3586 = vxpose.xlu2.b32.cont [12/16] (narrow) %v3416_v22, 8 }
 0x61a   :  { %v3512_v62 = vpop.f32.mrf.mxu2 }
 0x61b   :  { %3650 = vxpose.xlu1.b32.cont [12/16] (narrow) %v3512_v62, 8  ;;  %v3560_v4 = vpop.f32.mrf.mxu3 }
 0x61c   :  { %v3464_v24 = vpop.f32.mrf.mxu1 }
 0x61d   :  { %3618 = vxpose.xlu0.b32.cont [12/16] (narrow) %v3464_v24, 8  ;;  %v3729_v24 = vld [vmem:[%s8618_s2] sm:$0xff]  ;;  %s4368_s2 = smov [#allocation2]  }
 0x61e   :  { %s3776_s22 = sshll.u32 %s4368_s2, 4  ;;  %s3777_s22 = int_to_ptr.vmem [resolvable:$true] %s3776_s22 }
 0x622   :  { %v3515_v48 = vpop.f32.mrf.mxu2 }
 0x623   :  { %3651 = vxpose.xlu1.b32.cont [13/16] (narrow) %v3515_v48, 8  ;;  %v3563_v61 = vpop.f32.mrf.mxu3 }
 0x624   :  { %v3419_v17 = vpop.f32.mrf.mxu0  ;;  %v3467_v21 = vpop.f32.mrf.mxu1 }
 0x625   :  { %3619 = vxpose.xlu0.b32.cont [13/16] (narrow) %v3467_v21, 8  ;;  %3587 = vxpose.xlu2.b32.cont [13/16] (narrow) %v3419_v17, 8 }
 0x62b   :  { %v3518_v9 = vpop.f32.mrf.mxu2 }
 0x62c   :  { %3652 = vxpose.xlu1.b32.cont [14/16] (narrow) %v3518_v9, 8  ;;  %v3422_v50 = vpop.f32.mrf.mxu0  ;;  %v3470_v20 = vpop.f32.mrf.mxu1  ;;  %v3742_v9 = vld [vmem:[%s8619_s3] sm:$0xff] }
 0x62d   :  { %3620 = vxpose.xlu0.b32.cont [14/16] (narrow) %v3470_v20, 8  ;;  %3588 = vxpose.xlu2.b32.cont [14/16] (narrow) %v3422_v50, 8 }
 0x633   :  { %v3566_v15 = vpop.f32.mrf.mxu3 }
 0x634   :  { %v3425_v57 = vpop.f32.mrf.mxu0 }
 0x635   :  { %3589 = vxpose.xlu2.b32.cont [15/16] (narrow) %v3425_v57, 8 }
 0x63a   :  { %v3521_v55 = vpop.f32.mrf.mxu2 }
 0x63b   :  { %3653 = vxpose.xlu1.b32.cont [15/16] (narrow) %v3521_v55, 8  ;;  %v3569_v33 = vpop.f32.mrf.mxu3 }
 0x63c   :  { %v3473_v25 = vpop.f32.mrf.mxu1 }
 0x63d   :  { %3621 = vxpose.xlu0.b32.cont [15/16] (narrow) %v3473_v25, 8 }
 0x643   :  { %v3572_v8 = vpop.f32.mrf.mxu3 }
 0x645   :  { %v3524_v18 = vpop.f32.mrf.mxu2  ;;  %v3428_v30 = vpop.f32.mrf.mxu0 }
 0x646   :  { %3654 = vxpose.xlu1.b32.end [16/16] (narrow) %v3524_v18, 8  ;;  %3590 = vxpose.xlu2.b32.end [16/16] (narrow) %v3428_v30, 8 }
 0x647   :  { %v3476_v12 = vpop.f32.mrf.mxu1 }
 0x648   :  { %3622 = vxpose.xlu0.b32.end [16/16] (narrow) %v3476_v12, 8 }
 0x64e   :  { %3671 = vxpose.xlu2.b32.start [1/16] (narrow) %v3527_v51, 8 }
 0x656   :  { %3672 = vxpose.xlu2.b32.cont [2/16] (narrow) %v3530_v45, 8 }
 0x65e   :  { %3673 = vxpose.xlu2.b32.cont [3/16] (narrow) %v3533_v0, 8 }
 0x666   :  { %3674 = vxpose.xlu2.b32.cont [4/16] (narrow) %v3536_v26, 8 }
 0x667   :  { %v3591_v34 = vpop.trf.xlu2 }
 0x668   :  { %v3716_v43 = vmul.f32 %v3591_v34, %v3591_v34 }
 0x66e   :  { %3675 = vxpose.xlu2.b32.cont [5/16] (narrow) %v3539_v6, 8 }
 0x672   :  { %v3655_v23 = vpop.trf.xlu1 }
 0x673   :  { %v3718_v28 = vmul.f32 %v3655_v23, %v3655_v23 }
 0x674   :  { %v3623_v44 = vpop.trf.xlu0 }
 0x675   :  { %v3717_v40 = vmul.f32 %v3623_v44, %v3623_v44  ;;  %v3703_v56 = vadd.f32 %v3623_v44, %v3591_v34 }
 0x676   :  { %3676 = vxpose.xlu2.b32.cont [6/16] (narrow) %v3542_v16, 8 }
 0x677   :  { %v3720_v59 = vadd.f32 %v3717_v40, %v3716_v43  ;;  %v3704_v7 = vadd.f32 %v3703_v56, %v3655_v23 }
 0x679   :  { %v3721_v39 = vadd.f32 %v3720_v59, %v3718_v28 }
 0x67e   :  { %3677 = vxpose.xlu2.b32.cont [7/16] (narrow) %v3545_v53, 8 }
 0x686   :  { %3678 = vxpose.xlu2.b32.cont [8/16] (narrow) %v3548_v11, 8 }
 0x68e   :  { %3679 = vxpose.xlu2.b32.cont [9/16] (narrow) %v3551_v31, 8 }
 0x696   :  { %3680 = vxpose.xlu2.b32.cont [10/16] (narrow) %v3554_v1, 8 }
 0x699   :  { %4267 = vset.pattern.permute.xlu1 %v4367_v58 }
 0x69e   :  { %3681 = vxpose.xlu2.b32.cont [11/16] (narrow) %v3557_v36, 8 }
 0x6a6   :  { %3682 = vxpose.xlu2.b32.cont [12/16] (narrow) %v3560_v4, 8 }
 0x6ae   :  { %3683 = vxpose.xlu2.b32.cont [13/16] (narrow) %v3563_v61, 8 }
 0x6af   :  { %4266 = vset.pattern.permute.xlu0 %v4367_v58 }
 0x6b6   :  { %3684 = vxpose.xlu2.b32.cont [14/16] (narrow) %v3566_v15, 8 }
 0x6be   :  { %3685 = vxpose.xlu2.b32.cont [15/16] (narrow) %v3569_v33, 8 }
 0x6c6   :  { %3686 = vxpose.xlu2.b32.end [16/16] (narrow) %v3572_v8, 8 }
 0x6e7   :  { %v3687_v38 = vpop.trf.xlu2 }
 0x6e8   :  { %v3705_v46 = vadd.f32 %v3704_v7, %v3687_v38  ;;  %v3719_v27 = vmul.f32 %v3687_v38, %v3687_v38 }
 0x6ea   :  { %v3722_v35 = vadd.f32 %v3721_v39, %v3719_v27  ;;  %3706 = vadd.xlane.f32.xlu0 %v3705_v46 }
 0x6ec   :  { %3723 = vadd.xlane.f32.xlu1 %v3722_v35 }
 0x75d   :  { %v3707_v47 = vpop.xlane.xlu0 %3706 }
 0x75e   :  { %v3715_v63 = vmul.f32 %v3714_v49, %v3707_v47 }
 0x75f   :  { %v3724_v19 = vpop.xlane.xlu1 %3723 }
 0x760   :  { %v3726_v41 = vmul.f32 %v3715_v63, %v3715_v63  ;;  %v3725_v54 = vmul.f32 %v3724_v19, %v3714_v49 }
 0x762   :  { %v3727_v52 = vsub.f32 %v3725_v54, %v3726_v41 }
 0x764   :  { %v3728_v13 = vmax.f32 %v3727_v52, 0.0 }
 0x766   :  { %v3730_v60 = vadd.f32 1e-05, %v3728_v13 }
 0x768   :  { %4270 = vrsqrt.f32 %v3730_v60  ;;  %vm3737_vm12 = vweird.f32 %v3730_v60 }
 0x76e   :  { %v4271_v42 = vpop.eup %4270 }
 0x76f   :  { %v3732_v5 = vmul.f32 %v4271_v42, %v3730_v60  ;;  %vm3738_vm11 = vweird.f32 %v4271_v42 }
 0x770   :  { %vm3739_vm13 = vmor %vm3737_vm12, %vm3738_vm11 }
 0x771   :  { %v3733_v32 = vmul.f32 %v4271_v42, %v3732_v5 }
 0x773   :  { %v3734_v22 = vmul.f32 0.5, %v3733_v32 }
 0x775   :  { %v3735_v62 = vsub.f32 1.5, %v3734_v22 }
 0x777   :  { %v3736_v48 = vmul.f32 %v4271_v42, %v3735_v62 }
 0x779   :  { %v3740_v17 = vsel %vm3739_vm13, %v4271_v42, %v3736_v48 }
 0x77a   :  { %v3741_v21 = vmul.f32 %v3740_v17, %v3729_v24 }
 0x77c   :  { %3747 = vperm.xlu0 %4266, %v3741_v21   ;;  %v3743_v50 = vmul.f32 %v3741_v21, %v3715_v63 }
 0x77e   :  { %v3744_v20 = vsub.f32 %v3742_v9, %v3743_v50 }
 0x780   :  { %3756 = vperm.xlu1 %4267, %v3744_v20  }
 0x7ee   :  { %v3748_v51 = vpop.permute.xlu0 %3747 }
 0x7ef   :  { %v3750_v57 = vmul.f32 %v3748_v51, %v3591_v34  ;;  %v3751_v55 = vmul.f32 %v3748_v51, %v3623_v44  ;;  %v3752_v45 = vmul.f32 %v3748_v51, %v3655_v23  ;;  %v3753_v25 = vmul.f32 %v3748_v51, %v3687_v38 }
 0x7f2   :  { %v3757_v18 = vpop.permute.xlu1 %3756 }
 0x7f3   :  { %v3759_v30 = vadd.f32 %v3757_v18, %v3750_v57  ;;  %v3760_v12 = vadd.f32 %v3757_v18, %v3751_v55  ;;  %v3761_v0 = vadd.f32 %v3757_v18, %v3752_v45  ;;  %v3762_v26 = vadd.f32 %v3757_v18, %v3753_v25 }
 0x7f5   :  { %v3763_v6 = vmax.f32 %v3759_v30, 0.0  ;;  %v3764_v16 = vmax.f32 %v3760_v12, 0.0  ;;  %v3765_v53 = vmax.f32 %v3761_v0, 0.0  ;;  %v3766_v11 = vmax.f32 %v3762_v26, 0.0 }
 0x7f7   :  { %3767 = vst [vmem:[#allocation2] sm:$0xff] %v3763_v6 }
 0x7f8   :  { %3768 = vst [vmem:[#allocation2 + $0x8] sm:$0xff] %v3764_v16 }
 0x7f9   :  { %3770 = vst [vmem:[#allocation2 + $0x10] sm:$0xff] %v3765_v53 }
 0x7fa   :  { %3771 = vst [vmem:[#allocation2 + $0x18] sm:$0xff] %v3766_v11 }
 0x7fb   :  { %3784 = dma.vmem_to_hbm [thread:$0]  %s3777_s22, 512, %s3779_s26, [#allocation3], %s4369_s27, %s4369_s27, %s4361_s5  }
 0x7fc   :  { %4356 = dma.done.wait [#allocation3], 512  }
 0x7fd   :  { %4357 = vsyncadd [#allocation3], 4294966784 }
 0x7fe   :  { %3789 = vsyncpa [#allocation3], 1 }

</bundles_post_ra>
